<compile_context>
chip_gen: v5e
topology: v5e:2x2
jax: 0.10.0
libtpu: 0.0.40
codegen_flags: <defaults>
</compile_context>

<pallas_src>
import jax
import jax.numpy as jnp
import numpy as np
from jax.experimental import pallas as pl
from jax.experimental.pallas import tpu as pltpu


def coord_att_kernel(x_ref, kh_ref, bh_ref, kw_ref, bw_ref,
                     w1_ref, b1_ref, w23_ref, b23_ref, o_ref):
    bt, HW, C = x_ref.shape
    oup = o_ref.shape[-1]
    W = kh_ref.shape[0]                                   # (1,7) kernel -> pool over W
    H = kw_ref.shape[0]                                   # (7,1) kernel -> pool over H

    # Channels-last: C rides the 128-wide lane dim throughout (lane-dense loads/stores).
    x = x_ref[...].astype(jnp.float32).reshape(bt, H, W, C)

    kh = kh_ref[...]                                      # (W, C): Linear_h (1,7) kernel, BN-scaled
    kw = kw_ref[...]                                      # (H, C): Linear_w (7,1) kernel, BN-scaled

    # Depthwise "pooling" convs (BN folded into kernel + per-channel bias).
    x_h = jnp.sum(x * kh[None, None, :, :], axis=2) + bh_ref[...]     # (bt, H, C)
    x_w = jnp.sum(x * kw[None, :, None, :], axis=1) + bw_ref[...]     # (bt, W, C)

    # torch.cat(dim=2) up to layout: stack h-rows and w-rows, flatten to one 2D slab so both
    # branches share a single MXU matmul per stage (no batched dot_general, no weight broadcast).
    y2d = jnp.concatenate([x_h.reshape(bt * H, C),
                           x_w.reshape(bt * W, C)], axis=0)           # (2*bt*7, C)

    # conv1 (1x1) + bn1 (folded) + h_swish  -- single (2*bt*7, C) x (C, mip) matmul.
    z = jnp.dot(y2d, w1_ref[...], preferred_element_type=jnp.float32) + b1_ref[...]
    z = z * (jnp.clip(z + 3.0, 0.0, 6.0) * (1.0 / 6.0))               # h_swish

    # conv2 | conv3 fused into one (mip, 2*oup) matmul, then sigmoid (EUP path).
    s = jnp.dot(z, w23_ref[...], preferred_element_type=jnp.float32) + b23_ref[...]
    att = jax.nn.sigmoid(s).reshape(2 * bt, H, 2 * oup)

    att_h = att[:bt, :, :oup]                             # conv2(sigmoid) on the h rows: (bt, H, oup)
    att_w = att[bt:, :, oup:]                             # conv3(sigmoid) on the w rows: (bt, W, oup)

    # out[b, h, w, o] = att_h[b, h, o] * att_w[b, w, o]   (== expand + multiply in the torch code)
    out = att_h[:, :, None, :] * att_w[:, None, :, :]                 # (bt, H, W, oup)
    o_ref[...] = out.reshape(bt, H * W, oup).astype(o_ref.dtype)


def coord_att(x_nchw, params, *, bt=None, min_steps=1, eps=1e-5):
    """CoordAtt forward. x_nchw: (B, C, 7, 7) -> (B, oup, 7, 7).

    min_steps: minimum number of grid steps. Keep 1 on single-TensorCore parts (v5e/v6e);
    use 2 on dual-TensorCore v7x so both cores get work.
    """
    B, C, H, W = x_nchw.shape
    if H != 7 or W != 7:
        raise ValueError("CoordAtt's (1,7)/(7,1) convs + expand imply a 7x7 feature map")
    mip = params["w1"].shape[0]
    oup = params["w2"].shape[0]

    if bt is None:
        # Largest divisor of B with bt <= 16 (M = 2*bt*7 <= 224 nearly fills the MXU row dim)
        # while keeping at least `min_steps` grid steps.
        bt = 1
        for cand in range(min(B, 16), 0, -1):
            if B % cand == 0 and B // cand >= min_steps:
                bt = cand
                break
    assert B % bt == 0

    # NCHW -> channels-last, spatial flattened: (B, H*W, C). Lane dim = C (dense for C=128),
    # sublane dim = 49 (single masked tail vreg per block). These reshapes are layout plumbing
    # that XLA fuses into the surrounding graph.
    x = jnp.transpose(x_nchw, (0, 2, 3, 1)).reshape(B, H * W, C)

    f32 = jnp.float32

    def bn_fold(bn):
        a = bn["gamma"] / jnp.sqrt(bn["var"] + eps)
        return a.astype(f32), (bn["beta"] - a * bn["mean"]).astype(f32)

    # Linear_h / Linear_w: depthwise conv (bias-free) + BN  ->  scaled kernel + per-channel bias.
    a_h, b_h = bn_fold(params["bn_h"])
    kh = (params["wh"] * a_h[:, None]).T.astype(f32)                     # (7, C), kernel over W
    bh = b_h.reshape(1, C)
    a_w, b_w = bn_fold(params["bn_w"])
    kw = (params["ww"] * a_w[:, None]).T.astype(f32)                     # (7, C), kernel over H
    bw = b_w.reshape(1, C)

    # conv1 (with bias) + bn1  ->  scaled weight + bias.
    a1, bb1 = bn_fold(params["bn1"])
    w1t = (params["w1"] * a1[:, None]).T.astype(f32)                     # (C, mip)
    b1 = (a1 * params["b1"] + bb1).reshape(1, mip)

    # conv2 | conv3 fused side by side.
    w23t = jnp.concatenate([params["w2"].T, params["w3"].T], axis=1).astype(f32)   # (mip, 2*oup)
    b23 = jnp.concatenate([params["b2"], params["b3"]]).reshape(1, 2 * oup).astype(f32)

    grid_spec = pltpu.PrefetchScalarGridSpec(
        num_scalar_prefetch=0,
        grid=(B // bt,),
        in_specs=[
            pl.BlockSpec((bt, H * W, C), lambda b: (b, 0, 0)),       # x, channels-last, flat spatial
            pl.BlockSpec((W, C), lambda b: (0, 0)),                  # kh (BN folded)
            pl.BlockSpec((1, C), lambda b: (0, 0)),                  # bh
            pl.BlockSpec((H, C), lambda b: (0, 0)),                  # kw (BN folded)
            pl.BlockSpec((1, C), lambda b: (0, 0)),                  # bw
            pl.BlockSpec((C, mip), lambda b: (0, 0)),                # W1^T (bn1 folded)
            pl.BlockSpec((1, mip), lambda b: (0, 0)),                # b1
            pl.BlockSpec((mip, 2 * oup), lambda b: (0, 0)),          # [W2^T | W3^T]
            pl.BlockSpec((1, 2 * oup), lambda b: (0, 0)),            # [b2 | b3]
        ],
        out_specs=pl.BlockSpec((bt, H * W, oup), lambda b: (b, 0, 0)),
    )

    out_flat = pl.pallas_call(
        coord_att_kernel,
        out_shape=jax.ShapeDtypeStruct((B, H * W, oup), x_nchw.dtype),
        grid_spec=grid_spec,
        compiler_params=pltpu.CompilerParams(
            dimension_semantics=("parallel",)),
    )(x, kh, bh, kw, bw, w1t, b1, w23t, b23)

    return jnp.transpose(out_flat.reshape(B, H, W, oup), (0, 3, 1, 2))


def coord_att_reference(x, p, eps=1e-5):
    """Pure-JAX reference matching the PyTorch CoordAtt.forward (NCHW, eval-mode BN, unfolded)."""
    B, C, H, W = x.shape

    def bn(y, bnp):
        inv = bnp["gamma"] / jnp.sqrt(bnp["var"] + eps)
        return (y - bnp["mean"][None, :, None, None]) * inv[None, :, None, None] \
               + bnp["beta"][None, :, None, None]

    x_h = jnp.einsum("bchw,cw->bch", x, p["wh"])[:, :, :, None]          # (B, C, H, 1)
    x_h = bn(x_h, p["bn_h"])
    x_w = jnp.einsum("bchw,ch->bcw", x, p["ww"])[:, :, None, :]          # (B, C, 1, W)
    x_w = bn(x_w, p["bn_w"])
    x_w = jnp.transpose(x_w, (0, 1, 3, 2))                               # (B, C, W, 1)

    y = jnp.concatenate([x_h, x_w], axis=2)                              # (B, C, H+W, 1)
    y = jnp.einsum("mc,bcsk->bmsk", p["w1"], y) + p["b1"][None, :, None, None]
    y = bn(y, p["bn1"])
    y = y * jnp.clip(y + 3.0, 0.0, 6.0) / 6.0                            # h_swish

    yh, yw = y[:, :, :H, :], y[:, :, H:, :]
    yw = jnp.transpose(yw, (0, 1, 3, 2))                                 # (B, mip, 1, W)
    a_h = jax.nn.sigmoid(jnp.einsum("om,bmsk->bosk", p["w2"], yh)
                         + p["b2"][None, :, None, None])                 # (B, oup, H, 1)
    a_w = jax.nn.sigmoid(jnp.einsum("om,bmsk->bosk", p["w3"], yw)
                         + p["b3"][None, :, None, None])                 # (B, oup, 1, W)
    return a_w * a_h                                                     # (B, oup, H, W)


def _bn_params(key, c):
    k1, k2, k3, k4 = jax.random.split(key, 4)
    return {
        "gamma": 1.0 + 0.1 * jax.random.normal(k1, (c,), jnp.float32),
        "beta": 0.1 * jax.random.normal(k2, (c,), jnp.float32),
        "mean": 0.1 * jax.random.normal(k3, (c,), jnp.float32),
        "var": 0.5 + jnp.abs(0.5 * jax.random.normal(k4, (c,), jnp.float32)),
    }


def make_params(key, inp, oup, groups=32):
    mip = max(8, inp // groups)
    ks = jax.random.split(key, 11)
    s = 0.1
    return {
        "wh": s * jax.random.normal(ks[0], (inp, 7), jnp.float32),   # Linear_h depthwise (1,7)
        "ww": s * jax.random.normal(ks[1], (inp, 7), jnp.float32),   # Linear_w depthwise (7,1)
        "bn_h": _bn_params(ks[2], inp),
        "bn_w": _bn_params(ks[3], inp),
        "w1": s * jax.random.normal(ks[4], (mip, inp), jnp.float32),
        "b1": s * jax.random.normal(ks[5], (mip,), jnp.float32),
        "bn1": _bn_params(ks[6], mip),
        "w2": s * jax.random.normal(ks[7], (oup, mip), jnp.float32),
        "b2": s * jax.random.normal(ks[8], (oup,), jnp.float32),
        "w3": s * jax.random.normal(ks[9], (oup, mip), jnp.float32),
        "b3": s * jax.random.normal(ks[10], (oup,), jnp.float32),
    }


if __name__ == "__main__":
    B, C, H, W = 4, 128, 7, 7     # 7x7 spatial is what the module's (1,7)/(7,1)/expand imply
    oup = C                       # typical CoordAtt usage: inp == oup
    key = jax.random.PRNGKey(0)
    kx, kp = jax.random.split(key)

    x = jax.random.normal(kx, (B, C, H, W), jnp.float32)
    params = make_params(kp, C, oup, groups=32)

    out = jax.block_until_ready(coord_att(x, params))
    ref = jax.block_until_ready(coord_att_reference(x, params))

    np.testing.assert_allclose(np.asarray(out), np.asarray(ref), atol=1e-4, rtol=1e-4)
    print("KERNEL_OK")
</pallas_src>

<mosaic_0001>
module attributes {stable_mosaic.version = 11 : i64} {
  func.func @coord_att_kernel(%arg0: i32, %arg1: memref<4x49x128xf32, #tpu.memory_space<vmem>>, %arg2: memref<7x128xf32, #tpu.memory_space<vmem>>, %arg3: memref<1x128xf32, #tpu.memory_space<vmem>>, %arg4: memref<7x128xf32, #tpu.memory_space<vmem>>, %arg5: memref<1x128xf32, #tpu.memory_space<vmem>>, %arg6: memref<128x8xf32, #tpu.memory_space<vmem>>, %arg7: memref<1x8xf32, #tpu.memory_space<vmem>>, %arg8: memref<8x256xf32, #tpu.memory_space<vmem>>, %arg9: memref<1x256xf32, #tpu.memory_space<vmem>>, %arg10: memref<4x49x128xf32, #tpu.memory_space<vmem>>) attributes {dimension_semantics = [#tpu.dimension_semantics<parallel>], iteration_bounds = array<i64: 1>, scalar_prefetch = 0 : i64, scratch_operands = 0 : i64, tpu.core_type = #tpu.core_type<tc>, window_params = [{transform_indices = @transform_0, window_bounds = array<i64: 4, 49, 128>}, {pipeline_mode = #tpu.pipeline_mode<synchronous>, transform_indices = @transform_1, window_bounds = array<i64: 7, 128>}, {pipeline_mode = #tpu.pipeline_mode<synchronous>, transform_indices = @transform_2, window_bounds = array<i64: 1, 128>}, {pipeline_mode = #tpu.pipeline_mode<synchronous>, transform_indices = @transform_3, window_bounds = array<i64: 7, 128>}, {pipeline_mode = #tpu.pipeline_mode<synchronous>, transform_indices = @transform_4, window_bounds = array<i64: 1, 128>}, {pipeline_mode = #tpu.pipeline_mode<synchronous>, transform_indices = @transform_5, window_bounds = array<i64: 128, 8>}, {pipeline_mode = #tpu.pipeline_mode<synchronous>, transform_indices = @transform_6, window_bounds = array<i64: 1, 8>}, {pipeline_mode = #tpu.pipeline_mode<synchronous>, transform_indices = @transform_7, window_bounds = array<i64: 8, 256>}, {pipeline_mode = #tpu.pipeline_mode<synchronous>, transform_indices = @transform_8, window_bounds = array<i64: 1, 256>}, {transform_indices = @transform_9, window_bounds = array<i64: 4, 49, 128>}]} {
    %c0 = arith.constant 0 : index
    %c0_0 = arith.constant 0 : index
    %c0_1 = arith.constant 0 : index
    %0 = vector.load %arg1[%c0, %c0_0, %c0_1] : memref<4x49x128xf32, #tpu.memory_space<vmem>>, vector<4x49x128xf32>
    %1 = vector.shape_cast %0 : vector<4x49x128xf32> to vector<4x7x7x128xf32>
    %c0_2 = arith.constant 0 : index
    %c0_3 = arith.constant 0 : index
    %2 = vector.load %arg2[%c0_2, %c0_3] : memref<7x128xf32, #tpu.memory_space<vmem>>, vector<7x128xf32>
    %c0_4 = arith.constant 0 : index
    %c0_5 = arith.constant 0 : index
    %3 = vector.load %arg4[%c0_4, %c0_5] : memref<7x128xf32, #tpu.memory_space<vmem>>, vector<7x128xf32>
    %4 = vector.shape_cast %2 : vector<7x128xf32> to vector<1x1x7x128xf32>
    %5 = vector.broadcast %4 : vector<1x1x7x128xf32> to vector<4x7x7x128xf32>
    %6 = arith.mulf %1, %5 : vector<4x7x7x128xf32>
    %cst = arith.constant dense<0.000000e+00> : vector<4x7x128xf32>
    %7 = vector.multi_reduction <add>, %6, %cst [2] : vector<4x7x7x128xf32> to vector<4x7x128xf32>
    %c0_6 = arith.constant 0 : index
    %c0_7 = arith.constant 0 : index
    %8 = vector.load %arg3[%c0_6, %c0_7] : memref<1x128xf32, #tpu.memory_space<vmem>>, vector<1x128xf32>
    %9 = vector.shape_cast %8 : vector<1x128xf32> to vector<1x1x128xf32>
    %10 = vector.broadcast %9 : vector<1x1x128xf32> to vector<4x7x128xf32>
    %11 = arith.addf %7, %10 : vector<4x7x128xf32>
    %12 = vector.shape_cast %3 : vector<7x128xf32> to vector<1x7x1x128xf32>
    %13 = vector.broadcast %12 : vector<1x7x1x128xf32> to vector<4x7x7x128xf32>
    %14 = arith.mulf %1, %13 : vector<4x7x7x128xf32>
    %cst_8 = arith.constant dense<0.000000e+00> : vector<4x7x128xf32>
    %15 = vector.multi_reduction <add>, %14, %cst_8 [1] : vector<4x7x7x128xf32> to vector<4x7x128xf32>
    %c0_9 = arith.constant 0 : index
    %c0_10 = arith.constant 0 : index
    %16 = vector.load %arg5[%c0_9, %c0_10] : memref<1x128xf32, #tpu.memory_space<vmem>>, vector<1x128xf32>
    %17 = vector.shape_cast %16 : vector<1x128xf32> to vector<1x1x128xf32>
    %18 = vector.broadcast %17 : vector<1x1x128xf32> to vector<4x7x128xf32>
    %19 = arith.addf %15, %18 : vector<4x7x128xf32>
    %20 = vector.shape_cast %11 : vector<4x7x128xf32> to vector<28x128xf32>
    %21 = vector.shape_cast %19 : vector<4x7x128xf32> to vector<28x128xf32>
    %22 = tpu.concatenate %20, %21 in 0 : vector<28x128xf32>, vector<28x128xf32> -> vector<56x128xf32>
    %c0_11 = arith.constant 0 : index
    %c0_12 = arith.constant 0 : index
    %23 = vector.load %arg6[%c0_11, %c0_12] : memref<128x8xf32, #tpu.memory_space<vmem>>, vector<128x8xf32>
    %cst_13 = arith.constant dense<0.000000e+00> : vector<56x8xf32>
    %24 = tpu.matmul %22, %23, %cst_13 {dimension_numbers = #tpu.dot_dimension_numbers<[1], [0], [0], [1], [0, 0, 1, 1], [], []>} : vector<56x128xf32>, vector<128x8xf32>, vector<56x8xf32> -> vector<56x8xf32>
    %c0_14 = arith.constant 0 : index
    %c0_15 = arith.constant 0 : index
    %25 = vector.load %arg7[%c0_14, %c0_15] : memref<1x8xf32, #tpu.memory_space<vmem>>, vector<1x8xf32>
    %26 = vector.broadcast %25 : vector<1x8xf32> to vector<56x8xf32>
    %27 = arith.addf %24, %26 : vector<56x8xf32>
    %cst_16 = arith.constant 3.000000e+00 : f32
    %28 = vector.broadcast %cst_16 : f32 to vector<56x8xf32>
    %29 = arith.addf %27, %28 : vector<56x8xf32>
    %cst_17 = arith.constant 0.000000e+00 : f32
    %cst_18 = arith.constant 6.000000e+00 : f32
    %30 = vector.broadcast %cst_17 : f32 to vector<56x8xf32>
    %31 = arith.maximumf %30, %29 : vector<56x8xf32>
    %32 = vector.broadcast %cst_18 : f32 to vector<56x8xf32>
    %33 = arith.minimumf %32, %31 : vector<56x8xf32>
    %cst_19 = arith.constant 0.166666672 : f32
    %34 = vector.broadcast %cst_19 : f32 to vector<56x8xf32>
    %35 = arith.mulf %33, %34 : vector<56x8xf32>
    %36 = arith.mulf %27, %35 : vector<56x8xf32>
    %c0_20 = arith.constant 0 : index
    %c0_21 = arith.constant 0 : index
    %37 = vector.load %arg8[%c0_20, %c0_21] : memref<8x256xf32, #tpu.memory_space<vmem>>, vector<8x256xf32>
    %cst_22 = arith.constant dense<0.000000e+00> : vector<56x256xf32>
    %38 = tpu.matmul %36, %37, %cst_22 {dimension_numbers = #tpu.dot_dimension_numbers<[1], [0], [0], [1], [0, 0, 1, 1], [], []>} : vector<56x8xf32>, vector<8x256xf32>, vector<56x256xf32> -> vector<56x256xf32>
    %c0_23 = arith.constant 0 : index
    %c0_24 = arith.constant 0 : index
    %39 = vector.load %arg9[%c0_23, %c0_24] : memref<1x256xf32, #tpu.memory_space<vmem>>, vector<1x256xf32>
    %40 = vector.broadcast %39 : vector<1x256xf32> to vector<56x256xf32>
    %41 = arith.addf %38, %40 : vector<56x256xf32>
    %42 = arith.negf %41 : vector<56x256xf32>
    %43 = math.exp %42 : vector<56x256xf32>
    %cst_25 = arith.constant 1.000000e+00 : f32
    %44 = vector.broadcast %cst_25 : f32 to vector<56x256xf32>
    %45 = arith.addf %44, %43 : vector<56x256xf32>
    %46 = arith.divf %44, %45 : vector<56x256xf32>
    %47 = vector.shape_cast %46 : vector<56x256xf32> to vector<8x7x256xf32>
    %48 = vector.extract_strided_slice %47 {offsets = [0, 0, 0], sizes = [4, 7, 128], strides = [1, 1, 1]} : vector<8x7x256xf32> to vector<4x7x128xf32>
    %49 = vector.extract_strided_slice %47 {offsets = [4, 0, 128], sizes = [4, 7, 128], strides = [1, 1, 1]} : vector<8x7x256xf32> to vector<4x7x128xf32>
    %50 = vector.shape_cast %48 : vector<4x7x128xf32> to vector<4x7x1x128xf32>
    %51 = vector.shape_cast %49 : vector<4x7x128xf32> to vector<4x1x7x128xf32>
    %52 = vector.broadcast %50 : vector<4x7x1x128xf32> to vector<4x7x7x128xf32>
    %53 = vector.broadcast %51 : vector<4x1x7x128xf32> to vector<4x7x7x128xf32>
    %54 = arith.mulf %52, %53 : vector<4x7x7x128xf32>
    %55 = vector.shape_cast %54 : vector<4x7x7x128xf32> to vector<4x49x128xf32>
    %c0_26 = arith.constant 0 : index
    %c0_27 = arith.constant 0 : index
    %c0_28 = arith.constant 0 : index
    %56 = vector.load %arg10[%c0_26, %c0_27, %c0_28] : memref<4x49x128xf32, #tpu.memory_space<vmem>>, vector<4x49x128xf32>
    tpu.vector_store %arg10[%c0_26, %c0_27, %c0_28], %55 {strides = array<i32>} : memref<4x49x128xf32, #tpu.memory_space<vmem>>, vector<4x49x128xf32>,
    return
  }
  func.func @transform_0(%arg0: i32) -> (i32, i32, i32) {
    %c0_i32 = arith.constant 0 : i32
    %c0_i32_0 = arith.constant 0 : i32
    %c0_i32_1 = arith.constant 0 : i32
    return %arg0, %c0_i32, %c0_i32_0 : i32, i32, i32
  }
  func.func @transform_1(%arg0: i32) -> (i32, i32) {
    %c0_i32 = arith.constant 0 : i32
    %c0_i32_0 = arith.constant 0 : i32
    %c0_i32_1 = arith.constant 0 : i32
    return %c0_i32, %c0_i32_0 : i32, i32
  }
  func.func @transform_2(%arg0: i32) -> (i32, i32) {
    %c0_i32 = arith.constant 0 : i32
    %c0_i32_0 = arith.constant 0 : i32
    %c0_i32_1 = arith.constant 0 : i32
    return %c0_i32, %c0_i32_0 : i32, i32
  }
  func.func @transform_3(%arg0: i32) -> (i32, i32) {
    %c0_i32 = arith.constant 0 : i32
    %c0_i32_0 = arith.constant 0 : i32
    %c0_i32_1 = arith.constant 0 : i32
    return %c0_i32, %c0_i32_0 : i32, i32
  }
  func.func @transform_4(%arg0: i32) -> (i32, i32) {
    %c0_i32 = arith.constant 0 : i32
    %c0_i32_0 = arith.constant 0 : i32
    %c0_i32_1 = arith.constant 0 : i32
    return %c0_i32, %c0_i32_0 : i32, i32
  }
  func.func @transform_5(%arg0: i32) -> (i32, i32) {
    %c0_i32 = arith.constant 0 : i32
    %c0_i32_0 = arith.constant 0 : i32
    %c0_i32_1 = arith.constant 0 : i32
    return %c0_i32, %c0_i32_0 : i32, i32
  }
  func.func @transform_6(%arg0: i32) -> (i32, i32) {
    %c0_i32 = arith.constant 0 : i32
    %c0_i32_0 = arith.constant 0 : i32
    %c0_i32_1 = arith.constant 0 : i32
    return %c0_i32, %c0_i32_0 : i32, i32
  }
  func.func @transform_7(%arg0: i32) -> (i32, i32) {
    %c0_i32 = arith.constant 0 : i32
    %c0_i32_0 = arith.constant 0 : i32
    %c0_i32_1 = arith.constant 0 : i32
    return %c0_i32, %c0_i32_0 : i32, i32
  }
  func.func @transform_8(%arg0: i32) -> (i32, i32) {
    %c0_i32 = arith.constant 0 : i32
    %c0_i32_0 = arith.constant 0 : i32
    %c0_i32_1 = arith.constant 0 : i32
    return %c0_i32, %c0_i32_0 : i32, i32
  }
  func.func @transform_9(%arg0: i32) -> (i32, i32, i32) {
    %c0_i32 = arith.constant 0 : i32
    %c0_i32_0 = arith.constant 0 : i32
    %c0_i32_1 = arith.constant 0 : i32
    return %arg0, %c0_i32, %c0_i32_0 : i32, i32, i32
  }
}

</mosaic_0001>

<bundles_post_ra>
// kernel: tpu_custom_call.1
= control target key start
LH: loop header
LB: loop body
LE: loop exit
PB: predicated region body
PF: predicated region fallthrough
CT: control target
= control target key end

     0   :  { %vm1085_vm0 = vcmask 1046528   ;;  %vm2186_vm1 = vcmask 1041409   ;;  %vm2189_vm2 = vcmask 1042434   ;;  %vm2192_vm3 = vcmask 1043459   ;;  %s6452_s5 = inlined_call_operand.vmem [shape: f32[128,8], index: 5, kind: input, shape index: {}]   ;;  %s6453_s2 = inlined_call_operand.vmem [shape: f32[1,128], index: 2, kind: input, shape index: {}]   ;;  %s6454_s0 = inlined_call_operand.vmem [shape: f32[4,49,128], index: 0, kind: input, shape index: {}]   ;;  %s6455_s1 = inlined_call_operand.vmem [shape: f32[7,128], index: 1, kind: input, shape index: {}]   ;;  %s6456_s4 = inlined_call_operand.vmem [shape: f32[1,128], index: 4, kind: input, shape index: {}]   ;;  %s6457_s3 = inlined_call_operand.vmem [shape: f32[7,128], index: 3, kind: input, shape index: {}]   ;;  %s6458_s6 = inlined_call_operand.vmem [shape: f32[1,8], index: 6, kind: input, shape index: {}]   ;;  %s6459_s7 = inlined_call_operand.vmem [shape: f32[8,256], index: 7, kind: input, shape index: {}]   ;;  %s6460_s8 = inlined_call_operand.vmem [shape: f32[1,256], index: 8, kind: input, shape index: {}]   ;;  %s6461_s9 = inlined_call_operand.vmem [shape: f32[4,49,128], index: 9, kind: output, shape index: {}]  }
   0x1   :  { %v2304_v0 = vld [vmem:[%s6452_s5 + $0x78] sm:$0xff]  ;;  %v2303_v1 = vld [vmem:[%s6452_s5 + $0x70] sm:$0xff]  ;;  %v2302_v2 = vld [vmem:[%s6452_s5 + $0x68] sm:$0xff]  ;;  %vm2195_vm4 = vcmask 1044484   ;;  %vm2198_vm5 = vcmask 1045509   ;;  %vm2201_vm6 = vcmask 1046534  }
   0x2   :  { %2309 = vmatpush.msra.mxu0 %v2304_v0  ;;  %3766 = vmatpush.msra.mxu3 %v2304_v0  ;;  %v2301_v3 = vld [vmem:[%s6452_s5 + $0x60] sm:$0xff]  ;;  %v2300_v4 = vld [vmem:[%s6452_s5 + $0x58] sm:$0xff]  ;;  %v2299_v5 = vld [vmem:[%s6452_s5 + $0x50] sm:$0xff]  ;;  %vm2204_vm7 = vcmask 1047559   ;;  %vm2287_vm8 = vcmask 1043456   ;;  %vm2390_vm9 = vcmask 64512  }
   0x3   :  { %v2298_v6 = vld [vmem:[%s6452_s5 + $0x48] sm:$0xff]  ;;  %v2297_v7 = vld [vmem:[%s6452_s5 + $0x40] sm:$0xff]  ;;  %v2296_v9 = vld [vmem:[%s6452_s5 + $0x38] sm:$0xff] }
   0x4   :  { %2310 = vmatpush.msra.mxu0 %v2303_v1  ;;  %3767 = vmatpush.msra.mxu3 %v2303_v1  ;;  %v3948_v8 = vld [vmem:[%s6454_s0] sm:$0xff]  ;;  %v2295_v11 = vld [vmem:[%s6452_s5 + $0x30] sm:$0xff]  ;;  %v2294_v13 = vld [vmem:[%s6452_s5 + $0x28] sm:$0xff] }
   0x5   :  { %v3956_v10 = vld [vmem:[%s6455_s1] sm:$0x7f]  ;;  %v84_v12 = vrot.slane %v3948_v8, 1  ;;  %v85_v14 = vrot.slane %v3948_v8, 2  ;;  %v86_v18 = vrot.slane %v3948_v8, 3  ;;  %v2292_v22 = vld [vmem:[%s6452_s5 + $0x18] sm:$0xff] }
   0x6   :  { %2311 = vmatpush.msra.mxu0 %v2302_v2  ;;  %3768 = vmatpush.msra.mxu3 %v2302_v2  ;;  %v3967_v15 = vrot.slane %v3956_v10, 1  ;;  %v3970_v16 = vrot.slane %v3956_v10, 2  ;;  %v2293_v17 = vld [vmem:[%s6452_s5 + $0x20] sm:$0xff]  ;;  %v3977_v19 = vrot.slane %v3956_v10, 3  ;;  %v435_v20 = vmul.f32 %v3956_v10, %v3948_v8  ;;  %v2291_v26 = vld [vmem:[%s6452_s5 + $0x10] sm:$0xff]  ;;  %v2290_v32 = vld [vmem:[%s6452_s5 + $0x8] sm:$0xff] }
   0x7   :  { %v87_v23 = vrot.slane %v3948_v8, 4  ;;  %v3989_v24 = vrot.slane %v3956_v10, 4  ;;  %v88_v27 = vrot.slane %v3948_v8, 5  ;;  %v3999_v28 = vrot.slane %v3956_v10, 5  ;;  %v2289_v34 = vld [vmem:[%s6452_s5] sm:$0xff]  ;;  %v4026_v37 = vld [vmem:[%s6454_s0 + $0x8] sm:$0xff] }
   0x8   :  { %2312 = vmatpush.msra.mxu0 %v2301_v3  ;;  %3769 = vmatpush.msra.mxu3 %v2301_v3  ;;  %v436_v21 = vmul.f32 %v3967_v15, %v84_v12  ;;  %v437_v25 = vmul.f32 %v3970_v16, %v85_v14  ;;  %827 = vst [vmem:[#allocation1] ss:$9 sm:$0xff] %v435_v20  ;;  %v89_v30 = vrot.slane %v3948_v8, 6  ;;  %v4006_v31 = vrot.slane %v3956_v10, 6  ;;  %v4059_v52 = vld [vmem:[%s6454_s0 + $0x10] sm:$0xff] }
   0x9   :  { %v438_v29 = vmul.f32 %v3977_v19, %v86_v18  ;;  %v439_v33 = vmul.f32 %v3989_v24, %v87_v23  ;;  %v440_v35 = vmul.f32 %v3999_v28, %v88_v27  ;;  %v90_v38 = vrot.slane %v3948_v8, 7 }
   0xa   :  { %2313 = vmatpush.msra.mxu0 %v2300_v4  ;;  %3770 = vmatpush.msra.mxu3 %v2300_v4  ;;  %829 = vst [vmem:[#allocation1 + $0x1] ss:$9 sm:$0xff] %v436_v21  ;;  %v441_v36 = vmul.f32 %v4006_v31, %v89_v30  ;;  %v91_v39 = vrot.slane %v4026_v37, 1  ;;  %v6596_v40 = vrot.slane %v4026_v37, 2  ;;  %v6592_v41 = vrot.slane %v4026_v37, 3  ;;  %v4093_v4 = vld [vmem:[%s6454_s0 + $0x18] sm:$0xff] }
   0xb   :  { %831 = vst [vmem:[#allocation1 + $0x2] ss:$9 sm:$0xff] %v437_v25  ;;  %v442_v42 = vmul.f32 %v3956_v10, %v90_v38  ;;  %v6589_v43 = vrot.slane %v4026_v37, 4  ;;  %v443_v44 = vmul.f32 %v3967_v15, %v4026_v37  ;;  %v6588_v45 = vrot.slane %v4026_v37, 5 }
   0xc   :  { %2314 = vmatpush.msra.mxu0 %v2299_v5  ;;  %3771 = vmatpush.msra.mxu3 %v2299_v5  ;;  %833 = vst [vmem:[#allocation1 + $0x3] ss:$9 sm:$0xff] %v438_v29  ;;  %v444_v46 = vmul.f32 %v3970_v16, %v91_v39  ;;  %v445_v47 = vmul.f32 %v3977_v19, %v6596_v40  ;;  %v6587_v53 = vrot.slane %v4026_v37, 6  ;;  %v6584_v54 = vrot.slane %v4026_v37, 7 }
   0xd   :  { %835 = vst [vmem:[#allocation1 + $0x4] ss:$9 sm:$0xff] %v439_v33  ;;  %v446_v49 = vmul.f32 %v3989_v24, %v6592_v41  ;;  %v447_v50 = vmul.f32 %v3999_v28, %v6589_v43  ;;  %v448_v51 = vmul.f32 %v4006_v31, %v6588_v45  ;;  %v6582_v55 = vrot.slane %v4059_v52, 1 }
   0xe   :  { %2315 = vmatpush.msra.mxu0 %v2298_v6  ;;  %3772 = vmatpush.msra.mxu3 %v2298_v6  ;;  %837 = vst [vmem:[#allocation1 + $0x5] ss:$9 sm:$0xff] %v440_v35  ;;  %v6541_v56 = vrot.slane %v4059_v52, 2  ;;  %v449_v57 = vmul.f32 %v3956_v10, %v6587_v53  ;;  %v6535_v58 = vrot.slane %v4059_v52, 3  ;;  %v450_v59 = vmul.f32 %v3967_v15, %v6584_v54 }
   0xf   :  { %839 = vst [vmem:[#allocation1 + $0x6] ss:$9 sm:$0xff] %v441_v36  ;;  %v6534_v60 = vrot.slane %v4059_v52, 4  ;;  %v451_v61 = vmul.f32 %v3970_v16, %v4059_v52  ;;  %v452_v62 = vmul.f32 %v3977_v19, %v6582_v55  ;;  %v6533_v3 = vrot.slane %v4059_v52, 5 }
  0x10   :  { %2316 = vmatpush.msra.mxu0 %v2297_v7  ;;  %3773 = vmatpush.msra.mxu3 %v2297_v7  ;;  %v453_v0 = vmul.f32 %v3989_v24, %v6541_v56  ;;  %v454_v1 = vmul.f32 %v3999_v28, %v6535_v58  ;;  %v6532_v5 = vrot.slane %v4059_v52, 6  ;;  %v6528_v6 = vrot.slane %v4059_v52, 7 }
  0x11   :  { %v455_v2 = vmul.f32 %v4006_v31, %v6534_v60  ;;  %v6525_v7 = vrot.slane %v4093_v4, 1  ;;  %v459_v21 = vmul.f32 %v3977_v19, %v4093_v4  ;;  %v6480_v33 = vrot.slane %v4093_v4, 5 }
  0x12   :  { %2317 = vmatpush.msra.mxu0 %v2296_v9  ;;  %3774 = vmatpush.msra.mxu3 %v2296_v9  ;;  %v456_v9 = vmul.f32 %v3956_v10, %v6533_v3  ;;  %v458_v20 = vmul.f32 %v3970_v16, %v6528_v6  ;;  %v6477_v35 = vrot.slane %v4093_v4, 6  ;;  %v6473_v36 = vrot.slane %v4093_v4, 7 }
  0x13   :  { %v460_v25 = vmul.f32 %v3989_v24, %v6525_v7 }
  0x14   :  { %2318 = vmatpush.msra.mxu0 %v2295_v11  ;;  %3775 = vmatpush.msra.mxu3 %v2295_v11  ;;  %v6486_v11 = vrot.slane %v4093_v4, 2 }
  0x16   :  { %2319 = vmatpush.msra.mxu0 %v2294_v13  ;;  %3776 = vmatpush.msra.mxu3 %v2294_v13  ;;  %v4045_v48 = vld [vmem:[#allocation1] sm:$0xff]  ;;  %v457_v13 = vmul.f32 %v3967_v15, %v6532_v5 }
  0x17   :  { %841 = vst [vmem:[#allocation1] ss:$9 sm:$0xff] %v442_v42 }
  0x18   :  { %2320 = vmatpush.msra.mxu0 %v2293_v17  ;;  %3777 = vmatpush.msra.mxu3 %v2293_v17  ;;  %842 = vst [vmem:[#allocation1 + $0x1] ss:$9 sm:$0xff] %v443_v44  ;;  %v6482_v17 = vrot.slane %v4093_v4, 3 }
  0x19   :  { %843 = vst [vmem:[#allocation1 + $0x2] ss:$9 sm:$0xff] %v444_v46  ;;  %v464_v46 = vmul.f32 %v3967_v15, %v6480_v33 }
  0x1a   :  { %2321 = vmatpush.msra.mxu0 %v2292_v22  ;;  %3778 = vmatpush.msra.mxu3 %v2292_v22  ;;  %844 = vst [vmem:[#allocation1 + $0x3] ss:$9 sm:$0xff] %v445_v47  ;;  %v462_v29 = vmul.f32 %v4006_v31, %v6482_v17 }
  0x1b   :  { %845 = vst [vmem:[#allocation1 + $0x4] ss:$9 sm:$0xff] %v446_v49  ;;  %v465_v49 = vmul.f32 %v3970_v16, %v6477_v35 }
  0x1c   :  { %2322 = vmatpush.msra.mxu0 %v2291_v26  ;;  %3779 = vmatpush.msra.mxu3 %v2291_v26  ;;  %846 = vst [vmem:[#allocation1 + $0x5] ss:$9 sm:$0xff] %v447_v50  ;;  %v461_v26 = vmul.f32 %v3999_v28, %v6486_v11  ;;  %v466_v50 = vmul.f32 %v3977_v19, %v6473_v36  ;;  %v4262_v11 = vld [vmem:[%s6454_s0 + $0x40] sm:$0xff] }
  0x1d   :  { %847 = vst [vmem:[#allocation1 + $0x6] ss:$9 sm:$0xff] %v448_v51 }
  0x1e   :  { %2323 = vmatpush.msra.mxu0 %v2290_v32  ;;  %3780 = vmatpush.msra.mxu3 %v2290_v32  ;;  %v6481_v32 = vrot.slane %v4093_v4, 4 }
  0x20   :  { %2324 = vmatpush.msra.mxu0 %v2289_v34  ;;  %3781 = vmatpush.msra.mxu3 %v2289_v34  ;;  %v4127_v34 = vld [vmem:[%s6454_s0 + $0x20] sm:$0xff]  ;;  %v463_v42 = vmul.f32 %v3956_v10, %v6481_v32 }
  0x21   :  { %v6472_v44 = vrot.slane %v4127_v34, 1  ;;  %v6471_v47 = vrot.slane %v4127_v34, 2 }
  0x24   :  { %v4078_v63 = vld [vmem:[#allocation1] sm:$0xff] }
  0x25   :  { %849 = vst [vmem:[#allocation1] ss:$9 sm:$0xff] %v449_v57  ;;  %v467_v57 = vmul.f32 %v3989_v24, %v4127_v34 }
  0x26   :  { %850 = vst [vmem:[#allocation1 + $0x1] ss:$9 sm:$0xff] %v450_v59  ;;  %v468_v59 = vmul.f32 %v3999_v28, %v6472_v44 }
  0x27   :  { %851 = vst [vmem:[#allocation1 + $0x2] ss:$9 sm:$0xff] %v451_v61  ;;  %v469_v61 = vmul.f32 %v4006_v31, %v6471_v47 }
  0x28   :  { %852 = vst [vmem:[#allocation1 + $0x3] ss:$9 sm:$0xff] %v452_v62  ;;  %v6468_v62 = vrot.slane %v4127_v34, 3 }
  0x29   :  { %853 = vst [vmem:[#allocation1 + $0x4] ss:$9 sm:$0xff] %v453_v0  ;;  %v6467_v0 = vrot.slane %v4127_v34, 4 }
  0x2a   :  { %854 = vst [vmem:[#allocation1 + $0x5] ss:$9 sm:$0xff] %v454_v1  ;;  %v6466_v1 = vrot.slane %v4127_v34, 5 }
  0x2b   :  { %855 = vst [vmem:[#allocation1 + $0x6] ss:$9 sm:$0xff] %v455_v2  ;;  %v4159_v2 = vld [vmem:[%s6454_s0 + $0x28] sm:$0xff] }
  0x32   :  { %v4111_v22 = vld [vmem:[#allocation1] sm:$0xff] }
  0x33   :  { %857 = vst [vmem:[#allocation1] ss:$9 sm:$0xff] %v456_v9  ;;  %v6465_v9 = vrot.slane %v4127_v34, 6 }
  0x34   :  { %858 = vst [vmem:[#allocation1 + $0x1] ss:$9 sm:$0xff] %v457_v13  ;;  %v6462_v13 = vrot.slane %v4127_v34, 7 }
  0x35   :  { %859 = vst [vmem:[#allocation1 + $0x2] ss:$9 sm:$0xff] %v458_v20  ;;  %v470_v20 = vmul.f32 %v3956_v10, %v6468_v62 }
  0x36   :  { %860 = vst [vmem:[#allocation1 + $0x3] ss:$9 sm:$0xff] %v459_v21  ;;  %v471_v21 = vmul.f32 %v3967_v15, %v6467_v0 }
  0x37   :  { %861 = vst [vmem:[#allocation1 + $0x4] ss:$9 sm:$0xff] %v460_v25  ;;  %v6463_v25 = vrot.slane %v4159_v2, 1 }
  0x38   :  { %862 = vst [vmem:[#allocation1 + $0x5] ss:$9 sm:$0xff] %v461_v26  ;;  %v472_v26 = vmul.f32 %v3970_v16, %v6466_v1 }
  0x39   :  { %863 = vst [vmem:[#allocation1 + $0x6] ss:$9 sm:$0xff] %v462_v29  ;;  %v473_v29 = vmul.f32 %v3977_v19, %v6465_v9 }
  0x40   :  { %v864_v51 = vld [vmem:[#allocation1] sm:$0xff] }
  0x41   :  { %865 = vst [vmem:[#allocation1] ss:$9 sm:$0xff] %v463_v42 }
  0x42   :  { %866 = vst [vmem:[#allocation1 + $0x1] ss:$9 sm:$0xff] %v464_v46  ;;  %v474_v46 = vmul.f32 %v3989_v24, %v6462_v13  ;;  %v6476_v13 = vrot.slane %v4159_v2, 6 }
  0x43   :  { %867 = vst [vmem:[#allocation1 + $0x2] ss:$9 sm:$0xff] %v465_v49  ;;  %v475_v49 = vmul.f32 %v3999_v28, %v4159_v2 }
  0x44   :  { %868 = vst [vmem:[#allocation1 + $0x3] ss:$9 sm:$0xff] %v466_v50  ;;  %v476_v50 = vmul.f32 %v4006_v31, %v6463_v25 }
  0x45   :  { %869 = vst [vmem:[#allocation1 + $0x4] ss:$9 sm:$0xff] %v467_v57  ;;  %v6464_v57 = vrot.slane %v4159_v2, 2 }
  0x46   :  { %870 = vst [vmem:[#allocation1 + $0x5] ss:$9 sm:$0xff] %v468_v59  ;;  %v6469_v59 = vrot.slane %v4159_v2, 3 }
  0x47   :  { %871 = vst [vmem:[#allocation1 + $0x6] ss:$9 sm:$0xff] %v469_v61  ;;  %v6470_v61 = vrot.slane %v4159_v2, 4 }
  0x4e   :  { %v872_v42 = vld [vmem:[#allocation1] sm:$0xff] }
  0x4f   :  { %873 = vst [vmem:[#allocation1] ss:$9 sm:$0xff] %v470_v20  ;;  %v6474_v20 = vrot.slane %v4159_v2, 5  ;;  %v1114_v47 = vsel %vm1085_vm0, %v872_v42, 0.0 }
  0x50   :  { %874 = vst [vmem:[#allocation1 + $0x1] ss:$9 sm:$0xff] %v471_v21  ;;  %v477_v21 = vmul.f32 %v3956_v10, %v6464_v57  ;;  %v479_v57 = vmul.f32 %v3970_v16, %v6470_v61 }
  0x51   :  { %875 = vst [vmem:[#allocation1 + $0x2] ss:$9 sm:$0xff] %v472_v26  ;;  %v1086_v26 = vsel %vm1085_vm0, %v4045_v48, 0.0  ;;  %v1107_v48 = vsel %vm1085_vm0, %v864_v51, 0.0 }
  0x52   :  { %876 = vst [vmem:[#allocation1 + $0x3] ss:$9 sm:$0xff] %v473_v29  ;;  %v1093_v29 = vsel %vm1085_vm0, %v4078_v63, 0.0  ;;  %v1087_v9 = vrot.slane %v1086_v26, 4  ;;  %v38_v63 = vld [vmem:[%s6454_s0 + $0x30] sm:$0x1] }
  0x53   :  { %877 = vst [vmem:[#allocation1 + $0x4] ss:$9 sm:$0xff] %v474_v46  ;;  %v1100_v46 = vsel %vm1085_vm0, %v4111_v22, 0.0  ;;  %v1094_v25 = vrot.slane %v1093_v29, 4  ;;  %v480_v22 = vmul.f32 %v3977_v19, %v6474_v20  ;;  %v1108_v51 = vrot.slane %v1107_v48, 4 }
  0x54   :  { %878 = vst [vmem:[#allocation1 + $0x5] ss:$9 sm:$0xff] %v475_v49  ;;  %v6475_v49 = vrot.slane %v4159_v2, 7  ;;  %v1101_v1 = vrot.slane %v1100_v46, 4  ;;  %v483_v44 = vmul.f32 %v4006_v31, %v38_v63  ;;  %v1088_v36 = vadd.f32 %v1087_v9, %v1086_v26 }
  0x55   :  { %879 = vst [vmem:[#allocation1 + $0x6] ss:$9 sm:$0xff] %v476_v50  ;;  %v478_v50 = vmul.f32 %v3967_v15, %v6469_v59  ;;  %v1095_v62 = vadd.f32 %v1094_v25, %v1093_v29  ;;  %v481_v59 = vmul.f32 %v3989_v24, %v6476_v13  ;;  %v4223_v29 = vld [vmem:[%s6454_s0 + $0x38] sm:$0xff] }
  0x56   :  { %v482_v61 = vmul.f32 %v3999_v28, %v6475_v49  ;;  %v1102_v20 = vadd.f32 %v1101_v1, %v1100_v46  ;;  %v1089_v42 = vrot.slane %v1088_v36, 2  ;;  %v6479_v26 = vrot.slane %v4223_v29, 2 }
  0x57   :  { %v1096_v25 = vrot.slane %v1095_v62, 2  ;;  %v6485_v63 = vrot.slane %v4223_v29, 3 }
  0x58   :  { %v1103_v13 = vrot.slane %v1102_v20, 2 }
  0x59   :  { %v1097_v9 = vadd.f32 %v1096_v25, %v1095_v62 }
  0x5c   :  { %v880_v0 = vld [vmem:[#allocation1] sm:$0xff] }
  0x5d   :  { %881 = vst [vmem:[#allocation1] ss:$9 sm:$0xff] %v477_v21  ;;  %v1115_v21 = vrot.slane %v1114_v47, 4  ;;  %v1121_v49 = vsel %vm1085_vm0, %v880_v0, 0.0  ;;  %v484_v0 = vmul.f32 %v3956_v10, %v4223_v29 }
  0x5e   :  { %882 = vst [vmem:[#allocation1 + $0x1] ss:$9 sm:$0xff] %v478_v50  ;;  %v1109_v50 = vadd.f32 %v1108_v51, %v1107_v48  ;;  %v1122_v1 = vrot.slane %v1121_v49, 4  ;;  %v1104_v48 = vadd.f32 %v1103_v13, %v1102_v20  ;;  %v1098_v51 = vrot.slane %v1097_v9, 1 }
  0x5f   :  { %883 = vst [vmem:[#allocation1 + $0x2] ss:$9 sm:$0xff] %v479_v57  ;;  %v6478_v57 = vrot.slane %v4223_v29, 1  ;;  %v1116_v46 = vadd.f32 %v1115_v21, %v1114_v47  ;;  %v6487_v47 = vrot.slane %v4223_v29, 6  ;;  %v486_v21 = vmul.f32 %v3970_v16, %v6479_v26 }
  0x60   :  { %884 = vst [vmem:[#allocation1 + $0x3] ss:$9 sm:$0xff] %v480_v22  ;;  %v1110_v22 = vrot.slane %v1109_v50, 2  ;;  %v1123_v25 = vadd.f32 %v1122_v1, %v1121_v49  ;;  %v1105_v49 = vrot.slane %v1104_v48, 1  ;;  %v1099_v33 = vadd.f32 %v1098_v51, %v1097_v9 }
  0x61   :  { %885 = vst [vmem:[#allocation1 + $0x4] ss:$9 sm:$0xff] %v481_v59  ;;  %v6483_v59 = vrot.slane %v4223_v29, 4  ;;  %v485_v62 = vmul.f32 %v3967_v15, %v6478_v57  ;;  %v1117_v35 = vrot.slane %v1116_v46, 2 }
  0x62   :  { %886 = vst [vmem:[#allocation1 + $0x5] ss:$9 sm:$0xff] %v482_v61  ;;  %v1090_v61 = vadd.f32 %v1089_v42, %v1088_v36  ;;  %v487_v36 = vmul.f32 %v3977_v19, %v6485_v63  ;;  %v1111_v20 = vadd.f32 %v1110_v22, %v1109_v50  ;;  %v1124_v32 = vrot.slane %v1123_v25, 2  ;;  %v4253_v50 = vld [vmem:[%s6453_s2] ss:$0 sm:$0xff] }
  0x63   :  { %887 = vst [vmem:[#allocation1 + $0x6] ss:$9 sm:$0xff] %v483_v44  ;;  %v6484_v44 = vrot.slane %v4223_v29, 5  ;;  %v488_v42 = vmul.f32 %v3989_v24, %v6483_v59  ;;  %v490_v22 = vmul.f32 %v4006_v31, %v6487_v47  ;;  %v1287_v63 = vadd.f32 %v4253_v50, %v1099_v33 }
  0x64   :  { %v1091_v57 = vrot.slane %v1090_v61, 1  ;;  %v6522_v33 = vrot.slane %v4262_v11, 2 }
  0x65   :  { %v489_v26 = vmul.f32 %v3999_v28, %v6484_v44  ;;  %v1106_v44 = vadd.f32 %v1105_v49, %v1104_v48 }
  0x66   :  { %v1092_v9 = vadd.f32 %v1091_v57, %v1090_v61  ;;  %v2185_v61 = vrot.slane %v1287_v63, 7  ;;  %v6520_v63 = vrot.slane %v4262_v11, 5 }
  0x6a   :  { %v888_v13 = vld [vmem:[#allocation1] sm:$0xff] }
  0x6b   :  { %889 = vst [vmem:[#allocation1] ss:$9 sm:$0xff] %v484_v0  ;;  %v1128_v1 = vsel %vm1085_vm0, %v888_v13, 0.0  ;;  %v1118_v0 = vadd.f32 %v1117_v35, %v1116_v46  ;;  %v1112_v13 = vrot.slane %v1111_v20, 1  ;;  %v6523_v35 = vrot.slane %v4223_v29, 7 }
  0x6c   :  { %890 = vst [vmem:[#allocation1 + $0x1] ss:$9 sm:$0xff] %v485_v62  ;;  %v1129_v17 = vrot.slane %v1128_v1, 4  ;;  %v1125_v62 = vadd.f32 %v1124_v32, %v1123_v25  ;;  %v1286_v32 = vadd.f32 %v4253_v50, %v1092_v9  ;;  %v6489_v25 = vrot.slane %v4262_v11, 3 }
  0x6d   :  { %891 = vst [vmem:[#allocation1 + $0x2] ss:$9 sm:$0xff] %v486_v21  ;;  %v1119_v47 = vrot.slane %v1118_v0, 1  ;;  %v1113_v46 = vadd.f32 %v1112_v13, %v1111_v20  ;;  %v492_v20 = vmul.f32 %v3967_v15, %v4262_v11  ;;  %v494_v13 = vmul.f32 %v3977_v19, %v6522_v33 }
  0x6e   :  { %892 = vst [vmem:[#allocation1 + $0x3] ss:$9 sm:$0xff] %v487_v36  ;;  %v1130_v59 = vadd.f32 %v1129_v17, %v1128_v1  ;;  %v1288_v17 = vadd.f32 %v4253_v50, %v1106_v44  ;;  %v1126_v57 = vrot.slane %v1125_v62, 1  ;;  %v491_v36 = vmul.f32 %v3956_v10, %v6523_v35 }
  0x6f   :  { %893 = vst [vmem:[#allocation1 + $0x4] ss:$9 sm:$0xff] %v488_v42  ;;  %v1120_v48 = vadd.f32 %v1119_v47, %v1118_v0  ;;  %v6521_v44 = vrot.slane %v4262_v11, 4  ;;  %v2187_v0 = vsel %vm2186_vm1, %v2185_v61, %v1286_v32  ;;  %v497_v61 = vmul.f32 %v4006_v31, %v6520_v63 }
  0x70   :  { %894 = vst [vmem:[#allocation1 + $0x5] ss:$9 sm:$0xff] %v489_v26  ;;  %v1131_v51 = vrot.slane %v1130_v59, 2  ;;  %v6488_v26 = vrot.slane %v4262_v11, 1  ;;  %v2188_v49 = vrot.slane %v1288_v17, 6 }
  0x71   :  { %895 = vst [vmem:[#allocation1 + $0x6] ss:$9 sm:$0xff] %v490_v22  ;;  %v1127_v22 = vadd.f32 %v1126_v57, %v1125_v62  ;;  %v496_v62 = vmul.f32 %v3999_v28, %v6521_v44 }
  0x72   :  { %v1132_v21 = vadd.f32 %v1131_v51, %v1130_v59  ;;  %v1289_v59 = vadd.f32 %v4253_v50, %v1113_v46  ;;  %v493_v47 = vmul.f32 %v3970_v16, %v6488_v26  ;;  %v1290_v51 = vadd.f32 %v4253_v50, %v1120_v48 }
  0x73   :  { %v495_v46 = vmul.f32 %v3989_v24, %v6489_v25  ;;  %v2190_v32 = vsel %vm2189_vm2, %v2188_v49, %v2187_v0 }
  0x74   :  { %v1133_v42 = vrot.slane %v1132_v21, 1  ;;  %v2191_v26 = vrot.slane %v1289_v59, 5 }
  0x76   :  { %v1134_v57 = vadd.f32 %v1133_v42, %v1132_v21  ;;  %v2193_v25 = vsel %vm2192_vm3, %v2191_v26, %v2190_v32  ;;  %v6519_v42 = vrot.slane %v4262_v11, 6 }
  0x78   :  { %v896_v1 = vld [vmem:[#allocation1] sm:$0xff]  ;;  %v1292_v21 = vadd.f32 %v4253_v50, %v1134_v57 }
  0x79   :  { %v1135_v9 = vsel %vm1085_vm0, %v896_v1, 0.0  ;;  %897 = vst [vmem:[#allocation1] ss:$9 sm:$0xff] %v491_v36  ;;  %v1291_v1 = vadd.f32 %v4253_v50, %v1127_v22  ;;  %v2194_v36 = vrot.slane %v1290_v51, 4  ;;  %v6515_v22 = vrot.slane %v4262_v11, 7 }
  0x7a   :  { %v1136_v17 = vrot.slane %v1135_v9, 4  ;;  %898 = vst [vmem:[#allocation1 + $0x1] ss:$9 sm:$0xff] %v492_v20  ;;  %v4303_v20 = vld [vmem:[%s6454_s0 + $0x48] sm:$0xff] }
  0x7b   :  { %899 = vst [vmem:[#allocation1 + $0x2] ss:$9 sm:$0xff] %v493_v47  ;;  %v2197_v47 = vrot.slane %v1291_v1, 3  ;;  %v2196_v0 = vsel %vm2195_vm4, %v2194_v36, %v2193_v25  ;;  %v6504_v51 = vrot.slane %v4303_v20, 2  ;;  %v499_v25 = vmul.f32 %v3967_v15, %v6515_v22  ;;  %v4464_v22 = vld [vmem:[%s6454_s0 + $0x70] sm:$0xff] }
  0x7c   :  { %v1137_v48 = vadd.f32 %v1136_v17, %v1135_v9  ;;  %900 = vst [vmem:[#allocation1 + $0x3] ss:$9 sm:$0xff] %v494_v13  ;;  %v6510_v13 = vrot.slane %v4303_v20, 1  ;;  %v2200_v9 = vrot.slane %v1292_v21, 2  ;;  %v498_v17 = vmul.f32 %v3956_v10, %v6519_v42 }
  0x7d   :  { %901 = vst [vmem:[#allocation1 + $0x4] ss:$9 sm:$0xff] %v495_v46  ;;  %v6503_v46 = vrot.slane %v4303_v20, 3  ;;  %v2199_v57 = vsel %vm2198_vm5, %v2197_v47, %v2196_v0  ;;  %v6497_v32 = vrot.slane %v4303_v20, 4  ;;  %v502_v21 = vmul.f32 %v3989_v24, %v6504_v51 }
  0x7e   :  { %v1138_v59 = vrot.slane %v1137_v48, 2  ;;  %902 = vst [vmem:[#allocation1 + $0x5] ss:$9 sm:$0xff] %v496_v62  ;;  %v501_v1 = vmul.f32 %v3977_v19, %v6510_v13  ;;  %v6531_v42 = vrot.slane %v4464_v22, 6 }
  0x7f   :  { %903 = vst [vmem:[#allocation1 + $0x6] ss:$9 sm:$0xff] %v497_v61  ;;  %v500_v61 = vmul.f32 %v3970_v16, %v4303_v20  ;;  %v503_v47 = vmul.f32 %v3999_v28, %v6503_v46  ;;  %v504_v0 = vmul.f32 %v4006_v31, %v6497_v32 }
  0x80   :  { %v1139_v49 = vadd.f32 %v1138_v59, %v1137_v48  ;;  %v2202_v59 = vsel %vm2201_vm6, %v2200_v9, %v2199_v57  ;;  %v6492_v9 = vrot.slane %v4303_v20, 5  ;;  %v6491_v57 = vrot.slane %v4303_v20, 7  ;;  %6655 = vst [vmem:[#allocation3_spill] sm:$0xff] %v4464_v22 }
  0x82   :  { %v1140_v26 = vrot.slane %v1139_v49, 1 }
  0x84   :  { %v1141_v62 = vadd.f32 %v1140_v26, %v1139_v49 }
  0x86   :  { %v1293_v48 = vadd.f32 %v4253_v50, %v1141_v62  ;;  %v4325_v36 = vld [vmem:[#allocation1] sm:$0xff]  ;;  %v6490_v62 = vrot.slane %v4303_v20, 6 }
  0x87   :  { %905 = vst [vmem:[#allocation1] ss:$9 sm:$0xff] %v498_v17  ;;  %v4342_v17 = vld [vmem:[%s6454_s0 + $0x50] sm:$0xff] }
  0x88   :  { %v2203_v49 = vrot.slane %v1293_v48, 1  ;;  %906 = vst [vmem:[#allocation1 + $0x1] ss:$9 sm:$0xff] %v499_v25  ;;  %v6495_v25 = vrot.slane %v4342_v17, 1  ;;  %v6493_v48 = vrot.slane %v4342_v17, 2 }
  0x89   :  { %907 = vst [vmem:[#allocation1 + $0x2] ss:$9 sm:$0xff] %v500_v61  ;;  %v505_v61 = vmul.f32 %v3956_v10, %v6492_v9  ;;  %v6498_v9 = vrot.slane %v4342_v17, 5 }
  0x8a   :  { %v2205_v26 = vsel %vm2204_vm7, %v2203_v49, %v2202_v59  ;;  %908 = vst [vmem:[#allocation1 + $0x3] ss:$9 sm:$0xff] %v501_v1  ;;  %v506_v1 = vmul.f32 %v3967_v15, %v6490_v62  ;;  %v6494_v59 = vrot.slane %v4342_v17, 3  ;;  %v508_v49 = vmul.f32 %v3977_v19, %v4342_v17 }
  0x8b   :  { %2325 = vmatmul.f32.vlgmr.msra.gmra.mxu0 %v2205_v26  ;;  %909 = vst [vmem:[#allocation1 + $0x4] ss:$9 sm:$0xff] %v502_v21  ;;  %v507_v21 = vmul.f32 %v3970_v16, %v6491_v57  ;;  %v510_v26 = vmul.f32 %v3999_v28, %v6493_v48  ;;  %v6496_v57 = vrot.slane %v4342_v17, 4  ;;  %v6499_v48 = vrot.slane %v4342_v17, 7 }
  0x8c   :  { %910 = vst [vmem:[#allocation1 + $0x5] ss:$9 sm:$0xff] %v503_v47  ;;  %v511_v62 = vmul.f32 %v4006_v31, %v6494_v59 }
  0x8d   :  { %911 = vst [vmem:[#allocation1 + $0x6] ss:$9 sm:$0xff] %v504_v0  ;;  %v509_v0 = vmul.f32 %v3989_v24, %v6495_v25  ;;  %v515_v59 = vmul.f32 %v3977_v19, %v6499_v48 }
  0x94   :  { %v4360_v47 = vld [vmem:[#allocation1] sm:$0xff] }
  0x95   :  { %913 = vst [vmem:[#allocation1] ss:$9 sm:$0xff] %v505_v61  ;;  %v4376_v61 = vld [vmem:[%s6454_s0 + $0x58] sm:$0xff] }
  0x96   :  { %914 = vst [vmem:[#allocation1 + $0x1] ss:$9 sm:$0xff] %v506_v1  ;;  %v6500_v1 = vrot.slane %v4342_v17, 6  ;;  %v6505_v48 = vrot.slane %v4376_v61, 3 }
  0x97   :  { %915 = vst [vmem:[#allocation1 + $0x2] ss:$9 sm:$0xff] %v507_v21  ;;  %v512_v21 = vmul.f32 %v3956_v10, %v6496_v57  ;;  %v516_v57 = vmul.f32 %v3989_v24, %v4376_v61 }
  0x98   :  { %916 = vst [vmem:[#allocation1 + $0x3] ss:$9 sm:$0xff] %v508_v49  ;;  %v6501_v49 = vrot.slane %v4376_v61, 1 }
  0x99   :  { %917 = vst [vmem:[#allocation1 + $0x4] ss:$9 sm:$0xff] %v509_v0  ;;  %v6502_v0 = vrot.slane %v4376_v61, 2 }
  0x9a   :  { %918 = vst [vmem:[#allocation1 + $0x5] ss:$9 sm:$0xff] %v510_v26  ;;  %v514_v26 = vmul.f32 %v3970_v16, %v6500_v1  ;;  %v517_v32 = vmul.f32 %v3999_v28, %v6501_v49  ;;  %v6506_v1 = vrot.slane %v4376_v61, 4  ;;  %v4408_v49 = vld [vmem:[%s6454_s0 + $0x60] sm:$0xff] }
  0x9b   :  { %919 = vst [vmem:[#allocation1 + $0x6] ss:$9 sm:$0xff] %v511_v62  ;;  %v513_v62 = vmul.f32 %v3967_v15, %v6498_v9  ;;  %v518_v9 = vmul.f32 %v4006_v31, %v6502_v0  ;;  %v6509_v0 = vrot.slane %v4376_v61, 7  ;;  %v6516_v13 = vrot.slane %v4408_v49, 6 }
  0x9c   :  { %6654 = vst [vmem:[#allocation2_spill] sm:$0xff] %v4408_v49 }
  0x9d   :  { %v523_v51 = vmul.f32 %v3989_v24, %v6509_v0  ;;  %v6514_v0 = vrot.slane %v4408_v49, 4 }
  0xa2   :  { %v920_v25 = vld [vmem:[#allocation1] sm:$0xff] }
  0xa3   :  { %921 = vst [vmem:[#allocation1] ss:$9 sm:$0xff] %v512_v21  ;;  %v6508_v21 = vrot.slane %v4376_v61, 5 }
  0xa4   :  { %922 = vst [vmem:[#allocation1 + $0x1] ss:$9 sm:$0xff] %v513_v62  ;;  %v6507_v62 = vrot.slane %v4376_v61, 6 }
  0xa5   :  { %923 = vst [vmem:[#allocation1 + $0x2] ss:$9 sm:$0xff] %v514_v26 }
  0xa6   :  { %924 = vst [vmem:[#allocation1 + $0x3] ss:$9 sm:$0xff] %v515_v59  ;;  %v521_v59 = vmul.f32 %v3970_v16, %v6508_v21  ;;  %v522_v26 = vmul.f32 %v3977_v19, %v6507_v62  ;;  %v6512_v62 = vrot.slane %v4408_v49, 2  ;;  %v6513_v21 = vrot.slane %v4408_v49, 3 }
  0xa7   :  { %925 = vst [vmem:[#allocation1 + $0x4] ss:$9 sm:$0xff] %v516_v57  ;;  %v6511_v57 = vrot.slane %v4408_v49, 1 }
  0xa8   :  { %926 = vst [vmem:[#allocation1 + $0x5] ss:$9 sm:$0xff] %v517_v32  ;;  %v519_v32 = vmul.f32 %v3956_v10, %v6505_v48  ;;  %v524_v48 = vmul.f32 %v3999_v28, %v4408_v49 }
  0xa9   :  { %927 = vst [vmem:[#allocation1 + $0x6] ss:$9 sm:$0xff] %v518_v9  ;;  %v520_v9 = vmul.f32 %v3967_v15, %v6506_v1  ;;  %v525_v1 = vmul.f32 %v4006_v31, %v6511_v57 }
  0xb0   :  { %v928_v46 = vld [vmem:[#allocation1] sm:$0xff] }
  0xb1   :  { %929 = vst [vmem:[#allocation1] ss:$9 sm:$0xff] %v519_v32  ;;  %v6517_v32 = vrot.slane %v4408_v49, 5  ;;  %v1163_v63 = vsel %vm1085_vm0, %v928_v46, 0.0 }
  0xb2   :  { %930 = vst [vmem:[#allocation1 + $0x1] ss:$9 sm:$0xff] %v520_v9  ;;  %v526_v9 = vmul.f32 %v3956_v10, %v6512_v62  ;;  %v530_v62 = vmul.f32 %v3989_v24, %v6516_v13  ;;  %v6524_v13 = vrot.slane %v4464_v22, 1 }
  0xb3   :  { %931 = vst [vmem:[#allocation1 + $0x2] ss:$9 sm:$0xff] %v521_v59  ;;  %v6518_v59 = vrot.slane %v4408_v49, 7 }
  0xb4   :  { %932 = vst [vmem:[#allocation1 + $0x3] ss:$9 sm:$0xff] %v522_v26  ;;  %v529_v26 = vmul.f32 %v3977_v19, %v6517_v32  ;;  %v6527_v32 = vrot.slane %v4464_v22, 3 }
  0xb5   :  { %933 = vst [vmem:[#allocation1 + $0x4] ss:$9 sm:$0xff] %v523_v51  ;;  %v527_v51 = vmul.f32 %v3967_v15, %v6513_v21  ;;  %v531_v21 = vmul.f32 %v3999_v28, %v6518_v59  ;;  %v534_v59 = vmul.f32 %v3967_v15, %v6524_v13 }
  0xb6   :  { %934 = vst [vmem:[#allocation1 + $0x5] ss:$9 sm:$0xff] %v524_v48  ;;  %v528_v48 = vmul.f32 %v3970_v16, %v6514_v0 }
  0xb7   :  { %935 = vst [vmem:[#allocation1 + $0x6] ss:$9 sm:$0xff] %v525_v1  ;;  %v45_v1 = vld [vmem:[%s6454_s0 + $0x68] sm:$0x1] }
  0xb8   :  { %v532_v0 = vmul.f32 %v4006_v31, %v45_v1  ;;  %v6529_v1 = vrot.slane %v4464_v22, 4 }
  0xba   :  { %v537_v13 = vmul.f32 %v3989_v24, %v6529_v1 }
  0xbe   :  { %v936_v57 = vld [vmem:[#allocation1] sm:$0xff] }
  0xbf   :  { %937 = vst [vmem:[#allocation1] ss:$9 sm:$0xff] %v526_v9  ;;  %v6526_v9 = vrot.slane %v4464_v22, 2  ;;  %v1170_v46 = vsel %vm1085_vm0, %v936_v57, 0.0 }
  0xc0   :  { %938 = vst [vmem:[#allocation1 + $0x1] ss:$9 sm:$0xff] %v527_v51  ;;  %v1149_v51 = vsel %vm1085_vm0, %v4360_v47, 0.0  ;;  %v1171_v1 = vrot.slane %v1170_v46, 4 }
  0xc1   :  { %939 = vst [vmem:[#allocation1 + $0x2] ss:$9 sm:$0xff] %v528_v48  ;;  %v1156_v48 = vsel %vm1085_vm0, %v920_v25, 0.0  ;;  %v535_v25 = vmul.f32 %v3970_v16, %v6526_v9  ;;  %v1164_v9 = vrot.slane %v1163_v63, 4 }
  0xc2   :  { %940 = vst [vmem:[#allocation1 + $0x3] ss:$9 sm:$0xff] %v529_v26  ;;  %v533_v26 = vmul.f32 %v3956_v10, %v4464_v22  ;;  %v1157_v47 = vrot.slane %v1156_v48, 4 }
  0xc3   :  { %941 = vst [vmem:[#allocation1 + $0x4] ss:$9 sm:$0xff] %v530_v62  ;;  %v6530_v62 = vrot.slane %v4464_v22, 5  ;;  %v1165_v57 = vadd.f32 %v1164_v9, %v1163_v63 }
  0xc4   :  { %942 = vst [vmem:[#allocation1 + $0x5] ss:$9 sm:$0xff] %v531_v21  ;;  %v1142_v21 = vsel %vm1085_vm0, %v4325_v36, 0.0  ;;  %v536_v36 = vmul.f32 %v3977_v19, %v6527_v32  ;;  %v539_v32 = vmul.f32 %v4006_v31, %v6531_v42  ;;  %v1158_v6 = vadd.f32 %v1157_v47, %v1156_v48 }
  0xc5   :  { %943 = vst [vmem:[#allocation1 + $0x6] ss:$9 sm:$0xff] %v532_v0  ;;  %v1150_v0 = vrot.slane %v1149_v51, 4  ;;  %v1143_v33 = vrot.slane %v1142_v21, 4  ;;  %v538_v7 = vmul.f32 %v3999_v28, %v6530_v62  ;;  %v6537_v62 = vrot.slane %v4464_v22, 7 }
  0xc6   :  { %v1159_v42 = vrot.slane %v1158_v6, 2 }
  0xc7   :  { %v1151_v35 = vadd.f32 %v1150_v0, %v1149_v51  ;;  %v1144_v51 = vadd.f32 %v1143_v33, %v1142_v21 }
  0xc8   :  { %v1160_v63 = vadd.f32 %v1159_v42, %v1158_v6 }
  0xc9   :  { %v1152_v0 = vrot.slane %v1151_v35, 2 }
  0xcb   :  { %v1153_v48 = vadd.f32 %v1152_v0, %v1151_v35 }
  0xcc   :  { %v944_v44 = vld [vmem:[#allocation1] sm:$0xff] }
  0xcd   :  { %945 = vst [vmem:[#allocation1] ss:$9 sm:$0xff] %v533_v26  ;;  %v1177_v26 = vsel %vm1085_vm0, %v944_v44, 0.0  ;;  %v1166_v44 = vrot.slane %v1165_v57, 2  ;;  %v1154_v9 = vrot.slane %v1153_v48, 1 }
  0xce   :  { %946 = vst [vmem:[#allocation1 + $0x1] ss:$9 sm:$0xff] %v534_v59  ;;  %v4503_v59 = vld [vmem:[%s6454_s0 + $0x78] sm:$0xff]  ;;  %v1178_v47 = vrot.slane %v1177_v26, 4 }
  0xcf   :  { %947 = vst [vmem:[#allocation1 + $0x2] ss:$9 sm:$0xff] %v535_v25  ;;  %v1145_v25 = vrot.slane %v1144_v51, 2  ;;  %v6536_v33 = vrot.slane %v4503_v59, 1  ;;  %v6539_v21 = vrot.slane %v4503_v59, 2  ;;  %v6540_v5 = vrot.slane %v4503_v59, 4 }
  0xd0   :  { %948 = vst [vmem:[#allocation1 + $0x3] ss:$9 sm:$0xff] %v536_v36  ;;  %v6538_v36 = vrot.slane %v4503_v59, 3  ;;  %v1179_v0 = vadd.f32 %v1178_v47, %v1177_v26  ;;  %v1155_v47 = vadd.f32 %v1154_v9, %v1153_v48  ;;  %v4536_v9 = vld [vmem:[%s6454_s0 + $0x80] sm:$0xff] }
  0xd1   :  { %949 = vst [vmem:[#allocation1 + $0x4] ss:$9 sm:$0xff] %v537_v13  ;;  %v1172_v13 = vadd.f32 %v1171_v1, %v1170_v46  ;;  %v1146_v35 = vadd.f32 %v1145_v25, %v1144_v51  ;;  %v6579_v1 = vrot.slane %v4503_v59, 5  ;;  %v542_v46 = vmul.f32 %v3970_v16, %v6536_v33 }
  0xd2   :  { %6656 = vst [vmem:[#allocation4_spill] sm:$0xff] %v4503_v59  ;;  %v543_v60 = vmul.f32 %v3977_v19, %v6539_v21  ;;  %v544_v6 = vmul.f32 %v3989_v24, %v6538_v36  ;;  %v545_v42 = vmul.f32 %v3999_v28, %v6540_v5  ;;  %v1161_v51 = vrot.slane %v1160_v63, 1 }
  0xd3   :  { %950 = vst [vmem:[#allocation1 + $0x5] ss:$9 sm:$0xff] %v538_v7  ;;  %v540_v7 = vmul.f32 %v3956_v10, %v6537_v62  ;;  %v1173_v3 = vrot.slane %v1172_v13, 2  ;;  %v1167_v10 = vadd.f32 %v1166_v44, %v1165_v57  ;;  %v1147_v25 = vrot.slane %v1146_v35, 1 }
  0xd4   :  { %951 = vst [vmem:[#allocation1 + $0x6] ss:$9 sm:$0xff] %v539_v32  ;;  %v541_v32 = vmul.f32 %v3967_v15, %v4503_v59  ;;  %v1180_v33 = vrot.slane %v1179_v0, 2  ;;  %v546_v57 = vmul.f32 %v4006_v31, %v6579_v1  ;;  %v1162_v5 = vadd.f32 %v1161_v51, %v1160_v63  ;;  %v4547_v51 = vld [vmem:[%s6455_s1] sm:$0x7f] }
  0xd5   :  { %v1174_v44 = vadd.f32 %v1173_v3, %v1172_v13  ;;  %v1168_v36 = vrot.slane %v1167_v10, 1  ;;  %6657 = vst [vmem:[#allocation5_spill] sm:$0xff] %v4536_v9  ;;  %v6543_v3 = vrot.slane %v4503_v59, 6 }
  0xd6   :  { %v1181_v56 = vadd.f32 %v1180_v33, %v1179_v0  ;;  %v1296_v63 = vadd.f32 %v4253_v50, %v1162_v5 }
  0xd7   :  { %v1175_v48 = vrot.slane %v1174_v44, 1 }
  0xdb   :  { %v952_v58 = vld [vmem:[#allocation1] sm:$0xff] }
  0xdc   :  { %953 = vst [vmem:[#allocation1] ss:$9 sm:$0xff] %v540_v7  ;;  %v1184_v26 = vsel %vm1085_vm0, %v952_v58, 0.0  ;;  %v1148_v7 = vadd.f32 %v1147_v25, %v1146_v35  ;;  %v1182_v35 = vrot.slane %v1181_v56, 1  ;;  %v2208_v25 = vrot.slane %v1296_v63, 6 }
  0xdd   :  { %954 = vst [vmem:[#allocation1 + $0x1] ss:$9 sm:$0xff] %v541_v32  ;;  %v1185_v62 = vrot.slane %v1184_v26, 4  ;;  %v1295_v32 = vadd.f32 %v4253_v50, %v1155_v47  ;;  %v6576_v47 = vrot.slane %v4536_v9, 4 }
  0xde   :  { %955 = vst [vmem:[#allocation1 + $0x2] ss:$9 sm:$0xff] %v542_v46  ;;  %v1294_v33 = vadd.f32 %v4253_v50, %v1148_v7  ;;  %v6578_v46 = vrot.slane %v4536_v9, 1  ;;  %v1183_v7 = vadd.f32 %v1182_v35, %v1181_v56 }
  0xdf   :  { %956 = vst [vmem:[#allocation1 + $0x3] ss:$9 sm:$0xff] %v543_v60  ;;  %v1186_v21 = vadd.f32 %v1185_v62, %v1184_v26  ;;  %v1169_v60 = vadd.f32 %v1168_v36, %v1167_v10  ;;  %v6542_v62 = vrot.slane %v4503_v59, 7  ;;  %v2206_v0 = vrot.slane %v1295_v32, 7 }
  0xe0   :  { %957 = vst [vmem:[#allocation1 + $0x4] ss:$9 sm:$0xff] %v544_v6  ;;  %v1176_v6 = vadd.f32 %v1175_v48, %v1174_v44  ;;  %v6577_v36 = vrot.slane %v4536_v9, 3  ;;  %v550_v32 = vmul.f32 %v3977_v19, %v6578_v46 }
  0xe1   :  { %958 = vst [vmem:[#allocation1 + $0x5] ss:$9 sm:$0xff] %v545_v42  ;;  %v1187_v58 = vrot.slane %v1186_v21, 2  ;;  %v6544_v42 = vrot.slane %v4536_v9, 2  ;;  %v1297_v5 = vadd.f32 %v4253_v50, %v1169_v60  ;;  %v548_v10 = vmul.f32 %v3967_v15, %v6542_v62 }
  0xe2   :  { %959 = vst [vmem:[#allocation1 + $0x6] ss:$9 sm:$0xff] %v546_v57  ;;  %v549_v57 = vmul.f32 %v3970_v16, %v4536_v9  ;;  %v1298_v60 = vadd.f32 %v4253_v50, %v1176_v6  ;;  %v552_v56 = vmul.f32 %v3999_v28, %v6577_v36 }
  0xe3   :  { %v1188_v13 = vadd.f32 %v1187_v58, %v1186_v21  ;;  %v547_v21 = vmul.f32 %v4547_v51, %v6543_v3  ;;  %v2207_v58 = vsel %vm2186_vm1, %v2206_v0, %v1294_v33  ;;  %v551_v63 = vmul.f32 %v3989_v24, %v6544_v42 }
  0xe4   :  { %v2210_v3 = vrot.slane %v1297_v5, 5  ;;  %v2209_v33 = vsel %vm2189_vm2, %v2208_v25, %v2207_v58  ;;  %v553_v0 = vmul.f32 %v4006_v31, %v6576_v47  ;;  %v6567_v58 = vrot.slane %v4536_v9, 7 }
  0xe5   :  { %v1189_v26 = vrot.slane %v1188_v13, 1 }
  0xe6   :  { %v2211_v42 = vsel %vm2192_vm3, %v2210_v3, %v2209_v33 }
  0xe7   :  { %v1190_v35 = vadd.f32 %v1189_v26, %v1188_v13  ;;  %v6574_v13 = vrot.slane %v4536_v9, 5 }
  0xe9   :  { %v960_v44 = vld [vmem:[#allocation1] sm:$0xff] }
  0xea   :  { %v1191_v48 = vsel %vm1085_vm0, %v960_v44, 0.0  ;;  %961 = vst [vmem:[#allocation1] ss:$9 sm:$0xff] %v547_v21  ;;  %v1299_v44 = vadd.f32 %v4253_v50, %v1183_v7  ;;  %v2212_v21 = vrot.slane %v1298_v60, 4  ;;  %v554_v60 = vmul.f32 %v4547_v51, %v6574_v13 }
  0xeb   :  { %v1192_v62 = vrot.slane %v1191_v48, 4  ;;  %962 = vst [vmem:[#allocation1 + $0x1] ss:$9 sm:$0xff] %v548_v10  ;;  %v1300_v10 = vadd.f32 %v4253_v50, %v1190_v35 }
  0xec   :  { %963 = vst [vmem:[#allocation1 + $0x2] ss:$9 sm:$0xff] %v549_v57  ;;  %v2214_v25 = vrot.slane %v1299_v44, 3  ;;  %v6573_v57 = vrot.slane %v4536_v9, 6  ;;  %v2213_v7 = vsel %vm2195_vm4, %v2212_v21, %v2211_v42 }
  0xed   :  { %v1193_v6 = vadd.f32 %v1192_v62, %v1191_v48  ;;  %964 = vst [vmem:[#allocation1 + $0x3] ss:$9 sm:$0xff] %v550_v32  ;;  %v4583_v62 = vld [vmem:[%s6454_s0 + $0x88] sm:$0xff]  ;;  %v2216_v32 = vrot.slane %v1300_v10, 2 }
  0xee   :  { %965 = vst [vmem:[#allocation1 + $0x4] ss:$9 sm:$0xff] %v551_v63  ;;  %v6565_v48 = vrot.slane %v4583_v62, 1  ;;  %v6561_v35 = vrot.slane %v4583_v62, 2  ;;  %v555_v33 = vmul.f32 %v3967_v15, %v6573_v57  ;;  %v6556_v42 = vrot.slane %v4583_v62, 3 }
  0xef   :  { %v1194_v5 = vrot.slane %v1193_v6, 2  ;;  %966 = vst [vmem:[#allocation1 + $0x5] ss:$9 sm:$0xff] %v552_v56  ;;  %v2215_v56 = vsel %vm2198_vm5, %v2214_v25, %v2213_v7  ;;  %v557_v44 = vmul.f32 %v3977_v19, %v4583_v62 }
  0xf0   :  { %967 = vst [vmem:[#allocation1 + $0x6] ss:$9 sm:$0xff] %v553_v0  ;;  %v556_v0 = vmul.f32 %v3970_v16, %v6567_v58  ;;  %v558_v10 = vmul.f32 %v3989_v24, %v6565_v48  ;;  %v559_v25 = vmul.f32 %v3999_v28, %v6561_v35  ;;  %v4712_v35 = vld [vmem:[%s6454_s0 + $0xa8] sm:$0xff] }
  0xf1   :  { %v1195_v26 = vadd.f32 %v1194_v5, %v1193_v6  ;;  %6658 = vst [vmem:[#allocation6_spill] sm:$0xff] %v4583_v62  ;;  %v2217_v5 = vsel %vm2201_vm6, %v2216_v32, %v2215_v56  ;;  %v6549_v32 = vrot.slane %v4583_v62, 5  ;;  %v6545_v56 = vrot.slane %v4583_v62, 7 }
  0xf2   :  { %6661 = vst [vmem:[#allocation9_spill] sm:$0xff] %v4712_v35 }
  0xf3   :  { %v1196_v3 = vrot.slane %v1195_v26, 1 }
  0xf5   :  { %v1197_v63 = vadd.f32 %v1196_v3, %v1195_v26  ;;  %v6550_v3 = vrot.slane %v4583_v62, 4 }
  0xf7   :  { %v1301_v6 = vadd.f32 %v4253_v50, %v1197_v63  ;;  %v4604_v21 = vld [vmem:[#allocation1] sm:$0xff]  ;;  %v560_v50 = vmul.f32 %v4006_v31, %v6556_v42  ;;  %v6546_v63 = vrot.slane %v4583_v62, 6  ;;  %v6703_v62 = vrot.slane %v4127_v34, 7 }
  0xf8   :  { %969 = vst [vmem:[#allocation1] ss:$9 sm:$0xff] %v554_v60  ;;  %v4622_v60 = vld [vmem:[%s6454_s0 + $0x90] sm:$0xff] }
  0xf9   :  { %v2218_v26 = vrot.slane %v1301_v6, 1  ;;  %970 = vst [vmem:[#allocation1 + $0x1] ss:$9 sm:$0xff] %v555_v33  ;;  %v561_v33 = vmul.f32 %v4547_v51, %v6550_v3  ;;  %v562_v6 = vmul.f32 %v3967_v15, %v6549_v32 }
  0xfa   :  { %971 = vst [vmem:[#allocation1 + $0x2] ss:$9 sm:$0xff] %v556_v0  ;;  %v6547_v0 = vrot.slane %v4622_v60, 1 }
  0xfb   :  { %v2219_v7 = vsel %vm2204_vm7, %v2218_v26, %v2217_v5  ;;  %972 = vst [vmem:[#allocation1 + $0x3] ss:$9 sm:$0xff] %v557_v44  ;;  %v6548_v44 = vrot.slane %v4622_v60, 2  ;;  %v563_v5 = vmul.f32 %v3970_v16, %v6546_v63  ;;  %v6552_v63 = vrot.slane %v4622_v60, 4 }
  0xfc   :  { %2328 = vmatmul.f32.gmra.mxu0 %v2219_v7  ;;  %973 = vst [vmem:[#allocation1 + $0x4] ss:$9 sm:$0xff] %v558_v10  ;;  %v564_v10 = vmul.f32 %v3977_v19, %v6545_v56  ;;  %v6551_v56 = vrot.slane %v4622_v60, 3 }
  0xfd   :  { %974 = vst [vmem:[#allocation1 + $0x5] ss:$9 sm:$0xff] %v559_v25  ;;  %v565_v25 = vmul.f32 %v3989_v24, %v4622_v60  ;;  %v567_v7 = vmul.f32 %v4006_v31, %v6548_v44  ;;  %v6555_v44 = vrot.slane %v4622_v60, 7 }
  0xfe   :  { %975 = vst [vmem:[#allocation1 + $0x6] ss:$9 sm:$0xff] %v560_v50  ;;  %v566_v50 = vmul.f32 %v3999_v28, %v6547_v0  ;;  %v4656_v0 = vld [vmem:[%s6454_s0 + $0x98] sm:$0xff] }
  0xff   :  { %6659 = vst [vmem:[#allocation7_spill] sm:$0xff] %v4622_v60  ;;  %v572_v3 = vmul.f32 %v3989_v24, %v6555_v44  ;;  %v6560_v44 = vrot.slane %v4656_v0, 4  ;;  %v6562_v42 = vrot.slane %v4656_v0, 6 }
 0x100   :  { %6660 = vst [vmem:[#allocation8_spill] sm:$0xff] %v4656_v0 }
 0x105   :  { %v4640_v26 = vld [vmem:[#allocation1] sm:$0xff] }
 0x106   :  { %977 = vst [vmem:[#allocation1] ss:$9 sm:$0xff] %v561_v33  ;;  %v6554_v33 = vrot.slane %v4622_v60, 5 }
 0x107   :  { %978 = vst [vmem:[#allocation1 + $0x1] ss:$9 sm:$0xff] %v562_v6  ;;  %v6553_v6 = vrot.slane %v4622_v60, 6 }
 0x108   :  { %979 = vst [vmem:[#allocation1 + $0x2] ss:$9 sm:$0xff] %v563_v5  ;;  %v568_v5 = vmul.f32 %v4547_v51, %v6551_v56  ;;  %v573_v56 = vmul.f32 %v3999_v28, %v4656_v0 }
 0x109   :  { %980 = vst [vmem:[#allocation1 + $0x3] ss:$9 sm:$0xff] %v564_v10  ;;  %v569_v10 = vmul.f32 %v3967_v15, %v6552_v63 }
 0x10a   :  { %981 = vst [vmem:[#allocation1 + $0x4] ss:$9 sm:$0xff] %v565_v25  ;;  %v6557_v25 = vrot.slane %v4656_v0, 1 }
 0x10b   :  { %982 = vst [vmem:[#allocation1 + $0x5] ss:$9 sm:$0xff] %v566_v50  ;;  %v570_v50 = vmul.f32 %v3970_v16, %v6554_v33  ;;  %v6559_v33 = vrot.slane %v4656_v0, 3 }
 0x10c   :  { %983 = vst [vmem:[#allocation1 + $0x6] ss:$9 sm:$0xff] %v567_v7  ;;  %v571_v7 = vmul.f32 %v3977_v19, %v6553_v6  ;;  %v574_v63 = vmul.f32 %v4006_v31, %v6557_v25  ;;  %v6558_v6 = vrot.slane %v4656_v0, 2 }
 0x113   :  { %v984_v32 = vld [vmem:[#allocation1] sm:$0xff] }
 0x114   :  { %985 = vst [vmem:[#allocation1] ss:$9 sm:$0xff] %v568_v5  ;;  %v6563_v5 = vrot.slane %v4656_v0, 5 }
 0x115   :  { %986 = vst [vmem:[#allocation1 + $0x1] ss:$9 sm:$0xff] %v569_v10  ;;  %v575_v10 = vmul.f32 %v4547_v51, %v6558_v6  ;;  %v579_v6 = vmul.f32 %v3989_v24, %v6562_v42  ;;  %v6566_v42 = vrot.slane %v4712_v35, 1 }
 0x116   :  { %987 = vst [vmem:[#allocation1 + $0x2] ss:$9 sm:$0xff] %v570_v50  ;;  %v6564_v50 = vrot.slane %v4656_v0, 7  ;;  %v6701_v0 = vrot.slane %v4127_v34, 6 }
 0x117   :  { %988 = vst [vmem:[#allocation1 + $0x3] ss:$9 sm:$0xff] %v571_v7  ;;  %v578_v7 = vmul.f32 %v3977_v19, %v6563_v5  ;;  %v6568_v5 = vrot.slane %v4712_v35, 3 }
 0x118   :  { %989 = vst [vmem:[#allocation1 + $0x4] ss:$9 sm:$0xff] %v572_v3  ;;  %v576_v3 = vmul.f32 %v3967_v15, %v6559_v33  ;;  %v580_v33 = vmul.f32 %v3999_v28, %v6564_v50 }
 0x119   :  { %990 = vst [vmem:[#allocation1 + $0x5] ss:$9 sm:$0xff] %v573_v56  ;;  %v52_v56 = vld [vmem:[%s6454_s0 + $0xa0] sm:$0x1] }
 0x11a   :  { %991 = vst [vmem:[#allocation1 + $0x6] ss:$9 sm:$0xff] %v574_v63  ;;  %v577_v63 = vmul.f32 %v3970_v16, %v6560_v44  ;;  %v581_v44 = vmul.f32 %v4006_v31, %v52_v56  ;;  %v6570_v56 = vrot.slane %v4712_v35, 5 }
 0x121   :  { %v992_v25 = vld [vmem:[#allocation1] sm:$0xff] }
 0x122   :  { %993 = vst [vmem:[#allocation1] ss:$9 sm:$0xff] %v575_v10  ;;  %v6572_v10 = vrot.slane %v4712_v35, 2  ;;  %v1219_v13 = vsel %vm1085_vm0, %v992_v25, 0.0 }
 0x123   :  { %994 = vst [vmem:[#allocation1 + $0x1] ss:$9 sm:$0xff] %v576_v3  ;;  %v6569_v3 = vrot.slane %v4712_v35, 4 }
 0x124   :  { %995 = vst [vmem:[#allocation1 + $0x2] ss:$9 sm:$0xff] %v577_v63  ;;  %v582_v63 = vmul.f32 %v4547_v51, %v4712_v35 }
 0x125   :  { %996 = vst [vmem:[#allocation1 + $0x3] ss:$9 sm:$0xff] %v578_v7  ;;  %v583_v7 = vmul.f32 %v3967_v15, %v6566_v42  ;;  %v586_v48 = vmul.f32 %v3989_v24, %v6569_v3  ;;  %v587_v42 = vmul.f32 %v3999_v28, %v6570_v56  ;;  %v1205_v56 = vsel %vm1085_vm0, %v4640_v26, 0.0 }
 0x126   :  { %997 = vst [vmem:[#allocation1 + $0x4] ss:$9 sm:$0xff] %v579_v6  ;;  %v585_v6 = vmul.f32 %v3977_v19, %v6568_v5  ;;  %v4743_v5 = vld [vmem:[%s6454_s0 + $0xb0] sm:$0xff] }
 0x127   :  { %998 = vst [vmem:[#allocation1 + $0x5] ss:$9 sm:$0xff] %v580_v33  ;;  %v6571_v33 = vrot.slane %v4712_v35, 6  ;;  %v6580_v3 = vrot.slane %v4743_v5, 1  ;;  %v6585_v57 = vrot.slane %v4743_v5, 5 }
 0x128   :  { %999 = vst [vmem:[#allocation1 + $0x6] ss:$9 sm:$0xff] %v581_v44  ;;  %v584_v44 = vmul.f32 %v3970_v16, %v6572_v10  ;;  %v590_v10 = vmul.f32 %v3967_v15, %v4743_v5 }
 0x129   :  { %v588_v58 = vmul.f32 %v4006_v31, %v6571_v33  ;;  %6662 = vst [vmem:[#allocation10_spill] sm:$0xff] %v4743_v5  ;;  %v1206_v33 = vrot.slane %v1205_v56, 4 }
 0x12b   :  { %v1207_v36 = vadd.f32 %v1206_v33, %v1205_v56 }
 0x12d   :  { %v1208_v33 = vrot.slane %v1207_v36, 2 }
 0x12f   :  { %v1000_v50 = vld [vmem:[#allocation1] sm:$0xff] }
 0x130   :  { %1001 = vst [vmem:[#allocation1] ss:$9 sm:$0xff] %v582_v63  ;;  %v6575_v63 = vrot.slane %v4712_v35, 7  ;;  %v1226_v25 = vsel %vm1085_vm0, %v1000_v50, 0.0  ;;  %v6590_v50 = vrot.slane %v4743_v5, 6 }
 0x131   :  { %1002 = vst [vmem:[#allocation1 + $0x1] ss:$9 sm:$0xff] %v583_v7  ;;  %v6581_v7 = vrot.slane %v4743_v5, 2 }
 0x132   :  { %1003 = vst [vmem:[#allocation1 + $0x2] ss:$9 sm:$0xff] %v584_v44  ;;  %v1212_v44 = vsel %vm1085_vm0, %v984_v32, 0.0  ;;  %v591_v32 = vmul.f32 %v3970_v16, %v6580_v3  ;;  %v1220_v3 = vrot.slane %v1219_v13, 4 }
 0x133   :  { %1004 = vst [vmem:[#allocation1 + $0x3] ss:$9 sm:$0xff] %v585_v6  ;;  %v589_v6 = vmul.f32 %v4547_v51, %v6575_v63  ;;  %v1213_v26 = vrot.slane %v1212_v44, 4  ;;  %v592_v63 = vmul.f32 %v3977_v19, %v6581_v7  ;;  %v595_v7 = vmul.f32 %v4006_v31, %v6585_v57 }
 0x134   :  { %1005 = vst [vmem:[#allocation1 + $0x4] ss:$9 sm:$0xff] %v586_v48  ;;  %v6583_v48 = vrot.slane %v4743_v5, 3  ;;  %v1221_v54 = vadd.f32 %v1220_v3, %v1219_v13  ;;  %v596_v3 = vmul.f32 %v4547_v51, %v6590_v50 }
 0x135   :  { %1006 = vst [vmem:[#allocation1 + $0x5] ss:$9 sm:$0xff] %v587_v42  ;;  %v1198_v42 = vsel %vm1085_vm0, %v4604_v21, 0.0  ;;  %v1214_v55 = vadd.f32 %v1213_v26, %v1212_v44  ;;  %v6591_v44 = vrot.slane %v4743_v5, 7 }
 0x136   :  { %1007 = vst [vmem:[#allocation1 + $0x6] ss:$9 sm:$0xff] %v588_v58  ;;  %v6586_v58 = vrot.slane %v4743_v5, 4  ;;  %v1199_v47 = vrot.slane %v1198_v42, 4  ;;  %v593_v46 = vmul.f32 %v3989_v24, %v6583_v48  ;;  %v1227_v48 = vrot.slane %v1226_v25, 4 }
 0x137   :  { %v1215_v57 = vrot.slane %v1214_v55, 2  ;;  %v1222_v26 = vrot.slane %v1221_v54, 2 }
 0x138   :  { %v594_v1 = vmul.f32 %v3999_v28, %v6586_v58  ;;  %v1200_v56 = vadd.f32 %v1199_v47, %v1198_v42  ;;  %v1209_v47 = vadd.f32 %v1208_v33, %v1207_v36 }
 0x139   :  { %v1223_v50 = vadd.f32 %v1222_v26, %v1221_v54 }
 0x13a   :  { %v1210_v36 = vrot.slane %v1209_v47, 1 }
 0x13d   :  { %v1008_v21 = vld [vmem:[#allocation1] sm:$0xff] }
 0x13e   :  { %1009 = vst [vmem:[#allocation1] ss:$9 sm:$0xff] %v589_v6  ;;  %v1233_v6 = vsel %vm1085_vm0, %v1008_v21, 0.0  ;;  %v1216_v21 = vadd.f32 %v1215_v57, %v1214_v55 }
 0x13f   :  { %1010 = vst [vmem:[#allocation1 + $0x1] ss:$9 sm:$0xff] %v590_v10  ;;  %v4782_v10 = vld [vmem:[%s6454_s0 + $0xb8] sm:$0xff]  ;;  %v1234_v42 = vrot.slane %v1233_v6, 4 }
 0x140   :  { %1011 = vst [vmem:[#allocation1 + $0x2] ss:$9 sm:$0xff] %v591_v32  ;;  %v6594_v32 = vrot.slane %v4782_v10, 1  ;;  %v6595_v13 = vrot.slane %v4782_v10, 3 }
 0x141   :  { %1012 = vst [vmem:[#allocation1 + $0x3] ss:$9 sm:$0xff] %v592_v63  ;;  %v1201_v63 = vrot.slane %v1200_v56, 2  ;;  %v1235_v33 = vadd.f32 %v1234_v42, %v1233_v6  ;;  %v1211_v42 = vadd.f32 %v1210_v36, %v1209_v47  ;;  %v4814_v47 = vld [vmem:[%s6453_s2] ss:$0 sm:$0xff] }
 0x142   :  { %1013 = vst [vmem:[#allocation1 + $0x4] ss:$9 sm:$0xff] %v593_v46  ;;  %v1228_v46 = vadd.f32 %v1227_v48, %v1226_v25  ;;  %v6621_v48 = vrot.slane %v4782_v10, 4  ;;  %v598_v25 = vmul.f32 %v3970_v16, %v4782_v10  ;;  %v599_v45 = vmul.f32 %v3977_v19, %v6594_v32 }
 0x143   :  { %1014 = vst [vmem:[#allocation1 + $0x5] ss:$9 sm:$0xff] %v594_v1  ;;  %v6593_v1 = vrot.slane %v4782_v10, 2  ;;  %v1202_v58 = vadd.f32 %v1201_v63, %v1200_v56  ;;  %v601_v57 = vmul.f32 %v3999_v28, %v6595_v13  ;;  %v1217_v56 = vrot.slane %v1216_v21, 1 }
 0x144   :  { %6663 = vst [vmem:[#allocation11_spill] sm:$0xff] %v4782_v10  ;;  %v1229_v53 = vrot.slane %v1228_v46, 2  ;;  %v602_v54 = vmul.f32 %v4006_v31, %v6621_v48 }
 0x145   :  { %1015 = vst [vmem:[#allocation1 + $0x6] ss:$9 sm:$0xff] %v595_v7  ;;  %v597_v7 = vmul.f32 %v3967_v15, %v6591_v44  ;;  %v600_v55 = vmul.f32 %v3989_v24, %v6593_v1  ;;  %v1203_v63 = vrot.slane %v1202_v58, 1  ;;  %v1236_v44 = vrot.slane %v1235_v33, 2 }
 0x146   :  { %v1230_v26 = vadd.f32 %v1229_v53, %v1228_v46  ;;  %v1224_v1 = vrot.slane %v1223_v50, 1  ;;  %v1218_v13 = vadd.f32 %v1217_v56, %v1216_v21  ;;  %v6598_v53 = vrot.slane %v4782_v10, 5 }
 0x147   :  { %v1237_v40 = vadd.f32 %v1236_v44, %v1235_v33  ;;  %v6620_v21 = vrot.slane %v4782_v10, 7 }
 0x148   :  { %v1231_v36 = vrot.slane %v1230_v26, 1  ;;  %v1304_v46 = vadd.f32 %v4814_v47, %v1218_v13 }
 0x149   :  { %v1238_v33 = vrot.slane %v1237_v40, 1 }
 0x14c   :  { %v1016_v43 = vld [vmem:[#allocation1] sm:$0xff] }
 0x14d   :  { %1017 = vst [vmem:[#allocation1] ss:$9 sm:$0xff] %v596_v3  ;;  %v1240_v6 = vsel %vm1085_vm0, %v1016_v43, 0.0  ;;  %v1204_v3 = vadd.f32 %v1203_v63, %v1202_v58  ;;  %v6597_v58 = vrot.slane %v4782_v10, 6  ;;  %v2222_v63 = vrot.slane %v1304_v46, 6 }
 0x14e   :  { %1018 = vst [vmem:[#allocation1 + $0x1] ss:$9 sm:$0xff] %v597_v7  ;;  %v1241_v41 = vrot.slane %v1240_v6, 4  ;;  %v1303_v7 = vadd.f32 %v4814_v47, %v1211_v42  ;;  %v6695_v10 = vrot.slane %v4127_v34, 1 }
 0x14f   :  { %1019 = vst [vmem:[#allocation1 + $0x2] ss:$9 sm:$0xff] %v598_v25  ;;  %v1302_v25 = vadd.f32 %v4814_v47, %v1204_v3  ;;  %v1239_v3 = vadd.f32 %v1238_v33, %v1237_v40 }
 0x150   :  { %1020 = vst [vmem:[#allocation1 + $0x3] ss:$9 sm:$0xff] %v599_v45  ;;  %v1242_v32 = vadd.f32 %v1241_v41, %v1240_v6  ;;  %v1225_v45 = vadd.f32 %v1224_v1, %v1223_v50  ;;  %v4821_v41 = vld [vmem:[%s6454_s0 + $0xc0] sm:$0xff]  ;;  %v603_v50 = vmul.f32 %v4547_v51, %v6598_v53 }
 0x151   :  { %1021 = vst [vmem:[#allocation1 + $0x4] ss:$9 sm:$0xff] %v600_v55  ;;  %v2220_v55 = vrot.slane %v1303_v7, 7  ;;  %v6599_v56 = vrot.slane %v4821_v41, 1  ;;  %v6619_v6 = vrot.slane %v4821_v41, 2  ;;  %v6618_v42 = vrot.slane %v4821_v41, 3 }
 0x152   :  { %1022 = vst [vmem:[#allocation1 + $0x5] ss:$9 sm:$0xff] %v601_v57  ;;  %v1243_v43 = vrot.slane %v1242_v32, 2  ;;  %v1232_v57 = vadd.f32 %v1231_v36, %v1230_v26  ;;  %v1305_v1 = vadd.f32 %v4814_v47, %v1225_v45  ;;  %v606_v7 = vmul.f32 %v3977_v19, %v4821_v41 }
 0x153   :  { %1023 = vst [vmem:[#allocation1 + $0x6] ss:$9 sm:$0xff] %v602_v54  ;;  %v605_v54 = vmul.f32 %v3970_v16, %v6620_v21  ;;  %v607_v46 = vmul.f32 %v3989_v24, %v6599_v56  ;;  %v608_v40 = vmul.f32 %v3999_v28, %v6619_v6 }
 0x154   :  { %6664 = vst [vmem:[#allocation12_spill] sm:$0xff] %v4821_v41  ;;  %v1244_v44 = vadd.f32 %v1243_v43, %v1242_v32  ;;  %v604_v32 = vmul.f32 %v3967_v15, %v6597_v58  ;;  %v2221_v43 = vsel %vm2186_vm1, %v2220_v55, %v1302_v25  ;;  %v1306_v45 = vadd.f32 %v4814_v47, %v1232_v57 }
 0x155   :  { %v2224_v53 = vrot.slane %v1305_v1, 5  ;;  %v2223_v25 = vsel %vm2189_vm2, %v2222_v63, %v2221_v43  ;;  %v609_v55 = vmul.f32 %v4006_v31, %v6618_v42  ;;  %v6616_v43 = vrot.slane %v4821_v41, 5 }
 0x156   :  { %v1245_v13 = vrot.slane %v1244_v44, 1 }
 0x157   :  { %v2225_v56 = vsel %vm2192_vm3, %v2224_v53, %v2223_v25 }
 0x158   :  { %v1246_v33 = vadd.f32 %v1245_v13, %v1244_v44  ;;  %v6617_v44 = vrot.slane %v4821_v41, 4 }
 0x15a   :  { %v1024_v26 = vld [vmem:[#allocation1] sm:$0xff] }
 0x15b   :  { %v1247_v36 = vsel %vm1085_vm0, %v1024_v26, 0.0  ;;  %1025 = vst [vmem:[#allocation1] ss:$9 sm:$0xff] %v603_v50  ;;  %v1307_v26 = vadd.f32 %v4814_v47, %v1239_v3  ;;  %v2226_v50 = vrot.slane %v1306_v45, 4  ;;  %v6615_v3 = vrot.slane %v4821_v41, 6 }
 0x15c   :  { %v1248_v58 = vrot.slane %v1247_v36, 4  ;;  %1026 = vst [vmem:[#allocation1 + $0x1] ss:$9 sm:$0xff] %v604_v32  ;;  %v1308_v32 = vadd.f32 %v4814_v47, %v1246_v33  ;;  %v610_v45 = vmul.f32 %v4547_v51, %v6617_v44  ;;  %v611_v33 = vmul.f32 %v3967_v15, %v6616_v43 }
 0x15d   :  { %1027 = vst [vmem:[#allocation1 + $0x2] ss:$9 sm:$0xff] %v605_v54  ;;  %v2228_v63 = vrot.slane %v1307_v26, 3  ;;  %v4864_v54 = vld [vmem:[%s6454_s0 + $0xc8] sm:$0xff]  ;;  %v6681_v44 = vrot.slane %v4059_v52, 3 }
 0x15e   :  { %v1249_v57 = vadd.f32 %v1248_v58, %v1247_v36  ;;  %1028 = vst [vmem:[#allocation1 + $0x3] ss:$9 sm:$0xff] %v606_v7  ;;  %v2227_v58 = vsel %vm2195_vm4, %v2226_v50, %v2225_v56  ;;  %v6614_v7 = vrot.slane %v4821_v41, 7  ;;  %v2230_v36 = vrot.slane %v1308_v32, 2  ;;  %v3847_v41 = vld [vmem:[%s6454_s0 + $0x20] sm:$0xff] }
 0x15f   :  { %1029 = vst [vmem:[#allocation1 + $0x4] ss:$9 sm:$0xff] %v607_v46  ;;  %v6613_v56 = vrot.slane %v4864_v54, 1  ;;  %v6612_v25 = vrot.slane %v4864_v54, 2  ;;  %v614_v32 = vmul.f32 %v3989_v24, %v4864_v54 }
 0x160   :  { %v1250_v1 = vrot.slane %v1249_v57, 2  ;;  %1030 = vst [vmem:[#allocation1 + $0x5] ss:$9 sm:$0xff] %v608_v40  ;;  %v2229_v40 = vsel %vm2198_vm5, %v2228_v63, %v2227_v58  ;;  %v613_v26 = vmul.f32 %v3977_v19, %v6614_v7 }
 0x161   :  { %1031 = vst [vmem:[#allocation1 + $0x6] ss:$9 sm:$0xff] %v609_v55  ;;  %v612_v55 = vmul.f32 %v3970_v16, %v6615_v3  ;;  %v615_v63 = vmul.f32 %v3999_v28, %v6613_v56 }
 0x162   :  { %v1251_v13 = vadd.f32 %v1250_v1, %v1249_v57  ;;  %6665 = vst [vmem:[#allocation13_spill] sm:$0xff] %v4864_v54  ;;  %v2231_v1 = vsel %vm2201_vm6, %v2230_v36, %v2229_v40  ;;  %v6603_v36 = vrot.slane %v4864_v54, 4  ;;  %v6600_v40 = vrot.slane %v4864_v54, 6 }
 0x164   :  { %v1252_v53 = vrot.slane %v1251_v13, 1 }
 0x166   :  { %v1253_v46 = vadd.f32 %v1252_v53, %v1251_v13  ;;  %v6611_v53 = vrot.slane %v4864_v54, 3 }
 0x168   :  { %v1309_v57 = vadd.f32 %v4814_v47, %v1253_v46  ;;  %v4884_v50 = vld [vmem:[#allocation1] sm:$0xff]  ;;  %v616_v47 = vmul.f32 %v4006_v31, %v6612_v25  ;;  %v4902_v46 = vld [vmem:[%s6454_s0 + $0xd0] sm:$0xff] }
 0x169   :  { %6666 = vst [vmem:[#allocation14_spill] sm:$0xff] %v4884_v50  ;;  %v6687_v50 = vrot.slane %v4093_v4, 1 }
 0x16a   :  { %1033 = vst [vmem:[#allocation1] ss:$9 sm:$0xff] %v610_v45  ;;  %v2232_v13 = vrot.slane %v1309_v57, 1  ;;  %v6601_v45 = vrot.slane %v4864_v54, 5  ;;  %v618_v57 = vmul.f32 %v3967_v15, %v6603_v36  ;;  %v6608_v36 = vrot.slane %v4902_v46, 6 }
 0x16b   :  { %1034 = vst [vmem:[#allocation1 + $0x1] ss:$9 sm:$0xff] %v611_v33  ;;  %v6602_v33 = vrot.slane %v4864_v54, 7 }
 0x16c   :  { %1035 = vst [vmem:[#allocation1 + $0x2] ss:$9 sm:$0xff] %v612_v55  ;;  %v2233_v58 = vsel %vm2204_vm7, %v2232_v13, %v2231_v1  ;;  %v617_v55 = vmul.f32 %v4547_v51, %v6611_v53  ;;  %v619_v1 = vmul.f32 %v3970_v16, %v6601_v45  ;;  %v6609_v45 = vrot.slane %v4902_v46, 3 }
 0x16d   :  { %1036 = vst [vmem:[#allocation1 + $0x3] ss:$9 sm:$0xff] %v613_v26  ;;  %2331 = vmatmul.f32.gmra.mxu0 %v2233_v58  ;;  %v6604_v26 = vrot.slane %v4902_v46, 1 }
 0x16e   :  { %1037 = vst [vmem:[#allocation1 + $0x4] ss:$9 sm:$0xff] %v614_v32  ;;  %v620_v32 = vmul.f32 %v3977_v19, %v6600_v40  ;;  %v6610_v40 = vrot.slane %v4902_v46, 2 }
 0x16f   :  { %1038 = vst [vmem:[#allocation1 + $0x5] ss:$9 sm:$0xff] %v615_v63  ;;  %v621_v63 = vmul.f32 %v3989_v24, %v6602_v33  ;;  %v623_v58 = vmul.f32 %v4006_v31, %v6604_v26  ;;  %v6605_v33 = vrot.slane %v4902_v46, 4 }
 0x170   :  { %1039 = vst [vmem:[#allocation1 + $0x6] ss:$9 sm:$0xff] %v616_v47  ;;  %v622_v47 = vmul.f32 %v3999_v28, %v4902_v46 }
 0x171   :  { %6667 = vst [vmem:[#allocation15_spill] sm:$0xff] %v4902_v46 }
 0x177   :  { %v4919_v13 = vld [vmem:[#allocation1] sm:$0xff] }
 0x178   :  { %6668 = vst [vmem:[#allocation16_spill] sm:$0xff] %v4919_v13 }
 0x179   :  { %1041 = vst [vmem:[#allocation1] ss:$9 sm:$0xff] %v617_v55  ;;  %v6606_v55 = vrot.slane %v4902_v46, 5 }
 0x17a   :  { %1042 = vst [vmem:[#allocation1 + $0x1] ss:$9 sm:$0xff] %v618_v57  ;;  %v624_v57 = vmul.f32 %v4547_v51, %v6610_v40  ;;  %v4955_v51 = vld [vmem:[%s6457_s3] sm:$0x7f] }
 0x17b   :  { %1043 = vst [vmem:[#allocation1 + $0x2] ss:$9 sm:$0xff] %v619_v1  ;;  %v6607_v1 = vrot.slane %v4902_v46, 7  ;;  %v1316_v8 = vrot.slane %v4955_v51, 2  ;;  %v1317_v7 = vrot.slane %v4955_v51, 3  ;;  %v1318_v48 = vrot.slane %v4955_v51, 4 }
 0x17c   :  { %1044 = vst [vmem:[#allocation1 + $0x3] ss:$9 sm:$0xff] %v620_v32  ;;  %v625_v32 = vmul.f32 %v3967_v15, %v6609_v45  ;;  %v628_v15 = vmul.f32 %v3989_v24, %v6608_v36  ;;  %v6673_v45 = vrot.slane %v4026_v37, 3  ;;  %v1320_v35 = vrot.slane %v4955_v51, 6 }
 0x17d   :  { %1045 = vst [vmem:[#allocation1 + $0x4] ss:$9 sm:$0xff] %v621_v63  ;;  %v626_v63 = vmul.f32 %v3970_v16, %v6605_v33  ;;  %v629_v16 = vmul.f32 %v3999_v28, %v6607_v1  ;;  %v5055_v56 = vperm.slane %v1316_v8, 0  ;;  %v5100_v21 = vperm.slane %v1317_v7, 0 }
 0x17e   :  { %1046 = vst [vmem:[#allocation1 + $0x5] ss:$9 sm:$0xff] %v622_v47  ;;  %v59_v47 = vld [vmem:[%s6454_s0 + $0xd8] sm:$0x1] }
 0x17f   :  { %1047 = vst [vmem:[#allocation1 + $0x6] ss:$9 sm:$0xff] %v623_v58  ;;  %v627_v58 = vmul.f32 %v3977_v19, %v6606_v55  ;;  %v630_v33 = vmul.f32 %v4006_v31, %v59_v47  ;;  %v4965_v19 = vperm.slane %v4955_v51, 0  ;;  %v3843_v31 = vld [vmem:[%s6454_s0] sm:$0xff] }
 0x181   :  { %v4968_v55 = vrot.slane %v4965_v19, 1  ;;  %v4971_v24 = vrot.slane %v4965_v19, 2  ;;  %v4977_v28 = vrot.slane %v4965_v19, 4  ;;  %v4990_v47 = vrot.slane %v4965_v19, 6 }
 0x183   :  { %v1423_v1 = vmul.f32 %v4977_v28, %v87_v23 }
 0x186   :  { %v4950_v26 = vld [vmem:[#allocation1] sm:$0xff] }
 0x187   :  { %6669 = vst [vmem:[#allocation17_spill] sm:$0xff] %v4950_v26  ;;  %v6688_v26 = vrot.slane %v4093_v4, 2 }
 0x188   :  { %1049 = vst [vmem:[#allocation1] ss:$9 sm:$0xff] %v624_v57  ;;  %v4974_v57 = vrot.slane %v4965_v19, 3 }
 0x189   :  { %1050 = vst [vmem:[#allocation1 + $0x1] ss:$9 sm:$0xff] %v625_v32  ;;  %v1419_v32 = vmul.f32 %v3843_v31, %v4965_v19 }
 0x18a   :  { %1051 = vst [vmem:[#allocation1 + $0x2] ss:$9 sm:$0xff] %v626_v63  ;;  %v1420_v63 = vmul.f32 %v4968_v55, %v84_v12  ;;  %v1422_v31 = vmul.f32 %v4974_v57, %v86_v18 }
 0x18b   :  { %1052 = vst [vmem:[#allocation1 + $0x3] ss:$9 sm:$0xff] %v627_v58  ;;  %v1421_v58 = vmul.f32 %v4971_v24, %v85_v14  ;;  %v1425_v14 = vmul.f32 %v4990_v47, %v89_v30 }
 0x18c   :  { %1053 = vst [vmem:[#allocation1 + $0x4] ss:$9 sm:$0xff] %v628_v15 }
 0x18d   :  { %1054 = vst [vmem:[#allocation1 + $0x5] ss:$9 sm:$0xff] %v629_v16  ;;  %v1315_v16 = vrot.slane %v4955_v51, 1 }
 0x18e   :  { %1055 = vst [vmem:[#allocation1 + $0x6] ss:$9 sm:$0xff] %v630_v33  ;;  %v4984_v33 = vrot.slane %v4965_v19, 5 }
 0x18f   :  { %v5010_v36 = vperm.slane %v1315_v16, 0 }
 0x190   :  { %v1424_v12 = vmul.f32 %v4984_v33, %v88_v27 }
 0x191   :  { %v5013_v18 = vrot.slane %v5010_v36, 1  ;;  %v5016_v23 = vrot.slane %v5010_v36, 2  ;;  %v5019_v27 = vrot.slane %v5010_v36, 3  ;;  %v1426_v30 = vmul.f32 %v5010_v36, %v90_v38 }
 0x192   :  { %v5035_v16 = vrot.slane %v5010_v36, 6  ;;  %v6671_v38 = vrot.slane %v4026_v37, 2 }
 0x195   :  { %v4995_v15 = vld [vmem:[#allocation1] sm:$0xff] }
 0x196   :  { %6670 = vst [vmem:[#allocation18_spill] sm:$0xff] %v4995_v15 }
 0x197   :  { %1811 = vst [vmem:[#allocation1] ss:$9 sm:$0xff] %v1419_v32  ;;  %v5022_v32 = vrot.slane %v5010_v36, 4 }
 0x198   :  { %1813 = vst [vmem:[#allocation1 + $0x1] ss:$9 sm:$0xff] %v1420_v63  ;;  %v3844_v63 = vld [vmem:[%s6454_s0 + $0x8] sm:$0xff] }
 0x199   :  { %1815 = vst [vmem:[#allocation1 + $0x2] ss:$9 sm:$0xff] %v1421_v58  ;;  %v1427_v58 = vmul.f32 %v3844_v63, %v5013_v18  ;;  %v1430_v40 = vmul.f32 %v5022_v32, %v6673_v45  ;;  %v6674_v63 = vrot.slane %v4026_v37, 4  ;;  %v5061_v45 = vrot.slane %v5055_v56, 2 }
 0x19a   :  { %1817 = vst [vmem:[#allocation1 + $0x3] ss:$9 sm:$0xff] %v1422_v31  ;;  %v1428_v31 = vmul.f32 %v5016_v23, %v91_v39  ;;  %v6675_v39 = vrot.slane %v4026_v37, 5 }
 0x19b   :  { %1819 = vst [vmem:[#allocation1 + $0x4] ss:$9 sm:$0xff] %v1423_v1  ;;  %v5028_v1 = vrot.slane %v5010_v36, 5 }
 0x19c   :  { %1821 = vst [vmem:[#allocation1 + $0x5] ss:$9 sm:$0xff] %v1424_v12  ;;  %v1429_v12 = vmul.f32 %v5019_v27, %v6671_v38  ;;  %v1432_v25 = vmul.f32 %v5035_v16, %v6675_v39  ;;  %v5058_v38 = vrot.slane %v5055_v56, 1 }
 0x19d   :  { %1823 = vst [vmem:[#allocation1 + $0x6] ss:$9 sm:$0xff] %v1425_v14  ;;  %v1431_v53 = vmul.f32 %v5028_v1, %v6674_v63  ;;  %v3845_v63 = vld [vmem:[%s6454_s0 + $0x10] sm:$0xff] }
 0x19e   :  { %v1435_v39 = vmul.f32 %v3845_v63, %v5061_v45  ;;  %v6682_v63 = vrot.slane %v4059_v52, 4 }
 0x1a4   :  { %v5044_v14 = vld [vmem:[#allocation1] sm:$0xff] }
 0x1a5   :  { %6672 = vst [vmem:[#allocation19_spill] sm:$0xff] %v5044_v14  ;;  %v6693_v14 = vrot.slane %v4093_v4, 7 }
 0x1a6   :  { %1825 = vst [vmem:[#allocation1] ss:$9 sm:$0xff] %v1426_v30  ;;  %v5064_v30 = vrot.slane %v5055_v56, 3 }
 0x1a7   :  { %1826 = vst [vmem:[#allocation1 + $0x1] ss:$9 sm:$0xff] %v1427_v58  ;;  %v5067_v58 = vrot.slane %v5055_v56, 4 }
 0x1a8   :  { %1827 = vst [vmem:[#allocation1 + $0x2] ss:$9 sm:$0xff] %v1428_v31  ;;  %v6676_v31 = vrot.slane %v4026_v37, 6 }
 0x1a9   :  { %1828 = vst [vmem:[#allocation1 + $0x3] ss:$9 sm:$0xff] %v1429_v12  ;;  %v5079_v12 = vrot.slane %v5055_v56, 6 }
 0x1aa   :  { %1829 = vst [vmem:[#allocation1 + $0x4] ss:$9 sm:$0xff] %v1430_v40  ;;  %v1433_v8 = vmul.f32 %v5055_v56, %v6676_v31  ;;  %v5073_v40 = vrot.slane %v5055_v56, 5  ;;  %v6678_v31 = vrot.slane %v4059_v52, 1 }
 0x1ab   :  { %1830 = vst [vmem:[#allocation1 + $0x5] ss:$9 sm:$0xff] %v1431_v53  ;;  %v1439_v6 = vmul.f32 %v5079_v12, %v6682_v63 }
 0x1ac   :  { %1831 = vst [vmem:[#allocation1 + $0x6] ss:$9 sm:$0xff] %v1432_v25  ;;  %v6677_v25 = vrot.slane %v4026_v37, 7  ;;  %v1436_v3 = vmul.f32 %v5064_v30, %v6678_v31  ;;  %v6680_v37 = vrot.slane %v4059_v52, 2  ;;  %v1438_v42 = vmul.f32 %v5073_v40, %v6681_v44 }
 0x1ad   :  { %v5103_v31 = vrot.slane %v5100_v21, 1  ;;  %v5109_v44 = vrot.slane %v5100_v21, 3 }
 0x1ae   :  { %v1434_v53 = vmul.f32 %v5058_v38, %v6677_v25  ;;  %v1437_v25 = vmul.f32 %v5067_v58, %v6680_v37  ;;  %v5124_v37 = vrot.slane %v5100_v21, 6 }
 0x1b3   :  { %v5089_v43 = vld [vmem:[#allocation1] sm:$0xff] }
 0x1b4   :  { %6679 = vst [vmem:[#allocation20_spill] sm:$0xff] %v5089_v43  ;;  %v5145_v43 = vperm.slane %v1318_v48, 0 }
 0x1b5   :  { %1833 = vst [vmem:[#allocation1] ss:$9 sm:$0xff] %v1433_v8  ;;  %v5106_v8 = vrot.slane %v5100_v21, 2 }
 0x1b6   :  { %1834 = vst [vmem:[#allocation1 + $0x1] ss:$9 sm:$0xff] %v1434_v53  ;;  %v5112_v53 = vrot.slane %v5100_v21, 4 }
 0x1b7   :  { %1835 = vst [vmem:[#allocation1 + $0x2] ss:$9 sm:$0xff] %v1435_v39  ;;  %v6683_v39 = vrot.slane %v4059_v52, 5 }
 0x1b8   :  { %1836 = vst [vmem:[#allocation1 + $0x3] ss:$9 sm:$0xff] %v1436_v3  ;;  %v5118_v3 = vrot.slane %v5100_v21, 5 }
 0x1b9   :  { %1837 = vst [vmem:[#allocation1 + $0x4] ss:$9 sm:$0xff] %v1437_v25  ;;  %v1440_v7 = vmul.f32 %v5100_v21, %v6683_v39  ;;  %v6685_v25 = vrot.slane %v4059_v52, 7  ;;  %v3846_v39 = vld [vmem:[%s6454_s0 + $0x18] sm:$0xff] }
 0x1ba   :  { %1838 = vst [vmem:[#allocation1 + $0x5] ss:$9 sm:$0xff] %v1438_v42  ;;  %v1443_v46 = vmul.f32 %v3846_v39, %v5109_v44  ;;  %v5148_v39 = vrot.slane %v5145_v43, 1 }
 0x1bb   :  { %1839 = vst [vmem:[#allocation1 + $0x6] ss:$9 sm:$0xff] %v1439_v6  ;;  %v6684_v6 = vrot.slane %v4059_v52, 6  ;;  %v1442_v63 = vmul.f32 %v5106_v8, %v6685_v25  ;;  %v1445_v52 = vmul.f32 %v5118_v3, %v6688_v26  ;;  %v6689_v25 = vrot.slane %v4093_v4, 3 }
 0x1bc   :  { %v5154_v26 = vrot.slane %v5145_v43, 3 }
 0x1bd   :  { %v1441_v42 = vmul.f32 %v5103_v31, %v6684_v6  ;;  %v1444_v6 = vmul.f32 %v5112_v53, %v6687_v50  ;;  %v1446_v13 = vmul.f32 %v5124_v37, %v6689_v25  ;;  %v5151_v50 = vrot.slane %v5145_v43, 2 }
 0x1c2   :  { %v5134_v15 = vld [vmem:[#allocation1] sm:$0xff] }
 0x1c3   :  { %6686 = vst [vmem:[#allocation21_spill] sm:$0xff] %v5134_v15  ;;  %v1319_v15 = vrot.slane %v4955_v51, 5  ;;  %v6704_v51 = vrot.slane %v4159_v2, 1 }
 0x1c4   :  { %1841 = vst [vmem:[#allocation1] ss:$9 sm:$0xff] %v1440_v7  ;;  %v5157_v7 = vrot.slane %v5145_v43, 4 }
 0x1c5   :  { %1842 = vst [vmem:[#allocation1 + $0x1] ss:$9 sm:$0xff] %v1441_v42  ;;  %v6690_v42 = vrot.slane %v4093_v4, 4 }
 0x1c6   :  { %1843 = vst [vmem:[#allocation1 + $0x2] ss:$9 sm:$0xff] %v1442_v63 }
 0x1c7   :  { %1844 = vst [vmem:[#allocation1 + $0x3] ss:$9 sm:$0xff] %v1443_v46  ;;  %v1447_v48 = vmul.f32 %v5145_v43, %v6690_v42  ;;  %v5163_v46 = vrot.slane %v5145_v43, 5  ;;  %v1450_v42 = vmul.f32 %v5154_v26, %v6693_v14  ;;  %v5190_v14 = vperm.slane %v1319_v15, 0 }
 0x1c8   :  { %1845 = vst [vmem:[#allocation1 + $0x4] ss:$9 sm:$0xff] %v1444_v6  ;;  %v5169_v6 = vrot.slane %v5145_v43, 6 }
 0x1c9   :  { %1846 = vst [vmem:[#allocation1 + $0x5] ss:$9 sm:$0xff] %v1445_v52  ;;  %v6692_v52 = vrot.slane %v4093_v4, 6  ;;  %v1452_v5 = vmul.f32 %v5163_v46, %v6695_v10  ;;  %v5199_v10 = vrot.slane %v5190_v14, 3 }
 0x1ca   :  { %1847 = vst [vmem:[#allocation1 + $0x6] ss:$9 sm:$0xff] %v1446_v13  ;;  %v6691_v13 = vrot.slane %v4093_v4, 5 }
 0x1cb   :  { %v1449_v25 = vmul.f32 %v5151_v50, %v6692_v52  ;;  %v6696_v52 = vrot.slane %v4127_v34, 2 }
 0x1cc   :  { %v1448_v63 = vmul.f32 %v5148_v39, %v6691_v13  ;;  %v1451_v13 = vmul.f32 %v3847_v41, %v5157_v7  ;;  %v5196_v41 = vrot.slane %v5190_v14, 2 }
 0x1cd   :  { %v1453_v4 = vmul.f32 %v5169_v6, %v6696_v52  ;;  %v6700_v52 = vrot.slane %v4127_v34, 5 }
 0x1d1   :  { %v5178_v54 = vld [vmem:[#allocation1] sm:$0xff] }
 0x1d2   :  { %6694 = vst [vmem:[#allocation22_spill] sm:$0xff] %v5178_v54  ;;  %v5193_v54 = vrot.slane %v5190_v14, 1 }
 0x1d3   :  { %1849 = vst [vmem:[#allocation1] ss:$9 sm:$0xff] %v1447_v48  ;;  %v5202_v48 = vrot.slane %v5190_v14, 4 }
 0x1d4   :  { %1850 = vst [vmem:[#allocation1 + $0x1] ss:$9 sm:$0xff] %v1448_v63  ;;  %v6697_v63 = vrot.slane %v4127_v34, 3 }
 0x1d5   :  { %1851 = vst [vmem:[#allocation1 + $0x2] ss:$9 sm:$0xff] %v1449_v25  ;;  %v5208_v25 = vrot.slane %v5190_v14, 5  ;;  %v1458_v9 = vmul.f32 %v5202_v48, %v6703_v62 }
 0x1d6   :  { %1852 = vst [vmem:[#allocation1 + $0x3] ss:$9 sm:$0xff] %v1450_v42  ;;  %v1454_v15 = vmul.f32 %v5190_v14, %v6697_v63  ;;  %v1457_v63 = vmul.f32 %v5199_v10, %v6701_v0  ;;  %v5235_v0 = vperm.slane %v1320_v35, 0 }
 0x1d7   :  { %1853 = vst [vmem:[#allocation1 + $0x4] ss:$9 sm:$0xff] %v1451_v13  ;;  %v5214_v13 = vrot.slane %v5190_v14, 6 }
 0x1d8   :  { %1854 = vst [vmem:[#allocation1 + $0x5] ss:$9 sm:$0xff] %v1452_v5  ;;  %v6698_v5 = vrot.slane %v4127_v34, 4  ;;  %v5238_v34 = vrot.slane %v5235_v0, 1  ;;  %v5241_v62 = vrot.slane %v5235_v0, 2 }
 0x1d9   :  { %1855 = vst [vmem:[#allocation1 + $0x6] ss:$9 sm:$0xff] %v1453_v4  ;;  %v1456_v4 = vmul.f32 %v5196_v41, %v6700_v52  ;;  %v1460_v52 = vmul.f32 %v5214_v13, %v6704_v51  ;;  %v6709_v51 = vrot.slane %v4159_v2, 4 }
 0x1da   :  { %v1455_v42 = vmul.f32 %v5193_v54, %v6698_v5  ;;  %6699 = vst [vmem:[#allocation23_spill] sm:$0xff] %v5214_v13  ;;  %v3848_v5 = vld [vmem:[%s6454_s0 + $0x28] sm:$0xff] }
 0x1db   :  { %v1459_v59 = vmul.f32 %v3848_v5, %v5208_v25  ;;  %6705 = vst [vmem:[#allocation25_spill] sm:$0xff] %v5238_v34  ;;  %v5259_v5 = vrot.slane %v5235_v0, 6 }
 0x1dc   :  { %6706 = vst [vmem:[#allocation26_spill] sm:$0xff] %v5241_v62 }
 0x1e0   :  { %v5223_v60 = vld [vmem:[#allocation1] sm:$0xff] }
 0x1e1   :  { %6702 = vst [vmem:[#allocation24_spill] sm:$0xff] %v5223_v60  ;;  %v6710_v60 = vrot.slane %v4159_v2, 5 }
 0x1e2   :  { %1857 = vst [vmem:[#allocation1] ss:$9 sm:$0xff] %v1454_v15  ;;  %v5244_v15 = vrot.slane %v5235_v0, 3 }
 0x1e3   :  { %1858 = vst [vmem:[#allocation1 + $0x1] ss:$9 sm:$0xff] %v1455_v42  ;;  %v5247_v42 = vrot.slane %v5235_v0, 4 }
 0x1e4   :  { %1859 = vst [vmem:[#allocation1 + $0x2] ss:$9 sm:$0xff] %v1456_v4  ;;  %v6707_v4 = vrot.slane %v4159_v2, 2  ;;  %v1464_v22 = vmul.f32 %v5244_v15, %v6710_v60  ;;  %v3850_v60 = vld [vmem:[%s6454_s0 + $0x38] sm:$0xff] }
 0x1e5   :  { %1860 = vst [vmem:[#allocation1 + $0x3] ss:$9 sm:$0xff] %v1457_v63 }
 0x1e6   :  { %1861 = vst [vmem:[#allocation1 + $0x4] ss:$9 sm:$0xff] %v1458_v9  ;;  %v1461_v35 = vmul.f32 %v5235_v0, %v6707_v4  ;;  %v5253_v9 = vrot.slane %v5235_v0, 5  ;;  %v6712_v4 = vrot.slane %v4159_v2, 6 }
 0x1e7   :  { %1862 = vst [vmem:[#allocation1 + $0x5] ss:$9 sm:$0xff] %v1459_v59  ;;  %v6708_v59 = vrot.slane %v4159_v2, 3 }
 0x1e8   :  { %1863 = vst [vmem:[#allocation1 + $0x6] ss:$9 sm:$0xff] %v1460_v52  ;;  %v1463_v52 = vmul.f32 %v5241_v62, %v6709_v51  ;;  %v1465_v49 = vmul.f32 %v5247_v42, %v6712_v4  ;;  %v3849_v51 = vld [vmem:[%s6454_s0 + $0x30] sm:$0x1]  ;;  %v6715_v4 = vrot.slane %v4223_v29, 2 }
 0x1e9   :  { %v1462_v63 = vmul.f32 %v5238_v34, %v6708_v59  ;;  %v6713_v59 = vrot.slane %v4159_v2, 7  ;;  %v1467_v62 = vmul.f32 %v3849_v51, %v5259_v5  ;;  %v1468_v2 = vmul.f32 %v3850_v60, %v4965_v19 }
 0x1ea   :  { %v6719_v51 = vrot.slane %v4223_v29, 5 }
 0x1eb   :  { %v1466_v34 = vmul.f32 %v5253_v9, %v6713_v59  ;;  %v1470_v59 = vmul.f32 %v4971_v24, %v6715_v4 }
 0x1ec   :  { %v1473_v60 = vmul.f32 %v4984_v33, %v6719_v51 }
 0x1ef   :  { %v5267_v13 = vld [vmem:[#allocation1] sm:$0xff] }
 0x1f0   :  { %6711 = vst [vmem:[#allocation27_spill] sm:$0xff] %v5267_v13 }
 0x1f1   :  { %1865 = vst [vmem:[#allocation1] ss:$9 sm:$0xff] %v1461_v35  ;;  %v6714_v35 = vrot.slane %v4223_v29, 1 }
 0x1f2   :  { %1866 = vst [vmem:[#allocation1 + $0x1] ss:$9 sm:$0xff] %v1462_v63 }
 0x1f3   :  { %1867 = vst [vmem:[#allocation1 + $0x2] ss:$9 sm:$0xff] %v1463_v52  ;;  %v1469_v63 = vmul.f32 %v4968_v55, %v6714_v35  ;;  %v6716_v52 = vrot.slane %v4223_v29, 3  ;;  %v6720_v35 = vrot.slane %v4223_v29, 6 }
 0x1f4   :  { %1868 = vst [vmem:[#allocation1 + $0x3] ss:$9 sm:$0xff] %v1464_v22 }
 0x1f5   :  { %1869 = vst [vmem:[#allocation1 + $0x4] ss:$9 sm:$0xff] %v1465_v49  ;;  %v1471_v22 = vmul.f32 %v4974_v57, %v6716_v52  ;;  %v1474_v4 = vmul.f32 %v4990_v47, %v6720_v35  ;;  %v6721_v52 = vrot.slane %v4223_v29, 7  ;;  %v6725_v35 = vrot.slane %v4262_v11, 4 }
 0x1f6   :  { %1870 = vst [vmem:[#allocation1 + $0x5] ss:$9 sm:$0xff] %v1466_v34  ;;  %v6718_v34 = vrot.slane %v4223_v29, 4  ;;  %v6724_v29 = vrot.slane %v4262_v11, 3 }
 0x1f7   :  { %1871 = vst [vmem:[#allocation1 + $0x6] ss:$9 sm:$0xff] %v1467_v62 }
 0x1f8   :  { %v1472_v62 = vmul.f32 %v4977_v28, %v6718_v34 }
 0x1fe   :  { %v5292_v49 = vld [vmem:[#allocation1] sm:$0xff] }
 0x1ff   :  { %6717 = vst [vmem:[#allocation28_spill] sm:$0xff] %v5292_v49  ;;  %v1475_v49 = vmul.f32 %v5010_v36, %v6721_v52  ;;  %v6726_v52 = vrot.slane %v4262_v11, 5 }
 0x200   :  { %1873 = vst [vmem:[#allocation1] ss:$9 sm:$0xff] %v1468_v2  ;;  %v3851_v2 = vld [vmem:[%s6454_s0 + $0x40] sm:$0xff] }
 0x201   :  { %1874 = vst [vmem:[#allocation1 + $0x1] ss:$9 sm:$0xff] %v1469_v63  ;;  %v1476_v34 = vmul.f32 %v3851_v2, %v5013_v18  ;;  %v6722_v63 = vrot.slane %v4262_v11, 1  ;;  %v1481_v2 = vmul.f32 %v5035_v16, %v6726_v52 }
 0x202   :  { %1875 = vst [vmem:[#allocation1 + $0x2] ss:$9 sm:$0xff] %v1470_v59  ;;  %v6723_v59 = vrot.slane %v4262_v11, 2 }
 0x203   :  { %1876 = vst [vmem:[#allocation1 + $0x3] ss:$9 sm:$0xff] %v1471_v22  ;;  %v1477_v51 = vmul.f32 %v5016_v23, %v6722_v63  ;;  %v6727_v63 = vrot.slane %v4262_v11, 6 }
 0x204   :  { %1877 = vst [vmem:[#allocation1 + $0x4] ss:$9 sm:$0xff] %v1472_v62  ;;  %v1478_v22 = vmul.f32 %v5019_v27, %v6723_v59 }
 0x205   :  { %1878 = vst [vmem:[#allocation1 + $0x5] ss:$9 sm:$0xff] %v1473_v60  ;;  %v1479_v60 = vmul.f32 %v5022_v32, %v6724_v29  ;;  %v1482_v59 = vmul.f32 %v5055_v56, %v6727_v63  ;;  %v6733_v63 = vrot.slane %v4303_v20, 4 }
 0x206   :  { %1879 = vst [vmem:[#allocation1 + $0x6] ss:$9 sm:$0xff] %v1474_v4  ;;  %v1480_v4 = vmul.f32 %v5028_v1, %v6725_v35 }
 0x20d   :  { %v5316_v62 = vld [vmem:[#allocation1] sm:$0xff] }
 0x20e   :  { %1881 = vst [vmem:[#allocation1] ss:$9 sm:$0xff] %v1475_v49  ;;  %v6728_v49 = vrot.slane %v4262_v11, 7  ;;  %v6732_v11 = vrot.slane %v4303_v20, 3 }
 0x20f   :  { %1882 = vst [vmem:[#allocation1 + $0x1] ss:$9 sm:$0xff] %v1476_v34  ;;  %v3852_v34 = vld [vmem:[%s6454_s0 + $0x48] sm:$0xff] }
 0x210   :  { %1883 = vst [vmem:[#allocation1 + $0x2] ss:$9 sm:$0xff] %v1477_v51  ;;  %v1483_v29 = vmul.f32 %v5058_v38, %v6728_v49  ;;  %v1484_v35 = vmul.f32 %v3852_v34, %v5061_v45  ;;  %v6729_v51 = vrot.slane %v4303_v20, 1  ;;  %v1488_v49 = vmul.f32 %v5079_v12, %v6733_v63 }
 0x211   :  { %1884 = vst [vmem:[#allocation1 + $0x3] ss:$9 sm:$0xff] %v1478_v22  ;;  %v6734_v34 = vrot.slane %v4303_v20, 5 }
 0x212   :  { %1885 = vst [vmem:[#allocation1 + $0x4] ss:$9 sm:$0xff] %v1479_v60  ;;  %v1485_v22 = vmul.f32 %v5064_v30, %v6729_v51 }
 0x213   :  { %1886 = vst [vmem:[#allocation1 + $0x5] ss:$9 sm:$0xff] %v1480_v4  ;;  %v6731_v4 = vrot.slane %v4303_v20, 2  ;;  %v1489_v51 = vmul.f32 %v5100_v21, %v6734_v34 }
 0x214   :  { %1887 = vst [vmem:[#allocation1 + $0x6] ss:$9 sm:$0xff] %v1481_v2  ;;  %v1487_v2 = vmul.f32 %v5073_v40, %v6732_v11  ;;  %v6736_v11 = vrot.slane %v4303_v20, 7 }
 0x215   :  { %v1486_v52 = vmul.f32 %v5067_v58, %v6731_v4 }
 0x21b   :  { %v5340_v60 = vld [vmem:[#allocation1] sm:$0xff] }
 0x21c   :  { %6730 = vst [vmem:[#allocation29_spill] sm:$0xff] %v5340_v60 }
 0x21d   :  { %1889 = vst [vmem:[#allocation1] ss:$9 sm:$0xff] %v1482_v59  ;;  %v6735_v59 = vrot.slane %v4303_v20, 6  ;;  %v6740_v20 = vrot.slane %v4342_v17, 3 }
 0x21e   :  { %1890 = vst [vmem:[#allocation1 + $0x1] ss:$9 sm:$0xff] %v1483_v29  ;;  %v1491_v29 = vmul.f32 %v5106_v8, %v6736_v11  ;;  %v6741_v11 = vrot.slane %v4342_v17, 4 }
 0x21f   :  { %1891 = vst [vmem:[#allocation1 + $0x2] ss:$9 sm:$0xff] %v1484_v35  ;;  %v1490_v4 = vmul.f32 %v5103_v31, %v6735_v59  ;;  %v3853_v35 = vld [vmem:[%s6454_s0 + $0x50] sm:$0xff]  ;;  %v1495_v59 = vmul.f32 %v5124_v37, %v6740_v20  ;;  %v6746_v20 = vrot.slane %v4376_v61, 1 }
 0x220   :  { %1892 = vst [vmem:[#allocation1 + $0x3] ss:$9 sm:$0xff] %v1485_v22  ;;  %v1492_v22 = vmul.f32 %v3853_v35, %v5109_v44  ;;  %v1496_v35 = vmul.f32 %v5145_v43, %v6741_v11  ;;  %v6747_v11 = vrot.slane %v4376_v61, 2 }
 0x221   :  { %1893 = vst [vmem:[#allocation1 + $0x4] ss:$9 sm:$0xff] %v1486_v52 }
 0x222   :  { %1894 = vst [vmem:[#allocation1 + $0x5] ss:$9 sm:$0xff] %v1487_v2  ;;  %v6738_v2 = vrot.slane %v4342_v17, 1 }
 0x223   :  { %1895 = vst [vmem:[#allocation1 + $0x6] ss:$9 sm:$0xff] %v1488_v49  ;;  %v6739_v49 = vrot.slane %v4342_v17, 2 }
 0x224   :  { %v1493_v63 = vmul.f32 %v5112_v53, %v6738_v2 }
 0x225   :  { %v1494_v34 = vmul.f32 %v5118_v3, %v6739_v49  ;;  %v6743_v49 = vrot.slane %v4342_v17, 6 }
 0x22a   :  { %v5364_v52 = vld [vmem:[#allocation1] sm:$0xff] }
 0x22b   :  { %6737 = vst [vmem:[#allocation30_spill] sm:$0xff] %v5364_v52  ;;  %v6744_v52 = vrot.slane %v4342_v17, 7 }
 0x22c   :  { %1897 = vst [vmem:[#allocation1] ss:$9 sm:$0xff] %v1489_v51  ;;  %v6742_v51 = vrot.slane %v4342_v17, 5  ;;  %v1502_v17 = vmul.f32 %v5169_v6, %v6747_v11  ;;  %v3855_v11 = vld [vmem:[%s6454_s0 + $0x60] sm:$0xff] }
 0x22d   :  { %1898 = vst [vmem:[#allocation1 + $0x1] ss:$9 sm:$0xff] %v1490_v4  ;;  %v1498_v4 = vmul.f32 %v5151_v50, %v6743_v49 }
 0x22e   :  { %1899 = vst [vmem:[#allocation1 + $0x2] ss:$9 sm:$0xff] %v1491_v29  ;;  %v1497_v2 = vmul.f32 %v5148_v39, %v6742_v51  ;;  %v1499_v29 = vmul.f32 %v5154_v26, %v6744_v52  ;;  %v6748_v52 = vrot.slane %v4376_v61, 3 }
 0x22f   :  { %1900 = vst [vmem:[#allocation1 + $0x3] ss:$9 sm:$0xff] %v1492_v22 }
 0x230   :  { %1901 = vst [vmem:[#allocation1 + $0x4] ss:$9 sm:$0xff] %v1493_v63  ;;  %v3854_v63 = vld [vmem:[%s6454_s0 + $0x58] sm:$0xff]  ;;  %v1503_v51 = vmul.f32 %v5190_v14, %v6748_v52  ;;  %v6754_v52 = vld [vmem:[#allocation2_spill] sm:$0xff] }
 0x231   :  { %1902 = vst [vmem:[#allocation1 + $0x5] ss:$9 sm:$0xff] %v1494_v34  ;;  %v1500_v34 = vmul.f32 %v3854_v63, %v5157_v7  ;;  %v6750_v63 = vrot.slane %v4376_v61, 5  ;;  %v6762_v60 = vrot.slane %v6754_v52, 5 }
 0x232   :  { %1903 = vst [vmem:[#allocation1 + $0x6] ss:$9 sm:$0xff] %v1495_v59  ;;  %v1501_v59 = vmul.f32 %v5163_v46, %v6746_v20  ;;  %v6751_v20 = vrot.slane %v4376_v61, 6 }
 0x239   :  { %v5387_v22 = vld [vmem:[#allocation1] sm:$0xff] }
 0x23a   :  { %6745 = vst [vmem:[#allocation31_spill] sm:$0xff] %v5387_v22 }
 0x23b   :  { %1905 = vst [vmem:[#allocation1] ss:$9 sm:$0xff] %v1496_v35  ;;  %v6749_v35 = vrot.slane %v4376_v61, 4 }
 0x23c   :  { %1906 = vst [vmem:[#allocation1 + $0x1] ss:$9 sm:$0xff] %v1497_v2  ;;  %v1505_v2 = vmul.f32 %v5196_v41, %v6750_v63  ;;  %v6756_v63 = vld [vmem:[#allocation23_spill] sm:$0xff] }
 0x23d   :  { %1907 = vst [vmem:[#allocation1 + $0x2] ss:$9 sm:$0xff] %v1498_v4  ;;  %v1504_v49 = vmul.f32 %v5193_v54, %v6749_v35  ;;  %v1506_v4 = vmul.f32 %v5199_v10, %v6751_v20  ;;  %v6755_v35 = vrot.slane %v6754_v52, 1  ;;  %v6758_v20 = vrot.slane %v6754_v52, 3 }
 0x23e   :  { %1908 = vst [vmem:[#allocation1 + $0x3] ss:$9 sm:$0xff] %v1499_v29 }
 0x23f   :  { %1909 = vst [vmem:[#allocation1 + $0x4] ss:$9 sm:$0xff] %v1500_v34  ;;  %v6753_v34 = vrot.slane %v4376_v61, 7  ;;  %v1509_v22 = vmul.f32 %v6756_v63, %v6755_v35  ;;  %v6757_v61 = vrot.slane %v6754_v52, 2 }
 0x240   :  { %1910 = vst [vmem:[#allocation1 + $0x5] ss:$9 sm:$0xff] %v1501_v59 }
 0x241   :  { %1911 = vst [vmem:[#allocation1 + $0x6] ss:$9 sm:$0xff] %v1502_v17  ;;  %v1507_v59 = vmul.f32 %v5202_v48, %v6753_v34  ;;  %v1508_v17 = vmul.f32 %v3855_v11, %v5208_v25  ;;  %v6759_v34 = vld [vmem:[#allocation25_spill] sm:$0xff]  ;;  %v6760_v11 = vrot.slane %v6754_v52, 4 }
 0x248   :  { %v5411_v29 = vld [vmem:[#allocation1] sm:$0xff] }
 0x249   :  { %6752 = vst [vmem:[#allocation32_spill] sm:$0xff] %v5411_v29  ;;  %v1511_v29 = vmul.f32 %v6759_v34, %v6758_v20 }
 0x24a   :  { %1913 = vst [vmem:[#allocation1] ss:$9 sm:$0xff] %v1503_v51  ;;  %v1510_v51 = vmul.f32 %v5235_v0, %v6757_v61  ;;  %v3856_v61 = vld [vmem:[%s6454_s0 + $0x68] sm:$0x1] }
 0x24b   :  { %1914 = vst [vmem:[#allocation1 + $0x1] ss:$9 sm:$0xff] %v1504_v49  ;;  %v6761_v49 = vld [vmem:[#allocation26_spill] sm:$0xff]  ;;  %v1516_v20 = vmul.f32 %v3856_v61, %v5259_v5 }
 0x24c   :  { %1915 = vst [vmem:[#allocation1 + $0x2] ss:$9 sm:$0xff] %v1505_v2  ;;  %v1512_v13 = vmul.f32 %v6761_v49, %v6760_v11  ;;  %v1513_v2 = vmul.f32 %v5244_v15, %v6762_v60  ;;  %v3857_v60 = vld [vmem:[%s6454_s0 + $0x70] sm:$0xff] }
 0x24d   :  { %1916 = vst [vmem:[#allocation1 + $0x3] ss:$9 sm:$0xff] %v1506_v4 }
 0x24e   :  { %1917 = vst [vmem:[#allocation1 + $0x4] ss:$9 sm:$0xff] %v1507_v59 }
 0x24f   :  { %1918 = vst [vmem:[#allocation1 + $0x5] ss:$9 sm:$0xff] %v1508_v17  ;;  %v6765_v17 = vrot.slane %v6754_v52, 7 }
 0x250   :  { %1919 = vst [vmem:[#allocation1 + $0x6] ss:$9 sm:$0xff] %v1509_v22  ;;  %v6764_v22 = vrot.slane %v6754_v52, 6  ;;  %v1517_v52 = vmul.f32 %v3857_v60, %v4965_v19 }
 0x251   :  { %v1515_v35 = vmul.f32 %v5253_v9, %v6765_v17 }
 0x252   :  { %v1514_v59 = vmul.f32 %v5247_v42, %v6764_v22 }
 0x257   :  { %v5435_v4 = vld [vmem:[#allocation1] sm:$0xff] }
 0x258   :  { %6763 = vst [vmem:[#allocation2_spill] sm:$0xff] %v5435_v4 }
 0x259   :  { %1921 = vst [vmem:[#allocation1] ss:$9 sm:$0xff] %v1510_v51  ;;  %v6766_v51 = vld [vmem:[#allocation3_spill] sm:$0xff] }
 0x25a   :  { %1922 = vst [vmem:[#allocation1 + $0x1] ss:$9 sm:$0xff] %v1511_v29  ;;  %v6767_v11 = vrot.slane %v6766_v51, 1  ;;  %v6768_v22 = vrot.slane %v6766_v51, 2 }
 0x25b   :  { %1923 = vst [vmem:[#allocation1 + $0x2] ss:$9 sm:$0xff] %v1512_v13  ;;  %v6769_v13 = vrot.slane %v6766_v51, 3 }
 0x25c   :  { %1924 = vst [vmem:[#allocation1 + $0x3] ss:$9 sm:$0xff] %v1513_v2  ;;  %v1518_v29 = vmul.f32 %v4968_v55, %v6767_v11  ;;  %v1519_v17 = vmul.f32 %v4971_v24, %v6768_v22  ;;  %v6773_v11 = vrot.slane %v6766_v51, 6 }
 0x25d   :  { %1925 = vst [vmem:[#allocation1 + $0x4] ss:$9 sm:$0xff] %v1514_v59  ;;  %v1520_v2 = vmul.f32 %v4974_v57, %v6769_v13  ;;  %v6774_v13 = vrot.slane %v6766_v51, 7 }
 0x25e   :  { %1926 = vst [vmem:[#allocation1 + $0x5] ss:$9 sm:$0xff] %v1515_v35  ;;  %v6771_v35 = vrot.slane %v6766_v51, 4  ;;  %v1523_v22 = vmul.f32 %v4990_v47, %v6773_v11 }
 0x25f   :  { %1927 = vst [vmem:[#allocation1 + $0x6] ss:$9 sm:$0xff] %v1516_v20  ;;  %v6772_v20 = vrot.slane %v6766_v51, 5 }
 0x260   :  { %v1521_v61 = vmul.f32 %v4977_v28, %v6771_v35 }
 0x261   :  { %v1522_v60 = vmul.f32 %v4984_v33, %v6772_v20 }
 0x266   :  { %v5460_v59 = vld [vmem:[#allocation1] sm:$0xff] }
 0x267   :  { %6770 = vst [vmem:[#allocation23_spill] sm:$0xff] %v5460_v59  ;;  %v1524_v59 = vmul.f32 %v5010_v36, %v6774_v13 }
 0x268   :  { %1929 = vst [vmem:[#allocation1] ss:$9 sm:$0xff] %v1517_v52  ;;  %v3858_v52 = vld [vmem:[%s6454_s0 + $0x78] sm:$0xff] }
 0x269   :  { %1930 = vst [vmem:[#allocation1 + $0x1] ss:$9 sm:$0xff] %v1518_v29  ;;  %v1525_v35 = vmul.f32 %v3858_v52, %v5013_v18  ;;  %v6775_v29 = vld [vmem:[#allocation4_spill] sm:$0xff] }
 0x26a   :  { %1931 = vst [vmem:[#allocation1 + $0x2] ss:$9 sm:$0xff] %v1519_v17  ;;  %v6776_v20 = vrot.slane %v6775_v29, 1  ;;  %v6777_v17 = vrot.slane %v6775_v29, 2  ;;  %v6779_v51 = vrot.slane %v6775_v29, 3  ;;  %v6780_v11 = vrot.slane %v6775_v29, 4 }
 0x26b   :  { %1932 = vst [vmem:[#allocation1 + $0x3] ss:$9 sm:$0xff] %v1520_v2  ;;  %v6781_v13 = vrot.slane %v6775_v29, 5 }
 0x26c   :  { %1933 = vst [vmem:[#allocation1 + $0x4] ss:$9 sm:$0xff] %v1521_v61  ;;  %v1526_v4 = vmul.f32 %v5016_v23, %v6776_v20  ;;  %v1527_v2 = vmul.f32 %v5019_v27, %v6777_v17  ;;  %v6782_v20 = vrot.slane %v6775_v29, 6 }
 0x26d   :  { %1934 = vst [vmem:[#allocation1 + $0x5] ss:$9 sm:$0xff] %v1522_v60  ;;  %v1528_v60 = vmul.f32 %v5022_v32, %v6779_v51  ;;  %v1530_v52 = vmul.f32 %v5035_v16, %v6781_v13  ;;  %v6784_v13 = vld [vmem:[#allocation5_spill] sm:$0xff] }
 0x26e   :  { %1935 = vst [vmem:[#allocation1 + $0x6] ss:$9 sm:$0xff] %v1523_v22  ;;  %v1529_v22 = vmul.f32 %v5028_v1, %v6780_v11  ;;  %v1531_v17 = vmul.f32 %v5055_v56, %v6782_v20 }
 0x275   :  { %v5484_v61 = vld [vmem:[#allocation1] sm:$0xff] }
 0x276   :  { %6778 = vst [vmem:[#allocation25_spill] sm:$0xff] %v5484_v61 }
 0x277   :  { %1937 = vst [vmem:[#allocation1] ss:$9 sm:$0xff] %v1524_v59  ;;  %v6783_v59 = vrot.slane %v6775_v29, 7  ;;  %v6788_v29 = vrot.slane %v6784_v13, 3 }
 0x278   :  { %1938 = vst [vmem:[#allocation1 + $0x1] ss:$9 sm:$0xff] %v1525_v35  ;;  %v3859_v35 = vld [vmem:[%s6454_s0 + $0x80] sm:$0xff] }
 0x279   :  { %1939 = vst [vmem:[#allocation1 + $0x2] ss:$9 sm:$0xff] %v1526_v4  ;;  %v1532_v51 = vmul.f32 %v5058_v38, %v6783_v59  ;;  %v1533_v11 = vmul.f32 %v3859_v35, %v5061_v45  ;;  %v6785_v4 = vrot.slane %v6784_v13, 1  ;;  %v1536_v20 = vmul.f32 %v5073_v40, %v6788_v29 }
 0x27a   :  { %1940 = vst [vmem:[#allocation1 + $0x3] ss:$9 sm:$0xff] %v1527_v2  ;;  %v6789_v59 = vrot.slane %v6784_v13, 4  ;;  %v6792_v29 = vrot.slane %v6784_v13, 7 }
 0x27b   :  { %1941 = vst [vmem:[#allocation1 + $0x4] ss:$9 sm:$0xff] %v1528_v60  ;;  %v1534_v2 = vmul.f32 %v5064_v30, %v6785_v4  ;;  %v6790_v4 = vrot.slane %v6784_v13, 5 }
 0x27c   :  { %1942 = vst [vmem:[#allocation1 + $0x5] ss:$9 sm:$0xff] %v1529_v22  ;;  %v6787_v22 = vrot.slane %v6784_v13, 2  ;;  %v1537_v35 = vmul.f32 %v5079_v12, %v6789_v59 }
 0x27d   :  { %1943 = vst [vmem:[#allocation1 + $0x6] ss:$9 sm:$0xff] %v1530_v52 }
 0x27e   :  { %v1535_v52 = vmul.f32 %v5067_v58, %v6787_v22 }
 0x284   :  { %v5508_v60 = vld [vmem:[#allocation1] sm:$0xff] }
 0x285   :  { %6786 = vst [vmem:[#allocation26_spill] sm:$0xff] %v5508_v60  ;;  %v1538_v60 = vmul.f32 %v5100_v21, %v6790_v4 }
 0x286   :  { %1945 = vst [vmem:[#allocation1] ss:$9 sm:$0xff] %v1531_v17  ;;  %v6791_v17 = vrot.slane %v6784_v13, 6 }
 0x287   :  { %1946 = vst [vmem:[#allocation1 + $0x1] ss:$9 sm:$0xff] %v1532_v51  ;;  %v1540_v51 = vmul.f32 %v5106_v8, %v6792_v29 }
 0x288   :  { %1947 = vst [vmem:[#allocation1 + $0x2] ss:$9 sm:$0xff] %v1533_v11  ;;  %v1539_v22 = vmul.f32 %v5103_v31, %v6791_v17  ;;  %v3860_v11 = vld [vmem:[%s6454_s0 + $0x88] sm:$0xff] }
 0x289   :  { %1948 = vst [vmem:[#allocation1 + $0x3] ss:$9 sm:$0xff] %v1534_v2  ;;  %v1541_v2 = vmul.f32 %v3860_v11, %v5109_v44 }
 0x28a   :  { %1949 = vst [vmem:[#allocation1 + $0x4] ss:$9 sm:$0xff] %v1535_v52 }
 0x28b   :  { %1950 = vst [vmem:[#allocation1 + $0x5] ss:$9 sm:$0xff] %v1536_v20  ;;  %v6794_v20 = vld [vmem:[#allocation6_spill] sm:$0xff] }
 0x28c   :  { %1951 = vst [vmem:[#allocation1 + $0x6] ss:$9 sm:$0xff] %v1537_v35  ;;  %v6795_v59 = vrot.slane %v6794_v20, 1  ;;  %v6796_v4 = vrot.slane %v6794_v20, 2  ;;  %v6797_v13 = vrot.slane %v6794_v20, 3  ;;  %v6798_v11 = vrot.slane %v6794_v20, 4 }
 0x28d   :  { %v6801_v61 = vrot.slane %v6794_v20, 7 }
 0x28e   :  { %v1542_v35 = vmul.f32 %v5112_v53, %v6795_v59  ;;  %v1543_v17 = vmul.f32 %v5118_v3, %v6796_v4  ;;  %v1544_v29 = vmul.f32 %v5124_v37, %v6797_v13  ;;  %v6800_v4 = vrot.slane %v6794_v20, 6  ;;  %v6803_v13 = vld [vmem:[#allocation7_spill] sm:$0xff] }
 0x293   :  { %v5532_v52 = vld [vmem:[#allocation1] sm:$0xff] }
 0x294   :  { %6793 = vst [vmem:[#allocation3_spill] sm:$0xff] %v5532_v52  ;;  %v1545_v52 = vmul.f32 %v5145_v43, %v6798_v11 }
 0x295   :  { %1953 = vst [vmem:[#allocation1] ss:$9 sm:$0xff] %v1538_v60  ;;  %v6799_v60 = vrot.slane %v6794_v20, 5 }
 0x296   :  { %1954 = vst [vmem:[#allocation1 + $0x1] ss:$9 sm:$0xff] %v1539_v22  ;;  %v1547_v22 = vmul.f32 %v5151_v50, %v6800_v4 }
 0x297   :  { %1955 = vst [vmem:[#allocation1 + $0x2] ss:$9 sm:$0xff] %v1540_v51  ;;  %v1546_v59 = vmul.f32 %v5148_v39, %v6799_v60  ;;  %v1548_v51 = vmul.f32 %v5154_v26, %v6801_v61  ;;  %v6805_v60 = vrot.slane %v6803_v13, 2  ;;  %v6806_v61 = vrot.slane %v6803_v13, 3 }
 0x298   :  { %1956 = vst [vmem:[#allocation1 + $0x3] ss:$9 sm:$0xff] %v1541_v2 }
 0x299   :  { %1957 = vst [vmem:[#allocation1 + $0x4] ss:$9 sm:$0xff] %v1542_v35  ;;  %v3861_v35 = vld [vmem:[%s6454_s0 + $0x90] sm:$0xff]  ;;  %v1551_v20 = vmul.f32 %v5169_v6, %v6805_v60  ;;  %v1552_v4 = vmul.f32 %v5190_v14, %v6806_v61  ;;  %v3862_v60 = vld [vmem:[%s6454_s0 + $0x98] sm:$0xff] }
 0x29a   :  { %1958 = vst [vmem:[#allocation1 + $0x5] ss:$9 sm:$0xff] %v1543_v17  ;;  %v1549_v17 = vmul.f32 %v3861_v35, %v5157_v7  ;;  %v6812_v61 = vld [vmem:[#allocation8_spill] sm:$0xff] }
 0x29b   :  { %1959 = vst [vmem:[#allocation1 + $0x6] ss:$9 sm:$0xff] %v1544_v29  ;;  %v6804_v29 = vrot.slane %v6803_v13, 1 }
 0x29d   :  { %v1550_v11 = vmul.f32 %v5163_v46, %v6804_v29  ;;  %v6808_v29 = vrot.slane %v6803_v13, 5 }
 0x2a2   :  { %v5555_v2 = vld [vmem:[#allocation1] sm:$0xff] }
 0x2a3   :  { %6802 = vst [vmem:[#allocation4_spill] sm:$0xff] %v5555_v2  ;;  %v6809_v2 = vrot.slane %v6803_v13, 6 }
 0x2a4   :  { %1961 = vst [vmem:[#allocation1] ss:$9 sm:$0xff] %v1545_v52  ;;  %v6807_v52 = vrot.slane %v6803_v13, 4 }
 0x2a5   :  { %1962 = vst [vmem:[#allocation1 + $0x1] ss:$9 sm:$0xff] %v1546_v59  ;;  %v1554_v59 = vmul.f32 %v5196_v41, %v6808_v29 }
 0x2a6   :  { %1963 = vst [vmem:[#allocation1 + $0x2] ss:$9 sm:$0xff] %v1547_v22  ;;  %v1553_v35 = vmul.f32 %v5193_v54, %v6807_v52  ;;  %v1555_v22 = vmul.f32 %v5199_v10, %v6809_v2  ;;  %v6813_v52 = vrot.slane %v6812_v61, 1  ;;  %v6814_v2 = vrot.slane %v6812_v61, 2 }
 0x2a7   :  { %1964 = vst [vmem:[#allocation1 + $0x3] ss:$9 sm:$0xff] %v1548_v51 }
 0x2a8   :  { %1965 = vst [vmem:[#allocation1 + $0x4] ss:$9 sm:$0xff] %v1549_v17  ;;  %v6811_v17 = vrot.slane %v6803_v13, 7  ;;  %v1558_v29 = vmul.f32 %v6756_v63, %v6813_v52  ;;  %v1559_v13 = vmul.f32 %v5235_v0, %v6814_v2  ;;  %v6819_v52 = vrot.slane %v6812_v61, 7  ;;  %v3863_v2 = vld [vmem:[%s6454_s0 + $0xa0] sm:$0x1] }
 0x2a9   :  { %1966 = vst [vmem:[#allocation1 + $0x5] ss:$9 sm:$0xff] %v1550_v11 }
 0x2aa   :  { %1967 = vst [vmem:[#allocation1 + $0x6] ss:$9 sm:$0xff] %v1551_v20  ;;  %v1556_v11 = vmul.f32 %v5202_v48, %v6811_v17  ;;  %v1557_v20 = vmul.f32 %v3862_v60, %v5208_v25  ;;  %v6816_v60 = vrot.slane %v6812_v61, 4 }
 0x2b1   :  { %v5579_v51 = vld [vmem:[#allocation1] sm:$0xff] }
 0x2b2   :  { %6810 = vst [vmem:[#allocation5_spill] sm:$0xff] %v5579_v51  ;;  %v6817_v51 = vrot.slane %v6812_v61, 5 }
 0x2b3   :  { %1969 = vst [vmem:[#allocation1] ss:$9 sm:$0xff] %v1552_v4  ;;  %v6815_v4 = vrot.slane %v6812_v61, 3 }
 0x2b4   :  { %1970 = vst [vmem:[#allocation1 + $0x1] ss:$9 sm:$0xff] %v1553_v35  ;;  %v1561_v35 = vmul.f32 %v6761_v49, %v6816_v60 }
 0x2b5   :  { %1971 = vst [vmem:[#allocation1 + $0x2] ss:$9 sm:$0xff] %v1554_v59  ;;  %v1560_v17 = vmul.f32 %v6759_v34, %v6815_v4  ;;  %v1562_v59 = vmul.f32 %v5244_v15, %v6817_v51  ;;  %v1565_v4 = vmul.f32 %v3863_v2, %v5259_v5  ;;  %v3864_v51 = vld [vmem:[%s6454_s0 + $0xa8] sm:$0xff] }
 0x2b6   :  { %1972 = vst [vmem:[#allocation1 + $0x3] ss:$9 sm:$0xff] %v1555_v22 }
 0x2b7   :  { %1973 = vst [vmem:[#allocation1 + $0x4] ss:$9 sm:$0xff] %v1556_v11  ;;  %v6818_v11 = vrot.slane %v6812_v61, 6  ;;  %v1566_v61 = vmul.f32 %v3864_v51, %v4965_v19 }
 0x2b8   :  { %1974 = vst [vmem:[#allocation1 + $0x5] ss:$9 sm:$0xff] %v1557_v20 }
 0x2b9   :  { %1975 = vst [vmem:[#allocation1 + $0x6] ss:$9 sm:$0xff] %v1558_v29  ;;  %v1563_v20 = vmul.f32 %v5247_v42, %v6818_v11  ;;  %v1564_v29 = vmul.f32 %v5253_v9, %v6819_v52 }
 0x2c0   :  { %v5603_v22 = vld [vmem:[#allocation1] sm:$0xff] }
 0x2c1   :  { %1977 = vst [vmem:[#allocation1] ss:$9 sm:$0xff] %v1559_v13  ;;  %v6820_v13 = vld [vmem:[#allocation9_spill] sm:$0xff] }
 0x2c2   :  { %1978 = vst [vmem:[#allocation1 + $0x1] ss:$9 sm:$0xff] %v1560_v17  ;;  %v6821_v60 = vrot.slane %v6820_v13, 1  ;;  %v6822_v11 = vrot.slane %v6820_v13, 2  ;;  %v6825_v19 = vrot.slane %v6820_v13, 5 }
 0x2c3   :  { %1979 = vst [vmem:[#allocation1 + $0x2] ss:$9 sm:$0xff] %v1561_v35  ;;  %v6823_v35 = vrot.slane %v6820_v13, 3 }
 0x2c4   :  { %1980 = vst [vmem:[#allocation1 + $0x3] ss:$9 sm:$0xff] %v1562_v59  ;;  %v1567_v17 = vmul.f32 %v4968_v55, %v6821_v60  ;;  %v1568_v52 = vmul.f32 %v4971_v24, %v6822_v11  ;;  %v6826_v55 = vrot.slane %v6820_v13, 6 }
 0x2c5   :  { %1981 = vst [vmem:[#allocation1 + $0x4] ss:$9 sm:$0xff] %v1563_v20  ;;  %v1569_v59 = vmul.f32 %v4974_v57, %v6823_v35  ;;  %v6827_v57 = vrot.slane %v6820_v13, 7 }
 0x2c6   :  { %1982 = vst [vmem:[#allocation1 + $0x5] ss:$9 sm:$0xff] %v1564_v29  ;;  %v6824_v29 = vrot.slane %v6820_v13, 4  ;;  %v1572_v24 = vmul.f32 %v4990_v47, %v6826_v55 }
 0x2c7   :  { %1983 = vst [vmem:[#allocation1 + $0x6] ss:$9 sm:$0xff] %v1565_v4  ;;  %v1571_v4 = vmul.f32 %v4984_v33, %v6825_v19  ;;  %v1573_v51 = vmul.f32 %v5010_v36, %v6827_v57 }
 0x2c8   :  { %v1570_v2 = vmul.f32 %v4977_v28, %v6824_v29  ;;  %v3865_v28 = vld [vmem:[%s6454_s0 + $0xb0] sm:$0xff] }
 0x2c9   :  { %v1574_v33 = vmul.f32 %v3865_v28, %v5013_v18 }
 0x2ce   :  { %v5628_v20 = vld [vmem:[#allocation1] sm:$0xff] }
 0x2cf   :  { %1985 = vst [vmem:[#allocation1] ss:$9 sm:$0xff] %v1566_v61  ;;  %v6828_v61 = vld [vmem:[#allocation10_spill] sm:$0xff] }
 0x2d0   :  { %1986 = vst [vmem:[#allocation1 + $0x1] ss:$9 sm:$0xff] %v1567_v17  ;;  %v6829_v60 = vrot.slane %v6828_v61, 1  ;;  %v6830_v47 = vrot.slane %v6828_v61, 2  ;;  %v6831_v13 = vrot.slane %v6828_v61, 3  ;;  %v6832_v35 = vrot.slane %v6828_v61, 4 }
 0x2d1   :  { %1987 = vst [vmem:[#allocation1 + $0x2] ss:$9 sm:$0xff] %v1568_v52  ;;  %v6833_v18 = vrot.slane %v6828_v61, 5 }
 0x2d2   :  { %1988 = vst [vmem:[#allocation1 + $0x3] ss:$9 sm:$0xff] %v1569_v59  ;;  %v1575_v17 = vmul.f32 %v5016_v23, %v6829_v60  ;;  %v1576_v11 = vmul.f32 %v5019_v27, %v6830_v47  ;;  %v1577_v36 = vmul.f32 %v5022_v32, %v6831_v13  ;;  %v1578_v59 = vmul.f32 %v5028_v1, %v6832_v35  ;;  %v3866_v1 = vld [vmem:[%s6454_s0 + $0xb8] sm:$0xff] }
 0x2d3   :  { %1989 = vst [vmem:[#allocation1 + $0x4] ss:$9 sm:$0xff] %v1570_v2  ;;  %v1579_v23 = vmul.f32 %v5035_v16, %v6833_v18  ;;  %v6834_v27 = vrot.slane %v6828_v61, 6  ;;  %v6835_v32 = vrot.slane %v6828_v61, 7  ;;  %v1582_v19 = vmul.f32 %v3866_v1, %v5061_v45  ;;  %v6836_v16 = vld [vmem:[#allocation11_spill] sm:$0xff] }
 0x2d4   :  { %1990 = vst [vmem:[#allocation1 + $0x5] ss:$9 sm:$0xff] %v1571_v4  ;;  %v6837_v4 = vrot.slane %v6836_v16, 1  ;;  %v6838_v57 = vrot.slane %v6836_v16, 2  ;;  %v6840_v28 = vrot.slane %v6836_v16, 4 }
 0x2d5   :  { %1991 = vst [vmem:[#allocation1 + $0x6] ss:$9 sm:$0xff] %v1572_v24  ;;  %v1580_v29 = vmul.f32 %v5055_v56, %v6834_v27  ;;  %v1581_v2 = vmul.f32 %v5058_v38, %v6835_v32  ;;  %v3868_v32 = vld [vmem:[%s6454_s0 + $0xc8] sm:$0xff] }
 0x2d6   :  { %v1583_v55 = vmul.f32 %v5064_v30, %v6837_v4  ;;  %v1584_v56 = vmul.f32 %v5067_v58, %v6838_v57  ;;  %v1586_v45 = vmul.f32 %v5079_v12, %v6840_v28  ;;  %v6841_v30 = vrot.slane %v6836_v16, 5  ;;  %v3867_v12 = vld [vmem:[%s6454_s0 + $0xc0] sm:$0xff]  ;;  %v6856_v4 = vld [vmem:[#allocation20_spill] sm:$0xff] }
 0x2d7   :  { %v6842_v58 = vrot.slane %v6836_v16, 6 }
 0x2d9   :  { %v1588_v61 = vmul.f32 %v5103_v31, %v6842_v58 }
 0x2dc   :  { %v5652_v52 = vld [vmem:[#allocation1] sm:$0xff] }
 0x2dd   :  { %1993 = vst [vmem:[#allocation1] ss:$9 sm:$0xff] %v1573_v51  ;;  %v6839_v51 = vrot.slane %v6836_v16, 3 }
 0x2de   :  { %1994 = vst [vmem:[#allocation1 + $0x1] ss:$9 sm:$0xff] %v1574_v33  ;;  %v1587_v33 = vmul.f32 %v5100_v21, %v6841_v30 }
 0x2df   :  { %1995 = vst [vmem:[#allocation1 + $0x2] ss:$9 sm:$0xff] %v1575_v17  ;;  %v1585_v38 = vmul.f32 %v5073_v40, %v6839_v51  ;;  %v6843_v40 = vrot.slane %v6836_v16, 7  ;;  %v1590_v17 = vmul.f32 %v3867_v12, %v5109_v44 }
 0x2e0   :  { %1996 = vst [vmem:[#allocation1 + $0x3] ss:$9 sm:$0xff] %v1576_v11  ;;  %v6844_v11 = vld [vmem:[#allocation12_spill] sm:$0xff] }
 0x2e1   :  { %1997 = vst [vmem:[#allocation1 + $0x4] ss:$9 sm:$0xff] %v1577_v36  ;;  %v1589_v60 = vmul.f32 %v5106_v8, %v6843_v40  ;;  %v6845_v13 = vrot.slane %v6844_v11, 1  ;;  %v6846_v36 = vrot.slane %v6844_v11, 2  ;;  %v6847_v8 = vrot.slane %v6844_v11, 3 }
 0x2e2   :  { %1998 = vst [vmem:[#allocation1 + $0x5] ss:$9 sm:$0xff] %v1578_v59  ;;  %v6848_v44 = vrot.slane %v6844_v11, 4  ;;  %v6851_v27 = vrot.slane %v6844_v11, 7 }
 0x2e3   :  { %1999 = vst [vmem:[#allocation1 + $0x6] ss:$9 sm:$0xff] %v1579_v23  ;;  %v1591_v21 = vmul.f32 %v5112_v53, %v6845_v13  ;;  %v1592_v31 = vmul.f32 %v5118_v3, %v6846_v36  ;;  %v1593_v35 = vmul.f32 %v5124_v37, %v6847_v8  ;;  %v6849_v53 = vrot.slane %v6844_v11, 5  ;;  %v6866_v36 = vld [vmem:[#allocation18_spill] sm:$0xff] }
 0x2e4   :  { %v1594_v59 = vmul.f32 %v5145_v43, %v6848_v44  ;;  %v6850_v3 = vrot.slane %v6844_v11, 6  ;;  %v1597_v37 = vmul.f32 %v5154_v26, %v6851_v27  ;;  %v1598_v43 = vmul.f32 %v3868_v32, %v5157_v7  ;;  %v6855_v26 = vld [vmem:[#allocation19_spill] sm:$0xff]  ;;  %v6870_v32 = vld [vmem:[#allocation24_spill] sm:$0xff] }
 0x2e5   :  { %v1595_v18 = vmul.f32 %v5148_v39, %v6849_v53  ;;  %v2069_v16 = vsel %vm1085_vm0, %v6855_v26, 0.0  ;;  %v2070_v7 = vsel %vm1085_vm0, %v6856_v4, 0.0 }
 0x2e6   :  { %v1596_v23 = vmul.f32 %v5151_v50, %v6850_v3 }
 0x2ea   :  { %v5676_v24 = vld [vmem:[#allocation1] sm:$0xff] }
 0x2eb   :  { %2001 = vst [vmem:[#allocation1] ss:$9 sm:$0xff] %v1580_v29 }
 0x2ec   :  { %2002 = vst [vmem:[#allocation1 + $0x1] ss:$9 sm:$0xff] %v1581_v2  ;;  %v6852_v2 = vld [vmem:[#allocation13_spill] sm:$0xff] }
 0x2ed   :  { %2003 = vst [vmem:[#allocation1 + $0x2] ss:$9 sm:$0xff] %v1582_v19  ;;  %v6853_v1 = vrot.slane %v6852_v2, 1  ;;  %v6854_v50 = vrot.slane %v6852_v2, 2  ;;  %v6865_v11 = vrot.slane %v6852_v2, 7 }
 0x2ee   :  { %2004 = vst [vmem:[#allocation1 + $0x3] ss:$9 sm:$0xff] %v1583_v55  ;;  %v6857_v55 = vld [vmem:[#allocation16_spill] sm:$0xff] }
 0x2ef   :  { %2005 = vst [vmem:[#allocation1 + $0x4] ss:$9 sm:$0xff] %v1584_v56  ;;  %v1599_v39 = vmul.f32 %v5163_v46, %v6853_v1  ;;  %v1600_v19 = vmul.f32 %v5169_v6, %v6854_v50  ;;  %v1261_v57 = vsel %vm1085_vm0, %v6857_v55, 0.0  ;;  %v6858_v46 = vrot.slane %v6852_v2, 3  ;;  %v6871_v1 = vld [vmem:[#allocation29_spill] sm:$0xff]  ;;  %v6873_v55 = vld [vmem:[#allocation27_spill] sm:$0xff] }
 0x2f0   :  { %2006 = vst [vmem:[#allocation1 + $0x5] ss:$9 sm:$0xff] %v1585_v38  ;;  %v6859_v6 = vrot.slane %v6852_v2, 4  ;;  %v2071_v38 = vadd.f32 %v2070_v7, %v2069_v16  ;;  %v1262_v28 = vrot.slane %v1261_v57, 4  ;;  %v1605_v13 = vmul.f32 %v5202_v48, %v6865_v11 }
 0x2f1   :  { %2007 = vst [vmem:[#allocation1 + $0x6] ss:$9 sm:$0xff] %v1586_v45  ;;  %v1601_v56 = vmul.f32 %v5190_v14, %v6858_v46  ;;  %v6860_v45 = vld [vmem:[#allocation17_spill] sm:$0xff]  ;;  %v6864_v14 = vrot.slane %v6852_v2, 6 }
 0x2f2   :  { %v1602_v51 = vmul.f32 %v5193_v54, %v6859_v6  ;;  %v1268_v30 = vsel %vm1085_vm0, %v6860_v45, 0.0 }
 0x2f8   :  { %v5700_v47 = vld [vmem:[#allocation1] sm:$0xff] }
 0x2f9   :  { %2009 = vst [vmem:[#allocation1] ss:$9 sm:$0xff] %v1587_v33  ;;  %v6861_v33 = vrot.slane %v6852_v2, 5 }
 0x2fa   :  { %2010 = vst [vmem:[#allocation1 + $0x1] ss:$9 sm:$0xff] %v1588_v61  ;;  %v6862_v61 = vld [vmem:[#allocation21_spill] sm:$0xff] }
 0x2fb   :  { %2011 = vst [vmem:[#allocation1 + $0x2] ss:$9 sm:$0xff] %v1589_v60  ;;  %v1603_v58 = vmul.f32 %v5196_v41, %v6861_v33  ;;  %v2072_v40 = vsel %vm1085_vm0, %v6862_v61, 0.0  ;;  %v6863_v60 = vld [vmem:[#allocation14_spill] sm:$0xff]  ;;  %v1275_v41 = vsel %vm1085_vm0, %v6866_v36, 0.0 }
 0x2fc   :  { %2012 = vst [vmem:[#allocation1 + $0x3] ss:$9 sm:$0xff] %v1590_v17  ;;  %v1254_v12 = vsel %vm1085_vm0, %v6863_v60, 0.0  ;;  %v1604_v17 = vmul.f32 %v5199_v10, %v6864_v14  ;;  %v1276_v3 = vrot.slane %v1275_v41, 4  ;;  %v6879_v14 = vld [vmem:[#allocation28_spill] sm:$0xff] }
 0x2fd   :  { %2013 = vst [vmem:[#allocation1 + $0x4] ss:$9 sm:$0xff] %v1591_v21  ;;  %v1269_v21 = vrot.slane %v1268_v30, 4  ;;  %v1255_v44 = vrot.slane %v1254_v12, 4 }
 0x2fe   :  { %2014 = vst [vmem:[#allocation1 + $0x5] ss:$9 sm:$0xff] %v1592_v31  ;;  %v6867_v31 = vld [vmem:[#allocation15_spill] sm:$0xff]  ;;  %v1277_v2 = vadd.f32 %v1276_v3, %v1275_v41 }
 0x2ff   :  { %2015 = vst [vmem:[#allocation1 + $0x6] ss:$9 sm:$0xff] %v1593_v35  ;;  %v1606_v8 = vmul.f32 %v5208_v25, %v6867_v31  ;;  %v2073_v35 = vadd.f32 %v2072_v40, %v2071_v38  ;;  %v6868_v10 = vrot.slane %v6867_v31, 1  ;;  %v6872_v4 = vrot.slane %v6867_v31, 2  ;;  %v6881_v41 = vld [vmem:[#allocation31_spill] sm:$0xff] }
 0x300   :  { %v6874_v46 = vrot.slane %v6867_v31, 3  ;;  %v6877_v33 = vrot.slane %v6867_v31, 5 }
 0x301   :  { %v1607_v53 = vmul.f32 %v6756_v63, %v6868_v10  ;;  %v2082_v63 = vsel %vm1085_vm0, %v5316_v62, 0.0  ;;  %v1608_v7 = vmul.f32 %v5235_v0, %v6872_v4  ;;  %v1278_v62 = vrot.slane %v1277_v2, 2 }
 0x302   :  { %v1611_v0 = vmul.f32 %v5244_v15, %v6877_v33  ;;  %v6888_v33 = vld [vmem:[#allocation4_spill] sm:$0xff] }
 0x303   :  { %v1279_v15 = vadd.f32 %v1278_v62, %v1277_v2 }
 0x305   :  { %v1280_v10 = vrot.slane %v1279_v15, 1 }
 0x306   :  { %v5723_v29 = vld [vmem:[#allocation1] sm:$0xff] }
 0x307   :  { %2017 = vst [vmem:[#allocation1] ss:$9 sm:$0xff] %v1594_v59  ;;  %v1263_v59 = vadd.f32 %v1262_v28, %v1261_v57  ;;  %v2078_v57 = vsel %vm1085_vm0, %v6873_v55, 0.0  ;;  %v6876_v28 = vld [vmem:[#allocation30_spill] sm:$0xff]  ;;  %v6886_v55 = vld [vmem:[#allocation3_spill] sm:$0xff] }
 0x308   :  { %2018 = vst [vmem:[#allocation1 + $0x1] ss:$9 sm:$0xff] %v1595_v18  ;;  %v6869_v18 = vld [vmem:[#allocation22_spill] sm:$0xff]  ;;  %v2085_v45 = vsel %vm1085_vm0, %v6876_v28, 0.0 }
 0x309   :  { %2019 = vst [vmem:[#allocation1 + $0x2] ss:$9 sm:$0xff] %v1596_v23  ;;  %v2074_v48 = vsel %vm1085_vm0, %v6869_v18, 0.0  ;;  %v1270_v23 = vadd.f32 %v1269_v21, %v1268_v30  ;;  %v1264_v25 = vrot.slane %v1263_v59, 2  ;;  %v3869_v21 = vld [vmem:[%s6454_s0 + $0xd8] sm:$0x1] }
 0x30a   :  { %2020 = vst [vmem:[#allocation1 + $0x3] ss:$9 sm:$0xff] %v1597_v37  ;;  %v2075_v27 = vadd.f32 %v2074_v48, %v2073_v35  ;;  %v1256_v37 = vadd.f32 %v1255_v44, %v1254_v12  ;;  %v1614_v36 = vmul.f32 %v3869_v21, %v5259_v5  ;;  %v6882_v5 = vld [vmem:[#allocation32_spill] sm:$0xff] }
 0x30b   :  { %2021 = vst [vmem:[#allocation1 + $0x4] ss:$9 sm:$0xff] %v1598_v43  ;;  %v2076_v43 = vsel %vm1085_vm0, %v6870_v32, 0.0  ;;  %v1271_v50 = vrot.slane %v1270_v23, 2  ;;  %v1265_v16 = vadd.f32 %v1264_v25, %v1263_v59  ;;  %v6884_v32 = vld [vmem:[#allocation26_spill] sm:$0xff] }
 0x30c   :  { %2022 = vst [vmem:[#allocation1 + $0x5] ss:$9 sm:$0xff] %v1599_v39  ;;  %v2083_v39 = vsel %vm1085_vm0, %v6871_v1, 0.0  ;;  %v1257_v26 = vrot.slane %v1256_v37, 2  ;;  %v6885_v1 = vld [vmem:[#allocation2_spill] sm:$0xff] }
 0x30d   :  { %2023 = vst [vmem:[#allocation1 + $0x6] ss:$9 sm:$0xff] %v1600_v19  ;;  %v2077_v19 = vadd.f32 %v2076_v43, %v2075_v27  ;;  %v2084_v6 = vadd.f32 %v2083_v39, %v2082_v63  ;;  %v1272_v30 = vadd.f32 %v1271_v50, %v1270_v23  ;;  %v1266_v60 = vrot.slane %v1265_v16, 1  ;;  %v3870_v23 = vld [vmem:[%s6453_s2] ss:$0 sm:$0xff] }
 0x30e   :  { %v1258_v40 = vadd.f32 %v1257_v26, %v1256_v37  ;;  %v6883_v37 = vld [vmem:[#allocation25_spill] sm:$0xff]  ;;  %v2096_v43 = vsel %vm1085_vm0, %v6884_v32, 0.0  ;;  %v1281_v63 = vadd.f32 %v1280_v10, %v1279_v15  ;;  %v2091_v39 = vsel %vm1085_vm0, %v6885_v1, 0.0 }
 0x30f   :  { %v2079_v61 = vadd.f32 %v2078_v57, %v2077_v19  ;;  %v1267_v44 = vadd.f32 %v1266_v60, %v1265_v16  ;;  %v2095_v25 = vsel %vm1085_vm0, %v6883_v37, 0.0  ;;  %v2098_v57 = vsel %vm1085_vm0, %v6886_v55, 0.0 }
 0x310   :  { %v2097_v26 = vadd.f32 %v2096_v43, %v2095_v25  ;;  %v1313_v62 = vadd.f32 %v3870_v23, %v1281_v63  ;;  %v2113_v25 = vsel %vm1085_vm0, %v5723_v29, 0.0 }
 0x311   :  { %v1311_v27 = vadd.f32 %v3870_v23, %v1267_v44  ;;  %v2109_v44 = vsel %vm1085_vm0, %v5676_v24, 0.0 }
 0x314   :  { %v5759_v54 = vld [vmem:[#allocation1] sm:$0xff] }
 0x315   :  { %2025 = vst [vmem:[#allocation1] ss:$9 sm:$0xff] %v1601_v56  ;;  %v1609_v56 = vmul.f32 %v6759_v34, %v6874_v46  ;;  %v6878_v34 = vrot.slane %v6867_v31, 6 }
 0x316   :  { %2026 = vst [vmem:[#allocation1 + $0x1] ss:$9 sm:$0xff] %v1602_v51  ;;  %v6875_v51 = vrot.slane %v6867_v31, 4 }
 0x317   :  { %2027 = vst [vmem:[#allocation1 + $0x2] ss:$9 sm:$0xff] %v1603_v58  ;;  %v1612_v12 = vmul.f32 %v5247_v42, %v6878_v34  ;;  %v2087_v42 = vsel %vm1085_vm0, %v6881_v41, 0.0  ;;  %v2326_v41 = vpop.f32.mrf.mxu0 }
 0x318   :  { %2028 = vst [vmem:[#allocation1 + $0x3] ss:$9 sm:$0xff] %v1604_v17  ;;  %v1610_v38 = vmul.f32 %v6761_v49, %v6875_v51  ;;  %v2080_v49 = vsel %vm1085_vm0, %v6879_v14, 0.0  ;;  %v6880_v17 = vrot.slane %v6867_v31, 7  ;;  %v1259_v31 = vrot.slane %v1258_v40, 1  ;;  %v6887_v51 = vld [vmem:[#allocation23_spill] sm:$0xff] }
 0x319   :  { %2029 = vst [vmem:[#allocation1 + $0x4] ss:$9 sm:$0xff] %v1605_v13  ;;  %v2086_v13 = vadd.f32 %v2085_v45, %v2084_v6  ;;  %v2081_v35 = vadd.f32 %v2080_v49, %v2079_v61  ;;  %v2099_v45 = vadd.f32 %v2098_v57, %v2097_v26  ;;  %v2382_v57 = vld [vmem:[%s6459_s7] sm:$0xff] }
 0x31a   :  { %2030 = vst [vmem:[#allocation1 + $0x5] ss:$9 sm:$0xff] %v1606_v8  ;;  %v1613_v11 = vmul.f32 %v5253_v9, %v6880_v17  ;;  %v1273_v8 = vrot.slane %v1272_v30, 1  ;;  %v5814_v9 = vld [vmem:[%s6456_s4] ss:$0 sm:$0xff]  ;;  %v1260_v3 = vadd.f32 %v1259_v31, %v1258_v40  ;;  %v2238_v40 = vrot.slane %v1313_v62, 5  ;;  %2427 = vmatpush.msra.mxu1 %v2382_v57 }
 0x31b   :  { %2031 = vst [vmem:[#allocation1 + $0x6] ss:$9 sm:$0xff] %v1607_v53  ;;  %v2088_v59 = vadd.f32 %v2087_v42, %v2086_v13  ;;  %v2089_v53 = vsel %vm1085_vm0, %v6882_v5, 0.0  ;;  %v2125_v48 = vadd.f32 %v5814_v9, %v2081_v35  ;;  %v2383_v35 = vld [vmem:[%s6459_s7 + $0x8] sm:$0xff]  ;;  %v2108_v31 = vsel %vm1085_vm0, %v5652_v52, 0.0 }
 0x31c   :  { %v1274_v18 = vadd.f32 %v1273_v8, %v1272_v30  ;;  %v1310_v16 = vadd.f32 %v3870_v23, %v1260_v3  ;;  %v2104_v8 = vsel %vm1085_vm0, %v5603_v22, 0.0  ;;  %2465 = vmatpush.msra.mxu2 %v2383_v35 }
 0x31d   :  { %v2090_v2 = vadd.f32 %v2089_v53, %v2088_v59  ;;  %v2133_v19 = vrot.slane %v2125_v48, 1  ;;  %v2134_v4 = vrot.slane %v2125_v48, 2  ;;  %v2136_v17 = vrot.slane %v2125_v48, 4 }
 0x31e   :  { %v1312_v50 = vadd.f32 %v3870_v23, %v1274_v18  ;;  %v2137_v13 = vrot.slane %v2125_v48, 5  ;;  %v2138_v15 = vrot.slane %v2125_v48, 6  ;;  %v2110_v53 = vadd.f32 %v2109_v44, %v2108_v31 }
 0x31f   :  { %v2092_v6 = vadd.f32 %v2091_v39, %v2090_v2  ;;  %v2111_v18 = vsel %vm1085_vm0, %v5700_v47, 0.0  ;;  %v2106_v23 = vsel %vm1085_vm0, %v5628_v20, 0.0  ;;  %v2329_v43 = vpop.f32.mrf.mxu0  ;;  %v2115_v20 = vsel %vm1085_vm0, %v5759_v54, 0.0 }
 0x320   :  { %v2236_v28 = vrot.slane %v1312_v50, 6  ;;  %v2112_v37 = vadd.f32 %v2111_v18, %v2110_v53  ;;  %v2384_v53 = vld [vmem:[%s6460_s8] sm:$0x3] }
 0x322   :  { %v5795_v58 = vld [vmem:[#allocation1] sm:$0xff]  ;;  %v2114_v1 = vadd.f32 %v2113_v25, %v2112_v37 }
 0x323   :  { %2033 = vst [vmem:[#allocation1] ss:$9 sm:$0xff] %v1608_v7  ;;  %v2234_v7 = vrot.slane %v1311_v27, 7  ;;  %v2117_v55 = vsel %vm1085_vm0, %v5795_v58, 0.0 }
 0x324   :  { %2034 = vst [vmem:[#allocation1 + $0x1] ss:$9 sm:$0xff] %v1609_v56  ;;  %v2135_v56 = vrot.slane %v2125_v48, 3 }
 0x325   :  { %2035 = vst [vmem:[#allocation1 + $0x2] ss:$9 sm:$0xff] %v1610_v38  ;;  %v2093_v38 = vsel %vm1085_vm0, %v6887_v51, 0.0  ;;  %v2235_v30 = vsel %vm2186_vm1, %v2234_v7, %v1310_v16 }
 0x326   :  { %2036 = vst [vmem:[#allocation1 + $0x3] ss:$9 sm:$0xff] %v1611_v0  ;;  %v2100_v0 = vsel %vm1085_vm0, %v6888_v33, 0.0  ;;  %v2094_v61 = vadd.f32 %v2093_v38, %v2092_v6  ;;  %v2237_v60 = vsel %vm2189_vm2, %v2236_v28, %v2235_v30 }
 0x327   :  { %2037 = vst [vmem:[#allocation1 + $0x4] ss:$9 sm:$0xff] %v1612_v12  ;;  %v2101_v34 = vadd.f32 %v2100_v0, %v2099_v45  ;;  %v6889_v12 = vld [vmem:[#allocation5_spill] sm:$0xff]  ;;  %v2332_v6 = vpop.f32.mrf.mxu0 }
 0x328   :  { %2038 = vst [vmem:[#allocation1 + $0x5] ss:$9 sm:$0xff] %v1613_v11  ;;  %v2102_v14 = vsel %vm1085_vm0, %v6889_v12, 0.0  ;;  %v5841_v49 = vadd.f32 %v5814_v9, %v2094_v61  ;;  %v2239_v11 = vsel %vm2192_vm3, %v2238_v40, %v2237_v60 }
 0x329   :  { %2039 = vst [vmem:[#allocation1 + $0x6] ss:$9 sm:$0xff] %v1614_v36  ;;  %v2103_v21 = vadd.f32 %v2102_v14, %v2101_v34  ;;  %v5847_v36 = vld [vmem:[%s6458_s6] ss:$0 sm:$0xff] }
 0x32a   :  { %v2139_v10 = vrot.slane %v5841_v49, 1  ;;  %v2327_v5 = vadd.f32 %v5847_v36, %v2326_v41  ;;  %v2140_v22 = vrot.slane %v5841_v49, 2  ;;  %v2141_v52 = vrot.slane %v5841_v49, 3 }
 0x32b   :  { %v2142_v3 = vrot.slane %v5841_v49, 4  ;;  %v2330_v2 = vadd.f32 %v5847_v36, %v2329_v43  ;;  %v2143_v26 = vrot.slane %v5841_v49, 5  ;;  %v2144_v16 = vrot.slane %v5841_v49, 6 }
 0x32c   :  { %v2347_v24 = vadd.f32 3.0, %v2327_v5  ;;  %v2333_v38 = vadd.f32 %v5847_v36, %v2332_v6 }
 0x32d   :  { %v2348_v39 = vadd.f32 3.0, %v2330_v2 }
 0x32e   :  { %v2354_v27 = vmax.f32 %v2347_v24, 0.0  ;;  %v2349_v0 = vadd.f32 3.0, %v2333_v38 }
 0x32f   :  { %v2355_v29 = vmax.f32 %v2348_v39, 0.0 }
 0x330   :  { %v5830_v46 = vld [vmem:[#allocation1] sm:$0xff]  ;;  %v2361_v32 = vmin.f32 %v2354_v27, 6.0  ;;  %v2356_v40 = vmax.f32 %v2349_v0, 0.0 }
 0x331   :  { %2245 = vst [vmem:[#allocation1 + $0x4] ss:$9 sm:$0xff] %v2125_v48  ;;  %v2105_v48 = vadd.f32 %v2104_v8, %v2103_v21  ;;  %v2362_v7 = vmin.f32 %v2355_v29, 6.0  ;;  %v2119_v33 = vsel %vm1085_vm0, %v5830_v46, 0.0 }
 0x332   :  { %2247 = vst [vmem:[#allocation1 + $0x5] ss:$9 sm:$0xff] %v2133_v19  ;;  %v2368_v63 = vmul.f32 0.16666667, %v2361_v32  ;;  %v2363_v34 = vmin.f32 %v2356_v40, 6.0  ;;  %v5901_v32 = vperm.slane %v2384_v53, 0 }
 0x333   :  { %2249 = vst [vmem:[#allocation1 + $0x6] ss:$9 sm:$0xff] %v2134_v4  ;;  %v2107_v47 = vadd.f32 %v2106_v23, %v2105_v48  ;;  %v2116_v4 = vadd.f32 %v2115_v20, %v2114_v1  ;;  %v2369_v51 = vmul.f32 0.16666667, %v2362_v7 }
 0x334   :  { %2251 = vst [vmem:[#allocation1 + $0x7] ss:$9 sm:$0xff] %v2135_v56  ;;  %v2375_v19 = vmul.f32 %v2368_v63, %v2327_v5  ;;  %v2370_v12 = vmul.f32 0.16666667, %v2363_v34 }
 0x335   :  { %v2127_v50 = vadd.f32 %v5814_v9, %v2107_v47  ;;  %v2118_v45 = vadd.f32 %v2117_v55, %v2116_v4  ;;  %v2376_v30 = vmul.f32 %v2369_v51, %v2330_v2 }
 0x336   :  { %3745 = vmatmul.msk.f32.vlgmr.msra.gmra.mxu2 %vm2390_vm9, %v2375_v19  ;;  %3738 = vmatmul.msk.f32.vlgmr.msra.gmra.mxu1 %vm2390_vm9, %v2375_v19 }
 0x337   :  { %v2145_v56 = vrot.slane %v2127_v50, 1  ;;  %v2146_v62 = vrot.slane %v2127_v50, 2  ;;  %v2147_v28 = vrot.slane %v2127_v50, 3  ;;  %v2148_v58 = vrot.slane %v2127_v50, 4 }
 0x338   :  { %v2149_v61 = vrot.slane %v2127_v50, 5  ;;  %v2120_v60 = vadd.f32 %v2119_v33, %v2118_v45 }
 0x33a   :  { %v2128_v14 = vadd.f32 %v5814_v9, %v2120_v60 }
 0x33b   :  { %v2252_v42 = vld [vmem:[#allocation1] sm:$0xff] }
 0x33c   :  { %v2288_v59 = vsel %vm2287_vm8, %v2239_v11, %v2252_v42  ;;  %2253 = vst [vmem:[#allocation1] ss:$9 sm:$0xff] %v2136_v17  ;;  %v2150_v17 = vrot.slane %v2127_v50, 6  ;;  %v2151_v46 = vrot.slane %v2128_v14, 1  ;;  %v2154_v21 = vrot.slane %v2128_v14, 4 }
 0x33d   :  { %2334 = vmatmul.f32.gmra.mxu0 %v2288_v59  ;;  %2255 = vst [vmem:[#allocation1 + $0x1] ss:$9 sm:$0xff] %v2137_v13  ;;  %v2152_v13 = vrot.slane %v2128_v14, 2  ;;  %v2155_v41 = vrot.slane %v2128_v14, 5  ;;  %v2156_v42 = vrot.slane %v2128_v14, 6 }
 0x33e   :  { %2257 = vst [vmem:[#allocation1 + $0x2] ss:$9 sm:$0xff] %v2138_v15  ;;  %3746 = vmatmul.msk.f32.gmra.mxu2 %vm2390_vm9, %v2376_v30  ;;  %3739 = vmatmul.msk.f32.gmra.mxu1 %vm2390_vm9, %v2376_v30  ;;  %v2153_v15 = vrot.slane %v2128_v14, 3 }
 0x33f   :  { %2259 = vst [vmem:[#allocation1 + $0x3] ss:$9 sm:$0xff] %v5841_v49  ;;  %v2377_v49 = vmul.f32 %v2370_v12, %v2333_v38 }
 0x340   :  { %2260 = vst [vmem:[#allocation1 + $0x4] ss:$9 sm:$0xff] %v2139_v10 }
 0x341   :  { %2261 = vst [vmem:[#allocation1 + $0x5] ss:$9 sm:$0xff] %v2140_v22  ;;  %v5897_v22 = vperm.slane %v2384_v53, 1 }
 0x342   :  { %2262 = vst [vmem:[#allocation1 + $0x6] ss:$9 sm:$0xff] %v2141_v52 }
 0x343   :  { %2263 = vst [vmem:[#allocation1 + $0x7] ss:$9 sm:$0xff] %v2142_v3 }
 0x346   :  { %3747 = vmatmul.msk.f32.gmra.mxu2 %vm2390_vm9, %v2377_v49  ;;  %3740 = vmatmul.msk.f32.gmra.mxu1 %vm2390_vm9, %v2377_v49 }
 0x34a   :  { %v2264_v54 = vld [vmem:[#allocation1] sm:$0xff] }
 0x34b   :  { %2337 = vmatmul.f32.vlgmr.msra.gmra.mxu3 %v2264_v54  ;;  %2265 = vst [vmem:[#allocation1] ss:$9 sm:$0xff] %v2143_v26 }
 0x34c   :  { %2266 = vst [vmem:[#allocation1 + $0x1] ss:$9 sm:$0xff] %v2144_v16 }
 0x34d   :  { %2267 = vst [vmem:[#allocation1 + $0x2] ss:$9 sm:$0xff] %v2127_v50 }
 0x34e   :  { %2268 = vst [vmem:[#allocation1 + $0x3] ss:$9 sm:$0xff] %v2145_v56 }
 0x34f   :  { %2269 = vst [vmem:[#allocation1 + $0x4] ss:$9 sm:$0xff] %v2146_v62 }
 0x350   :  { %2270 = vst [vmem:[#allocation1 + $0x5] ss:$9 sm:$0xff] %v2147_v28 }
 0x351   :  { %2271 = vst [vmem:[#allocation1 + $0x6] ss:$9 sm:$0xff] %v2148_v58 }
 0x352   :  { %2272 = vst [vmem:[#allocation1 + $0x7] ss:$9 sm:$0xff] %v2149_v61 }
 0x359   :  { %v2273_v11 = vld [vmem:[#allocation1] sm:$0xff] }
 0x35a   :  { %2340 = vmatmul.f32.gmra.mxu3 %v2273_v11  ;;  %2274 = vst [vmem:[#allocation1] ss:$9 sm:$0xff] %v2150_v17 }
 0x35b   :  { %2275 = vst [vmem:[#allocation1 + $0x1] ss:$9 sm:$0xff] %v2128_v14 }
 0x35c   :  { %2276 = vst [vmem:[#allocation1 + $0x2] ss:$9 sm:$0xff] %v2151_v46 }
 0x35d   :  { %2277 = vst [vmem:[#allocation1 + $0x3] ss:$9 sm:$0xff] %v2152_v13 }
 0x35e   :  { %2278 = vst [vmem:[#allocation1 + $0x4] ss:$9 sm:$0xff] %v2153_v15 }
 0x35f   :  { %2279 = vst [vmem:[#allocation1 + $0x5] ss:$9 sm:$0xff] %v2154_v21 }
 0x360   :  { %2280 = vst [vmem:[#allocation1 + $0x6] ss:$9 sm:$0xff] %v2155_v41 }
 0x361   :  { %2281 = vst [vmem:[#allocation1 + $0x7] ss:$9 sm:$0xff] %v2156_v42 }
 0x368   :  { %v2282_v9 = vld [vmem:[#allocation1] sm:$0xff] }
 0x369   :  { %2343 = vmatmul.f32.gmra.mxu3 %v2282_v9 }
 0x3b3   :  { %v2429_v43 = vpop.f32.mrf.mxu1 }
 0x3b4   :  { %v2430_v1 = vadd.f32 %v2429_v43, %v5901_v32 }
 0x3b6   :  { %v3752_v39 = vmul.f32 -1.442695, %v2430_v1 }
 0x3b9   :  { %v2467_v18 = vpop.f32.mrf.mxu2 }
 0x3ba   :  { %v2335_v8 = vpop.f32.mrf.mxu0  ;;  %v2468_v52 = vadd.f32 %v2467_v18, %v5897_v22 }
 0x3bb   :  { %v2336_v35 = vadd.f32 %v5847_v36, %v2335_v8  ;;  %v2432_v7 = vpop.f32.mrf.mxu1 }
 0x3bc   :  { %v3753_v3 = vmul.f32 -1.442695, %v2468_v52  ;;  %v2433_v57 = vadd.f32 %v2432_v7, %v5901_v32 }
 0x3bd   :  { %v2350_v31 = vadd.f32 3.0, %v2336_v35 }
 0x3be   :  { %3785 = vpow2.f32 %v3753_v3  ;;  %v3754_v62 = vmul.f32 -1.442695, %v2433_v57 }
 0x3bf   :  { %v2357_v44 = vmax.f32 %v2350_v31, 0.0 }
 0x3c1   :  { %v2364_v59 = vmin.f32 %v2357_v44, 6.0  ;;  %v2470_v50 = vpop.f32.mrf.mxu2 }
 0x3c2   :  { %v2471_v26 = vadd.f32 %v2470_v50, %v5897_v22 }
 0x3c3   :  { %v2371_v10 = vmul.f32 0.16666667, %v2364_v59  ;;  %v2435_v1 = vpop.f32.mrf.mxu1 }
 0x3c4   :  { %v3786_v25 = vpop.eup %3785  ;;  %v3755_v4 = vmul.f32 -1.442695, %v2471_v26  ;;  %v2436_v7 = vadd.f32 %v2435_v1, %v5901_v32 }
 0x3c5   :  { %v2378_v5 = vmul.f32 %v2371_v10, %v2336_v35  ;;  %v2531_v2 = vadd.f32 1.0, %v3786_v25 }
 0x3c7   :  { %3741 = vmatmul.msk.f32.gmra.mxu1 %vm2390_vm9, %v2378_v5  ;;  %3748 = vmatmul.msk.f32.gmra.mxu2 %vm2390_vm9, %v2378_v5  ;;  %3787 = vrcp.f32 %v2531_v2  ;;  %vm2564_vm10 = vweird.f32 %v2531_v2  ;;  %v2570_v33 = vand.u32 2147483648, %v2531_v2  ;;  %v2568_v61 = vand.u32 2147483647, %v2531_v2 }
 0x3c8   :  { %3789 = vpow2.f32 %v3752_v39 }
 0x3c9   :  { %3791 = vpow2.f32 %v3755_v4  ;;  %v2473_v34 = vpop.f32.mrf.mxu2  ;;  %v2571_v49 = vor.u32 1.1754944e-38, %v2570_v33  ;;  %vm2569_vm13 = vcmp.eq.f32.partialorder %v2568_v61, 8.507059e+37 }
 0x3ca   :  { %3793 = vpow2.f32 %v3754_v62  ;;  %v2474_v11 = vadd.f32 %v2473_v34, %v5897_v22 }
 0x3cc   :  { %v3757_v31 = vmul.f32 -1.442695, %v2474_v11 }
 0x3cd   :  { %v3788_v29 = vpop.eup %3787 }
 0x3ce   :  { %v2338_v48 = vpop.f32.mrf.mxu3  ;;  %v2560_v55 = vmul.f32 %v3788_v29, %v2531_v2  ;;  %v3790_v56 = vpop.eup %3789  ;;  %vm2565_vm11 = vweird.f32 %v3788_v29 }
 0x3cf   :  { %v2339_v24 = vadd.f32 %v5847_v36, %v2338_v48  ;;  %v2530_v38 = vadd.f32 1.0, %v3790_v56  ;;  %v3792_v58 = vpop.eup %3791  ;;  %vm5913_vm12 = vmor %vm2564_vm10, %vm2565_vm11  ;;  %vm2775_vm10 = vcmask 1040384  }
 0x3d0   :  { %v2561_v6 = vsub.f32 1.0, %v2560_v55  ;;  %v5909_v40 = vadd.f32 1.0, %v3792_v58  ;;  %v3794_v12 = vpop.eup %3793 }
 0x3d1   :  { %v2351_v23 = vadd.f32 3.0, %v2339_v24  ;;  %3795 = vrcp.f32 %v2530_v38  ;;  %v5918_v46 = vadd.f32 1.0, %v3794_v12  ;;  %vm2549_vm14 = vweird.f32 %v2530_v38 }
 0x3d2   :  { %v2562_v28 = vmul.f32 %v3788_v29, %v2561_v6  ;;  %3797 = vrcp.f32 %v5909_v40  ;;  %v2555_v41 = vand.u32 2147483648, %v2530_v38  ;;  %v2553_v8 = vand.u32 2147483647, %v2530_v38 }
 0x3d3   :  { %v2358_v27 = vmax.f32 %v2351_v23, 0.0  ;;  %3799 = vrcp.f32 %v5918_v46  ;;  %vm2594_vm11 = vweird.f32 %v5909_v40  ;;  %v2600_v25 = vand.u32 2147483648, %v5909_v40 }
 0x3d4   :  { %v2563_v0 = vadd.f32 %v3788_v29, %v2562_v28  ;;  %v2556_v5 = vor.u32 1.1754944e-38, %v2555_v41  ;;  %vm2554_vm8 = vcmp.eq.f32.partialorder %v2553_v8, 8.507059e+37  ;;  %3801 = vpow2.f32 %v3757_v31 }
 0x3d5   :  { %v2365_v37 = vmin.f32 %v2358_v27, 6.0  ;;  %v2601_v55 = vor.u32 1.1754944e-38, %v2600_v25  ;;  %v2583_v6 = vand.u32 2147483647, %v5918_v46 }
 0x3d6   :  { %v2567_v13 = vsel %vm5913_vm12, %v3788_v29, %v2563_v0 }
 0x3d7   :  { %v2372_v47 = vmul.f32 0.16666667, %v2365_v37  ;;  %v3796_v14 = vpop.eup %3795  ;;  %v2572_v35 = vsel %vm2569_vm13, %v2571_v49, %v2567_v13  ;;  %v2598_v37 = vand.u32 2147483647, %v5909_v40 }
 0x3d8   :  { %v2545_v21 = vmul.f32 %v3796_v14, %v2530_v38  ;;  %vm2550_vm15 = vweird.f32 %v3796_v14  ;;  %v3798_v44 = vpop.eup %3797  ;;  %v2768_v18 = vrot.slane %v2572_v35, 7  ;;  %v3756_v38 = vmul.f32 -1.442695, %v2436_v7 }
 0x3d9   :  { %v2379_v63 = vmul.f32 %v2372_v47, %v2339_v24  ;;  %vm2551_vm7 = vmor %vm2549_vm14, %vm2550_vm15  ;;  %v2590_v53 = vmul.f32 %v3798_v44, %v5909_v40  ;;  %v3800_v23 = vpop.eup %3799  ;;  %vm2595_vm12 = vweird.f32 %v3798_v44  ;;  %vm2599_vm14 = vcmp.eq.f32.partialorder %v2598_v37, 8.507059e+37 }
 0x3da   :  { %v2546_v9 = vsub.f32 1.0, %v2545_v21  ;;  %v2575_v29 = vmul.f32 %v3800_v23, %v5918_v46  ;;  %vm2596_vm13 = vmor %vm2594_vm11, %vm2595_vm12  ;;  %vm2579_vm15 = vweird.f32 %v5918_v46 }
 0x3db   :  { %3742 = vmatmul.msk.f32.gmra.mxu1 %vm2390_vm9, %v2379_v63  ;;  %3749 = vmatmul.msk.f32.gmra.mxu2 %vm2390_vm9, %v2379_v63  ;;  %v2591_v48 = vsub.f32 1.0, %v2590_v53 }
 0x3dc   :  { %v2547_v10 = vmul.f32 %v3796_v14, %v2546_v9  ;;  %v2576_v56 = vsub.f32 1.0, %v2575_v29 }
 0x3dd   :  { %v2341_v20 = vpop.f32.mrf.mxu3  ;;  %v2592_v50 = vmul.f32 %v3798_v44, %v2591_v48 }
 0x3de   :  { %v2342_v19 = vadd.f32 %v5847_v36, %v2341_v20  ;;  %v2548_v52 = vadd.f32 %v3796_v14, %v2547_v10 }
 0x3df   :  { %v2593_v57 = vadd.f32 %v3798_v44, %v2592_v50 }
 0x3e0   :  { %v2352_v16 = vadd.f32 3.0, %v2342_v19  ;;  %v2552_v3 = vsel %vm2551_vm7, %v3796_v14, %v2548_v52  ;;  %vm2580_vm7 = vweird.f32 %v3800_v23 }
 0x3e1   :  { %v2557_v27 = vsel %vm2554_vm8, %v2556_v5, %v2552_v3  ;;  %vm2584_vm8 = vcmp.eq.f32.partialorder %v2583_v6, 8.507059e+37 }
 0x3e2   :  { %v2359_v54 = vmax.f32 %v2352_v16, 0.0  ;;  %v5930_v43 = vsel %vm2775_vm10, %v2557_v27, %v2768_v18  ;;  %v5933_v2 = vsel %vm2186_vm1, %v2557_v27, %v2768_v18  ;;  %v5936_v63 = vsel %vm2189_vm2, %v2557_v27, %v2768_v18  ;;  %v3802_v16 = vpop.eup %3801 }
 0x3e3   :  { %v5939_v39 = vsel %vm2192_vm3, %v2557_v27, %v2768_v18  ;;  %v5942_v20 = vsel %vm2195_vm4, %v2557_v27, %v2768_v18  ;;  %v5948_v26 = vsel %vm2201_vm6, %v2557_v27, %v2768_v18  ;;  %v5954_v4 = vsel %vm1085_vm0, %v2768_v18, %v2557_v27 }
 0x3e4   :  { %v2366_v51 = vmin.f32 %v2359_v54, 6.0  ;;  %v2585_v54 = vand.u32 2147483648, %v5918_v46  ;;  %v2535_v62 = vadd.f32 1.0, %v3802_v16 }
 0x3e6   :  { %v2373_v45 = vmul.f32 0.16666667, %v2366_v51  ;;  %v2597_v51 = vsel %vm2596_vm13, %v3798_v44, %v2593_v57  ;;  %v2586_v58 = vor.u32 1.1754944e-38, %v2585_v54  ;;  %3803 = vrcp.f32 %v2535_v62 }
 0x3e7   :  { %v2602_v28 = vsel %vm2599_vm14, %v2601_v55, %v2597_v51  ;;  %3805 = vpow2.f32 %v3756_v38  ;;  %vm2624_vm11 = vweird.f32 %v2535_v62  ;;  %v2628_v9 = vand.u32 2147483647, %v2535_v62 }
 0x3e8   :  { %v2380_v30 = vmul.f32 %v2373_v45, %v2342_v19  ;;  %v5945_v19 = vsel %vm2198_vm5, %v2557_v27, %v2768_v18  ;;  %v2577_v45 = vmul.f32 %v3800_v23, %v2576_v56  ;;  %v2630_v8 = vand.u32 2147483648, %v2535_v62 }
 0x3e9   :  { %vm2629_vm14 = vcmp.eq.f32.partialorder %v2628_v9, 8.507059e+37 }
 0x3ea   :  { %3750 = vmatmul.msk.f32.gmra.mxu2 %vm2390_vm9, %v2380_v30  ;;  %3743 = vmatmul.msk.f32.gmra.mxu1 %vm2390_vm9, %v2380_v30  ;;  %v2769_v30 = vrot.slane %v2602_v28, 7  ;;  %v2578_v33 = vadd.f32 %v3800_v23, %v2577_v45 }
 0x3ec   :  { %v2344_v17 = vpop.f32.mrf.mxu3  ;;  %v3804_v49 = vpop.eup %3803 }
 0x3ed   :  { %v2345_v15 = vadd.f32 %v5847_v36, %v2344_v17  ;;  %v3806_v13 = vpop.eup %3805  ;;  %vm2625_vm12 = vweird.f32 %v3804_v49 }
 0x3ee   :  { %v2534_v21 = vadd.f32 1.0, %v3806_v13  ;;  %vm2626_vm13 = vmor %vm2624_vm11, %vm2625_vm12 }
 0x3ef   :  { %v2353_v42 = vadd.f32 3.0, %v2345_v15 }
 0x3f0   :  { %3807 = vrcp.f32 %v2534_v21  ;;  %v2615_v10 = vand.u32 2147483648, %v2534_v21  ;;  %v2613_v18 = vand.u32 2147483647, %v2534_v21 }
 0x3f1   :  { %v2360_v59 = vmax.f32 %v2353_v42, 0.0 }
 0x3f2   :  { %v2616_v48 = vor.u32 1.1754944e-38, %v2615_v10 }
 0x3f3   :  { %v2367_v36 = vmin.f32 %v2360_v59, 6.0  ;;  %v2631_v59 = vor.u32 1.1754944e-38, %v2630_v8 }
 0x3f5   :  { %v2374_v24 = vmul.f32 0.16666667, %v2367_v36 }
 0x3f6   :  { %v3808_v31 = vpop.eup %3807 }
 0x3f7   :  { %v2381_v47 = vmul.f32 %v2374_v24, %v2345_v15  ;;  %v2620_v15 = vmul.f32 %v3804_v49, %v2535_v62  ;;  %v2605_v44 = vmul.f32 %v3808_v31, %v2534_v21 }
 0x3f9   :  { %3751 = vmatmul.msk.f32.gmra.mxu2 %vm2390_vm9, %v2381_v47  ;;  %3744 = vmatmul.msk.f32.gmra.mxu1 %vm2390_vm9, %v2381_v47  ;;  %vm2581_vm9 = vmor %vm2579_vm15, %vm2580_vm7  ;;  %v2621_v41 = vsub.f32 1.0, %v2620_v15  ;;  %vm2609_vm15 = vweird.f32 %v2534_v21  ;;  %v2606_v53 = vsub.f32 1.0, %v2605_v44  ;;  %vm2610_vm7 = vweird.f32 %v3808_v31 }
 0x3fa   :  { %v2582_v0 = vsel %vm2581_vm9, %v3800_v23, %v2578_v33  ;;  %vm2611_vm9 = vmor %vm2609_vm15, %vm2610_vm7 }
 0x3fb   :  { %v2587_v61 = vsel %vm2584_vm8, %v2586_v58, %v2582_v0  ;;  %v2622_v42 = vmul.f32 %v3804_v49, %v2621_v41  ;;  %v2607_v36 = vmul.f32 %v3808_v31, %v2606_v53  ;;  %vm2614_vm8 = vcmp.eq.f32.partialorder %v2613_v18, 8.507059e+37 }
 0x3fc   :  { %v5963_v40 = vsel %vm2775_vm10, %v2587_v61, %v2769_v30  ;;  %v5966_v60 = vsel %vm2186_vm1, %v2587_v61, %v2769_v30  ;;  %v5969_v34 = vsel %vm2189_vm2, %v2587_v61, %v2769_v30  ;;  %v5972_v12 = vsel %vm2192_vm3, %v2587_v61, %v2769_v30 }
 0x3fd   :  { %v5975_v14 = vsel %vm2195_vm4, %v2587_v61, %v2769_v30  ;;  %v5978_v17 = vsel %vm2198_vm5, %v2587_v61, %v2769_v30  ;;  %v5981_v46 = vsel %vm2201_vm6, %v2587_v61, %v2769_v30  ;;  %v5984_v11 = vsel %vm1085_vm0, %v2769_v30, %v2587_v61 }
 0x3fe   :  { %v2623_v35 = vadd.f32 %v3804_v49, %v2622_v42  ;;  %v2608_v24 = vadd.f32 %v3808_v31, %v2607_v36 }
 0x400   :  { %v2627_v5 = vsel %vm2626_vm13, %v3804_v49, %v2623_v35  ;;  %v2612_v23 = vsel %vm2611_vm9, %v3808_v31, %v2608_v24 }
 0x401   :  { %v2632_v52 = vsel %vm2629_vm14, %v2631_v59, %v2627_v5  ;;  %v5988_v27 = vsel %vm2614_vm8, %v2616_v48, %v2612_v23 }
 0x402   :  { %v5986_v3 = vrot.slane %v2632_v52, 7 }
 0x404   :  { %v5993_v37 = vsel %vm2198_vm5, %v5988_v27, %v5986_v3  ;;  %v5998_v25 = vsel %vm2201_vm6, %v5988_v27, %v5986_v3  ;;  %v6003_v47 = vsel %vm1085_vm0, %v5986_v3, %v5988_v27 }
 0x444   :  { %v2438_v1 = vpop.f32.mrf.mxu1 }
 0x445   :  { %v2439_v50 = vadd.f32 %v2438_v1, %v5901_v32 }
 0x447   :  { %v3758_v29 = vmul.f32 -1.442695, %v2439_v50 }
 0x449   :  { %3809 = vpow2.f32 %v3758_v29 }
 0x44a   :  { %v2476_v16 = vpop.f32.mrf.mxu2 }
 0x44b   :  { %v2477_v7 = vadd.f32 %v2476_v16, %v5897_v22 }
 0x44d   :  { %v3759_v55 = vmul.f32 -1.442695, %v2477_v7 }
 0x44f   :  { %v3810_v57 = vpop.eup %3809  ;;  %3811 = vpow2.f32 %v3759_v55 }
 0x450   :  { %v2536_v54 = vadd.f32 1.0, %v3810_v57 }
 0x452   :  { %3813 = vrcp.f32 %v2536_v54  ;;  %vm2639_vm13 = vweird.f32 %v2536_v54  ;;  %v2645_v35 = vand.u32 2147483648, %v2536_v54  ;;  %v2643_v59 = vand.u32 2147483647, %v2536_v54 }
 0x454   :  { %v2646_v36 = vor.u32 1.1754944e-38, %v2645_v35  ;;  %vm2644_vm8 = vcmp.eq.f32.partialorder %v2643_v59, 8.507059e+37 }
 0x455   :  { %v3812_v56 = vpop.eup %3811 }
 0x456   :  { %v2537_v6 = vadd.f32 1.0, %v3812_v56 }
 0x458   :  { %v3814_v62 = vpop.eup %3813  ;;  %3815 = vrcp.f32 %v2537_v6  ;;  %v2441_v51 = vpop.f32.mrf.mxu1  ;;  %v2658_v21 = vand.u32 2147483647, %v2537_v6  ;;  %v2660_v41 = vand.u32 2147483648, %v2537_v6  ;;  %vm2654_vm15 = vweird.f32 %v2537_v6 }
 0x459   :  { %v2635_v38 = vmul.f32 %v3814_v62, %v2536_v54  ;;  %v2442_v28 = vadd.f32 %v2441_v51, %v5901_v32  ;;  %vm2640_vm11 = vweird.f32 %v3814_v62 }
 0x45a   :  { %vm6011_vm14 = vmor %vm2639_vm13, %vm2640_vm11  ;;  %v2661_v5 = vor.u32 1.1754944e-38, %v2660_v41  ;;  %vm2659_vm9 = vcmp.eq.f32.partialorder %v2658_v21, 8.507059e+37 }
 0x45b   :  { %v2636_v45 = vsub.f32 1.0, %v2635_v38  ;;  %v3760_v58 = vmul.f32 -1.442695, %v2442_v28 }
 0x45d   :  { %3817 = vpow2.f32 %v3760_v58  ;;  %v2637_v0 = vmul.f32 %v3814_v62, %v2636_v45 }
 0x45e   :  { %v3816_v30 = vpop.eup %3815  ;;  %v2479_v33 = vpop.f32.mrf.mxu2 }
 0x45f   :  { %v2650_v61 = vmul.f32 %v3816_v30, %v2537_v6  ;;  %v2480_v49 = vadd.f32 %v2479_v33, %v5897_v22  ;;  %v2638_v9 = vadd.f32 %v3814_v62, %v2637_v0  ;;  %vm2655_vm12 = vweird.f32 %v3816_v30 }
 0x460   :  { %vm2656_vm7 = vmor %vm2654_vm15, %vm2655_vm12 }
 0x461   :  { %v2651_v13 = vsub.f32 1.0, %v2650_v61  ;;  %v3761_v15 = vmul.f32 -1.442695, %v2480_v49  ;;  %v2642_v53 = vsel %vm6011_vm14, %v3814_v62, %v2638_v9 }
 0x462   :  { %v2647_v23 = vsel %vm2644_vm8, %v2646_v36, %v2642_v53 }
 0x463   :  { %v3818_v42 = vpop.eup %3817  ;;  %v2652_v8 = vmul.f32 %v3816_v30, %v2651_v13  ;;  %3819 = vpow2.f32 %v3761_v15 }
 0x464   :  { %v6009_v31 = vadd.f32 1.0, %v3818_v42 }
 0x465   :  { %v2653_v10 = vadd.f32 %v3816_v30, %v2652_v8 }
 0x466   :  { %3821 = vrcp.f32 %v6009_v31  ;;  %vm2669_vm13 = vweird.f32 %v6009_v31  ;;  %v2675_v35 = vand.u32 2147483648, %v6009_v31  ;;  %v2673_v44 = vand.u32 2147483647, %v6009_v31 }
 0x467   :  { %v2657_v18 = vsel %vm2656_vm7, %v3816_v30, %v2653_v10 }
 0x468   :  { %v2662_v52 = vsel %vm2659_vm9, %v2661_v5, %v2657_v18  ;;  %v2676_v18 = vor.u32 1.1754944e-38, %v2675_v35  ;;  %vm2674_vm8 = vcmp.eq.f32.partialorder %v2673_v44, 8.507059e+37 }
 0x469   :  { %v3820_v48 = vpop.eup %3819  ;;  %v2771_v24 = vrot.slane %v2662_v52, 7 }
 0x46a   :  { %v2539_v55 = vadd.f32 1.0, %v3820_v48 }
 0x46b   :  { %v6019_v1 = vsel %vm2775_vm10, %v2647_v23, %v2771_v24  ;;  %v6022_v50 = vsel %vm2186_vm1, %v2647_v23, %v2771_v24  ;;  %v6025_v29 = vsel %vm2189_vm2, %v2647_v23, %v2771_v24  ;;  %v6028_v16 = vsel %vm2192_vm3, %v2647_v23, %v2771_v24 }
 0x46c   :  { %6894 = vst [vmem:[#allocation6_spill] sm:$0xff] %v6022_v50  ;;  %v2828_v7 = vsel %vm2195_vm4, %v2647_v23, %v2771_v24  ;;  %v3822_v57 = vpop.eup %3821  ;;  %v2830_v56 = vsel %vm2198_vm5, %v2647_v23, %v2771_v24  ;;  %v2832_v6 = vsel %vm2201_vm6, %v2647_v23, %v2771_v24  ;;  %v2834_v62 = vsel %vm1085_vm0, %v2771_v24, %v2647_v23 }
 0x46d   :  { %6895 = vst [vmem:[#allocation7_spill] sm:$0xff] %v6025_v29  ;;  %v2829_v54 = vrot.slane %v2828_v7, 4  ;;  %v2831_v51 = vrot.slane %v2830_v56, 5  ;;  %v2833_v38 = vrot.slane %v2832_v6, 6  ;;  %v2835_v28 = vrot.slane %v2834_v62, 7 }
 0x46e   :  { %6896 = vst [vmem:[#allocation8_spill] sm:$0xff] %v6028_v16  ;;  %v2665_v0 = vmul.f32 %v3822_v57, %v6009_v31  ;;  %3823 = vrcp.f32 %v2539_v55  ;;  %vm2670_vm11 = vweird.f32 %v3822_v57  ;;  %v2690_v41 = vand.u32 2147483648, %v2539_v55 }
 0x46f   :  { %v6034_v45 = vrot.slane %v2829_v54, 1  ;;  %v6036_v58 = vrot.slane %v2831_v51, 1  ;;  %v6038_v30 = vrot.slane %v2833_v38, 1  ;;  %v6040_v33 = vrot.slane %v2835_v28, 1  ;;  %vm2671_vm14 = vmor %vm2669_vm13, %vm2670_vm11 }
 0x470   :  { %v2666_v61 = vsub.f32 1.0, %v2665_v0  ;;  %v2688_v8 = vand.u32 2147483647, %v2539_v55  ;;  %vm2684_vm15 = vweird.f32 %v2539_v55  ;;  %v2691_v10 = vor.u32 1.1754944e-38, %v2690_v41  ;;  %v2482_v0 = vpop.f32.mrf.mxu2 }
 0x471   :  { %2965 = vst [vmem:[#allocation1] ss:$9 sm:$0xff] %v6034_v45 }
 0x472   :  { %2967 = vst [vmem:[#allocation1 + $0x1] ss:$9 sm:$0xff] %v6036_v58  ;;  %v2667_v13 = vmul.f32 %v3822_v57, %v2666_v61  ;;  %vm2689_vm9 = vcmp.eq.f32.partialorder %v2688_v8, 8.507059e+37  ;;  %v2483_v61 = vadd.f32 %v2482_v0, %v5897_v22 }
 0x473   :  { %2969 = vst [vmem:[#allocation1 + $0x2] ss:$9 sm:$0xff] %v6038_v30 }
 0x474   :  { %2971 = vst [vmem:[#allocation1 + $0x3] ss:$9 sm:$0xff] %v6040_v33  ;;  %v3824_v49 = vpop.eup %3823  ;;  %v2668_v42 = vadd.f32 %v3822_v57, %v2667_v13  ;;  %v3763_v13 = vmul.f32 -1.442695, %v2483_v61 }
 0x475   :  { %v2680_v15 = vmul.f32 %v3824_v49, %v2539_v55  ;;  %vm2685_vm12 = vweird.f32 %v3824_v49 }
 0x476   :  { %vm2686_vm7 = vmor %vm2684_vm15, %vm2685_vm12  ;;  %v2672_v5 = vsel %vm2671_vm14, %v3822_v57, %v2668_v42  ;;  %3825 = vpow2.f32 %v3763_v13 }
 0x477   :  { %v2681_v21 = vsub.f32 1.0, %v2680_v15  ;;  %v2677_v48 = vsel %vm2674_vm8, %v2676_v18, %v2672_v5 }
 0x479   :  { %v2682_v9 = vmul.f32 %v3824_v49, %v2681_v21 }
 0x47b   :  { %v2683_v59 = vadd.f32 %v3824_v49, %v2682_v9 }
 0x47c   :  { %v3826_v42 = vpop.eup %3825 }
 0x47d   :  { %v2687_v53 = vsel %vm2686_vm7, %v3824_v49, %v2683_v59  ;;  %v2444_v49 = vpop.f32.mrf.mxu1  ;;  %v2541_v9 = vadd.f32 1.0, %v3826_v42 }
 0x47e   :  { %v2692_v36 = vsel %vm2689_vm9, %v2691_v10, %v2687_v53  ;;  %v2445_v15 = vadd.f32 %v2444_v49, %v5901_v32 }
 0x47f   :  { %v2772_v52 = vrot.slane %v2692_v36, 7  ;;  %vm2714_vm11 = vweird.f32 %v2541_v9 }
 0x480   :  { %v3762_v21 = vmul.f32 -1.442695, %v2445_v15 }
 0x481   :  { %v2836_v24 = vsel %vm2775_vm10, %v2677_v48, %v2772_v52  ;;  %v2837_v23 = vsel %vm2186_vm1, %v2677_v48, %v2772_v52  ;;  %v2839_v7 = vsel %vm2189_vm2, %v2677_v48, %v2772_v52  ;;  %v6054_v31 = vsel %vm2192_vm3, %v2677_v48, %v2772_v52 }
 0x482   :  { %v2838_v55 = vrot.slane %v2837_v23, 1  ;;  %v2840_v54 = vrot.slane %v2839_v7, 2  ;;  %v6057_v57 = vsel %vm2195_vm4, %v2677_v48, %v2772_v52  ;;  %v6060_v56 = vsel %vm2198_vm5, %v2677_v48, %v2772_v52 }
 0x483   :  { %v6063_v6 = vsel %vm2201_vm6, %v2677_v48, %v2772_v52  ;;  %v6066_v62 = vsel %vm1085_vm0, %v2772_v52, %v2677_v48  ;;  %v6068_v51 = vrot.slane %v2836_v24, 1  ;;  %3827 = vpow2.f32 %v3762_v21 }
 0x484   :  { %v6070_v38 = vrot.slane %v2838_v55, 1  ;;  %v6072_v28 = vrot.slane %v2840_v54, 1  ;;  %3829 = vrcp.f32 %v2541_v9  ;;  %v2720_v48 = vand.u32 2147483648, %v2541_v9 }
 0x485   :  { %2973 = vst [vmem:[#allocation1 + $0x4] ss:$9 sm:$0xff] %v6068_v51  ;;  %v2718_v23 = vand.u32 2147483647, %v2541_v9 }
 0x486   :  { %2975 = vst [vmem:[#allocation1 + $0x5] ss:$9 sm:$0xff] %v6070_v38  ;;  %v2721_v7 = vor.u32 1.1754944e-38, %v2720_v48 }
 0x487   :  { %2977 = vst [vmem:[#allocation1 + $0x6] ss:$9 sm:$0xff] %v6072_v28  ;;  %vm2719_vm14 = vcmp.eq.f32.partialorder %v2718_v23, 8.507059e+37  ;;  %v2844_v23 = vrot.slane %v6057_v57, 4 }
 0x489   :  { %v3828_v8 = vpop.eup %3827 }
 0x48a   :  { %v2540_v35 = vadd.f32 1.0, %v3828_v8  ;;  %v3830_v44 = vpop.eup %3829 }
 0x48b   :  { %v2710_v59 = vmul.f32 %v3830_v44, %v2541_v9  ;;  %vm2715_vm12 = vweird.f32 %v3830_v44 }
 0x48c   :  { %3831 = vrcp.f32 %v2540_v35  ;;  %vm2716_vm13 = vmor %vm2714_vm11, %vm2715_vm12  ;;  %v2705_v54 = vand.u32 2147483648, %v2540_v35  ;;  %vm2699_vm15 = vweird.f32 %v2540_v35  ;;  %v2703_v13 = vand.u32 2147483647, %v2540_v35 }
 0x48d   :  { %v2711_v5 = vsub.f32 1.0, %v2710_v59 }
 0x48e   :  { %v6079_v41 = vld [vmem:[#allocation1] sm:$0xff]  ;;  %v2706_v15 = vor.u32 1.1754944e-38, %v2705_v54  ;;  %vm2704_vm8 = vcmp.eq.f32.partialorder %v2703_v13, 8.507059e+37  ;;  %v2485_v54 = vpop.f32.mrf.mxu2 }
 0x48f   :  { %2979 = vst [vmem:[#allocation1] ss:$9 sm:$0xff] %v6034_v45  ;;  %v2712_v36 = vmul.f32 %v3830_v44, %v2711_v5 }
 0x490   :  { %2980 = vst [vmem:[#allocation1 + $0x1] ss:$9 sm:$0xff] %v6036_v58 }
 0x491   :  { %2981 = vst [vmem:[#allocation1 + $0x2] ss:$9 sm:$0xff] %v6038_v30  ;;  %v2713_v24 = vadd.f32 %v3830_v44, %v2712_v36 }
 0x492   :  { %2982 = vst [vmem:[#allocation1 + $0x3] ss:$9 sm:$0xff] %v6040_v33  ;;  %v3832_v10 = vpop.eup %3831 }
 0x493   :  { %2983 = vst [vmem:[#allocation1 + $0x4] ss:$9 sm:$0xff] %v6068_v51  ;;  %v2695_v53 = vmul.f32 %v3832_v10, %v2540_v35  ;;  %v2717_v0 = vsel %vm2716_vm13, %v3830_v44, %v2713_v24  ;;  %vm2700_vm7 = vweird.f32 %v3832_v10  ;;  %v2842_v24 = vrot.slane %v6054_v31, 3 }
 0x494   :  { %2984 = vst [vmem:[#allocation1 + $0x5] ss:$9 sm:$0xff] %v6070_v38  ;;  %v2722_v61 = vsel %vm2719_vm14, %v2721_v7, %v2717_v0  ;;  %vm2701_vm9 = vmor %vm2699_vm15, %vm2700_vm7  ;;  %v2846_v7 = vrot.slane %v6060_v56, 5  ;;  %v2486_v0 = vadd.f32 %v2485_v54, %v5897_v22 }
 0x495   :  { %2985 = vst [vmem:[#allocation1 + $0x6] ss:$9 sm:$0xff] %v6072_v28  ;;  %v2696_v52 = vsub.f32 1.0, %v2695_v53  ;;  %v2773_v21 = vrot.slane %v2722_v61, 7  ;;  %v2447_v61 = vpop.f32.mrf.mxu1 }
 0x496   :  { %v2448_v13 = vadd.f32 %v2447_v61, %v5901_v32 }
 0x497   :  { %v2697_v55 = vmul.f32 %v3832_v10, %v2696_v52 }
 0x499   :  { %v2698_v49 = vadd.f32 %v3832_v10, %v2697_v55  ;;  %v6157_v55 = vrot.slane %v2842_v24, 1 }
 0x49b   :  { %v2702_v42 = vsel %vm2701_vm9, %v3832_v10, %v2698_v49  ;;  %v3765_v49 = vmul.f32 -1.442695, %v2486_v0 }
 0x49c   :  { %v6088_v18 = vld [vmem:[#allocation1] sm:$0xff]  ;;  %v2707_v9 = vsel %vm2704_vm8, %v2706_v15, %v2702_v42  ;;  %v3764_v15 = vmul.f32 -1.442695, %v2448_v13 }
 0x49d   :  { %2987 = vst [vmem:[#allocation1] ss:$9 sm:$0xff] %v6034_v45  ;;  %v6098_v8 = vsel %vm2189_vm2, %v2707_v9, %v2773_v21  ;;  %v6101_v44 = vsel %vm2192_vm3, %v2707_v9, %v2773_v21  ;;  %v6104_v59 = vsel %vm2195_vm4, %v2707_v9, %v2773_v21  ;;  %v6107_v5 = vsel %vm2198_vm5, %v2707_v9, %v2773_v21 }
 0x49e   :  { %2988 = vst [vmem:[#allocation1 + $0x1] ss:$9 sm:$0xff] %v6036_v58  ;;  %v6110_v35 = vsel %vm2201_vm6, %v2707_v9, %v2773_v21  ;;  %v6113_v53 = vsel %vm1085_vm0, %v2773_v21, %v2707_v9  ;;  %v2851_v31 = vsel %vm2775_vm10, %v2707_v9, %v2773_v21  ;;  %3833 = vpow2.f32 %v3765_v49 }
 0x49f   :  { %2989 = vst [vmem:[#allocation1 + $0x2] ss:$9 sm:$0xff] %v6038_v30  ;;  %3835 = vpow2.f32 %v3764_v15 }
 0x4a0   :  { %2990 = vst [vmem:[#allocation1 + $0x3] ss:$9 sm:$0xff] %v6040_v33 }
 0x4a1   :  { %2991 = vst [vmem:[#allocation1 + $0x4] ss:$9 sm:$0xff] %v6068_v51 }
 0x4a2   :  { %2992 = vst [vmem:[#allocation1 + $0x5] ss:$9 sm:$0xff] %v6070_v38 }
 0x4a3   :  { %2993 = vst [vmem:[#allocation1 + $0x6] ss:$9 sm:$0xff] %v6072_v28 }
 0x4a4   :  { %v3834_v42 = vpop.eup %3833 }
 0x4a5   :  { %v2543_v22 = vadd.f32 1.0, %v3834_v42 }
 0x4a7   :  { %3837 = vrcp.f32 %v2543_v22  ;;  %v2750_v54 = vand.u32 2147483648, %v2543_v22  ;;  %vm2744_vm11 = vweird.f32 %v2543_v22  ;;  %v2748_v61 = vand.u32 2147483647, %v2543_v22 }
 0x4a9   :  { %v2751_v49 = vor.u32 1.1754944e-38, %v2750_v54  ;;  %vm2749_vm7 = vcmp.eq.f32.partialorder %v2748_v61, 8.507059e+37 }
 0x4aa   :  { %v6115_v10 = vld [vmem:[#allocation1] sm:$0xff] }
 0x4ab   :  { %2995 = vst [vmem:[#allocation1] ss:$9 sm:$0xff] %v6034_v45 }
 0x4ac   :  { %2996 = vst [vmem:[#allocation1 + $0x1] ss:$9 sm:$0xff] %v6036_v58 }
 0x4ad   :  { %2997 = vst [vmem:[#allocation1 + $0x2] ss:$9 sm:$0xff] %v6038_v30 }
 0x4ae   :  { %2998 = vst [vmem:[#allocation1 + $0x3] ss:$9 sm:$0xff] %v6040_v33 }
 0x4af   :  { %2999 = vst [vmem:[#allocation1 + $0x4] ss:$9 sm:$0xff] %v6068_v51 }
 0x4b0   :  { %3000 = vst [vmem:[#allocation1 + $0x5] ss:$9 sm:$0xff] %v6070_v38 }
 0x4b1   :  { %3001 = vst [vmem:[#allocation1 + $0x6] ss:$9 sm:$0xff] %v6072_v28 }
 0x4b8   :  { %v6124_v36 = vld [vmem:[#allocation1] sm:$0xff] }
 0x4b9   :  { %3003 = vst [vmem:[#allocation1] ss:$9 sm:$0xff] %v6034_v45 }
 0x4ba   :  { %3004 = vst [vmem:[#allocation1 + $0x1] ss:$9 sm:$0xff] %v6036_v58 }
 0x4bb   :  { %3005 = vst [vmem:[#allocation1 + $0x2] ss:$9 sm:$0xff] %v6038_v30 }
 0x4bc   :  { %3006 = vst [vmem:[#allocation1 + $0x3] ss:$9 sm:$0xff] %v6040_v33 }
 0x4bd   :  { %3007 = vst [vmem:[#allocation1 + $0x4] ss:$9 sm:$0xff] %v6068_v51 }
 0x4be   :  { %3008 = vst [vmem:[#allocation1 + $0x5] ss:$9 sm:$0xff] %v6070_v38 }
 0x4bf   :  { %3009 = vst [vmem:[#allocation1 + $0x6] ss:$9 sm:$0xff] %v6072_v28 }
 0x4c6   :  { %v6133_v52 = vld [vmem:[#allocation1] sm:$0xff] }
 0x4c7   :  { %3011 = vst [vmem:[#allocation1] ss:$9 sm:$0xff] %v6034_v45 }
 0x4c8   :  { %3012 = vst [vmem:[#allocation1 + $0x1] ss:$9 sm:$0xff] %v6036_v58 }
 0x4c9   :  { %3013 = vst [vmem:[#allocation1 + $0x2] ss:$9 sm:$0xff] %v6038_v30 }
 0x4ca   :  { %3014 = vst [vmem:[#allocation1 + $0x3] ss:$9 sm:$0xff] %v6040_v33 }
 0x4cb   :  { %3015 = vst [vmem:[#allocation1 + $0x4] ss:$9 sm:$0xff] %v6068_v51 }
 0x4cc   :  { %3016 = vst [vmem:[#allocation1 + $0x5] ss:$9 sm:$0xff] %v6070_v38 }
 0x4cd   :  { %3017 = vst [vmem:[#allocation1 + $0x6] ss:$9 sm:$0xff] %v6072_v28 }
 0x4d4   :  { %v6142_v48 = vld [vmem:[#allocation1] sm:$0xff] }
 0x4d5   :  { %3019 = vst [vmem:[#allocation1] ss:$9 sm:$0xff] %v6034_v45  ;;  %v2848_v45 = vrot.slane %v6063_v6, 6 }
 0x4d6   :  { %3020 = vst [vmem:[#allocation1 + $0x1] ss:$9 sm:$0xff] %v6036_v58  ;;  %v2852_v58 = vsel %vm2186_vm1, %v2707_v9, %v2773_v21  ;;  %v3836_v9 = vpop.eup %3835 }
 0x4d7   :  { %3021 = vst [vmem:[#allocation1 + $0x2] ss:$9 sm:$0xff] %v6038_v30  ;;  %v2850_v30 = vrot.slane %v6066_v62, 7  ;;  %v2853_v57 = vrot.slane %v2852_v58, 1  ;;  %v6167_v56 = vrot.slane %v2848_v45, 1  ;;  %v6174_v62 = vrot.slane %v2851_v31, 1  ;;  %v3838_v24 = vpop.eup %3837 }
 0x4d8   :  { %3022 = vst [vmem:[#allocation1 + $0x3] ss:$9 sm:$0xff] %v6040_v33  ;;  %v6159_v33 = vrot.slane %v2844_v23, 1  ;;  %v2542_v32 = vadd.f32 1.0, %v3836_v9  ;;  %vm2745_vm12 = vweird.f32 %v3838_v24 }
 0x4d9   :  { %3023 = vst [vmem:[#allocation1 + $0x4] ss:$9 sm:$0xff] %v6068_v51  ;;  %v6170_v6 = vrot.slane %v2850_v30, 1  ;;  %vm2746_vm13 = vmor %vm2744_vm11, %vm2745_vm12 }
 0x4da   :  { %3024 = vst [vmem:[#allocation1 + $0x5] ss:$9 sm:$0xff] %v6070_v38  ;;  %v6163_v38 = vrot.slane %v2846_v7, 1  ;;  %3839 = vrcp.f32 %v2542_v32  ;;  %v2740_v7 = vmul.f32 %v3838_v24, %v2543_v22  ;;  %vm2729_vm14 = vweird.f32 %v2542_v32 }
 0x4db   :  { %3025 = vst [vmem:[#allocation1 + $0x6] ss:$9 sm:$0xff] %v6072_v28  ;;  %v6177_v28 = vrot.slane %v2853_v57, 1  ;;  %v2733_v15 = vand.u32 2147483647, %v2542_v32  ;;  %v2735_v42 = vand.u32 2147483648, %v2542_v32 }
 0x4dc   :  { %v2741_v58 = vsub.f32 1.0, %v2740_v7 }
 0x4dd   :  { %vm2734_vm8 = vcmp.eq.f32.partialorder %v2733_v15, 8.507059e+37  ;;  %v2857_v15 = vrot.slane %v6101_v44, 3 }
 0x4de   :  { %v2742_v31 = vmul.f32 %v3838_v24, %v2741_v58 }
 0x4e0   :  { %v3840_v45 = vpop.eup %3839  ;;  %v2743_v0 = vadd.f32 %v3838_v24, %v2742_v31 }
 0x4e1   :  { %v2725_v30 = vmul.f32 %v3840_v45, %v2542_v32  ;;  %vm2730_vm15 = vweird.f32 %v3840_v45 }
 0x4e2   :  { %v6161_v51 = vld [vmem:[#allocation1] sm:$0xff]  ;;  %v2747_v9 = vsel %vm2746_vm13, %v3838_v24, %v2743_v0  ;;  %vm2731_vm9 = vmor %vm2729_vm14, %vm2730_vm15 }
 0x4e3   :  { %3027 = vst [vmem:[#allocation1] ss:$9 sm:$0xff] %v6157_v55  ;;  %v2726_v57 = vsub.f32 1.0, %v2725_v30  ;;  %v2752_v58 = vsel %vm2749_vm7, %v2751_v49, %v2747_v9  ;;  %v2736_v30 = vor.u32 1.1754944e-38, %v2735_v42  ;;  %v2859_v42 = vrot.slane %v6104_v59, 4 }
 0x4e4   :  { %3028 = vst [vmem:[#allocation1 + $0x1] ss:$9 sm:$0xff] %v6159_v33  ;;  %v2774_v16 = vrot.slane %v2752_v58, 7 }
 0x4e5   :  { %3029 = vst [vmem:[#allocation1 + $0x2] ss:$9 sm:$0xff] %v6163_v38  ;;  %v2727_v13 = vmul.f32 %v3840_v45, %v2726_v57 }
 0x4e6   :  { %3030 = vst [vmem:[#allocation1 + $0x3] ss:$9 sm:$0xff] %v6167_v56 }
 0x4e7   :  { %3031 = vst [vmem:[#allocation1 + $0x4] ss:$9 sm:$0xff] %v6170_v6  ;;  %v2728_v7 = vadd.f32 %v3840_v45, %v2727_v13  ;;  %v2855_v13 = vrot.slane %v6098_v8, 2 }
 0x4e8   :  { %3032 = vst [vmem:[#allocation1 + $0x5] ss:$9 sm:$0xff] %v6174_v62 }
 0x4e9   :  { %3033 = vst [vmem:[#allocation1 + $0x6] ss:$9 sm:$0xff] %v6177_v28  ;;  %v2732_v29 = vsel %vm2731_vm9, %v3840_v45, %v2728_v7  ;;  %v2895_v9 = vrot.slane %v2855_v13, 1 }
 0x4ea   :  { %v2737_v31 = vsel %vm2734_vm8, %v2736_v30, %v2732_v29 }
 0x4eb   :  { %v6204_v22 = vsel %vm2186_vm1, %v2737_v31, %v2774_v16  ;;  %v6207_v57 = vsel %vm2189_vm2, %v2737_v31, %v2774_v16  ;;  %v6210_v32 = vsel %vm2192_vm3, %v2737_v31, %v2774_v16  ;;  %v6215_v24 = vsel %vm2195_vm4, %v2737_v31, %v2774_v16 }
 0x4ec   :  { %v6218_v29 = vsel %vm2198_vm5, %v2737_v31, %v2774_v16  ;;  %v6221_v45 = vsel %vm2201_vm6, %v2737_v31, %v2774_v16  ;;  %v6224_v54 = vsel %vm1085_vm0, %v2774_v16, %v2737_v31  ;;  %v2866_v8 = vsel %vm2775_vm10, %v2737_v31, %v2774_v16 }
 0x4ed   :  { %v2901_v59 = vrot.slane %v2866_v8, 1  ;;  %v2868_v31 = vrot.slane %v6204_v22, 1  ;;  %v2870_v13 = vrot.slane %v6207_v57, 2 }
 0x4f0   :  { %v6183_v21 = vld [vmem:[#allocation1] sm:$0xff] }
 0x4f1   :  { %3035 = vst [vmem:[#allocation1] ss:$9 sm:$0xff] %v6157_v55 }
 0x4f2   :  { %3036 = vst [vmem:[#allocation1 + $0x1] ss:$9 sm:$0xff] %v6159_v33 }
 0x4f3   :  { %3037 = vst [vmem:[#allocation1 + $0x2] ss:$9 sm:$0xff] %v6163_v38 }
 0x4f4   :  { %3038 = vst [vmem:[#allocation1 + $0x3] ss:$9 sm:$0xff] %v6167_v56 }
 0x4f5   :  { %3039 = vst [vmem:[#allocation1 + $0x4] ss:$9 sm:$0xff] %v6170_v6 }
 0x4f6   :  { %3040 = vst [vmem:[#allocation1 + $0x5] ss:$9 sm:$0xff] %v6174_v62 }
 0x4f7   :  { %3041 = vst [vmem:[#allocation1 + $0x6] ss:$9 sm:$0xff] %v6177_v28 }
 0x4fe   :  { %v6192_v23 = vld [vmem:[#allocation1] sm:$0xff] }
 0x4ff   :  { %3043 = vst [vmem:[#allocation1] ss:$9 sm:$0xff] %v6157_v55 }
 0x500   :  { %3044 = vst [vmem:[#allocation1 + $0x1] ss:$9 sm:$0xff] %v6159_v33 }
 0x501   :  { %3045 = vst [vmem:[#allocation1 + $0x2] ss:$9 sm:$0xff] %v6163_v38 }
 0x502   :  { %3046 = vst [vmem:[#allocation1 + $0x3] ss:$9 sm:$0xff] %v6167_v56 }
 0x503   :  { %3047 = vst [vmem:[#allocation1 + $0x4] ss:$9 sm:$0xff] %v6170_v6 }
 0x504   :  { %3048 = vst [vmem:[#allocation1 + $0x5] ss:$9 sm:$0xff] %v6174_v62 }
 0x505   :  { %3049 = vst [vmem:[#allocation1 + $0x6] ss:$9 sm:$0xff] %v6177_v28 }
 0x50c   :  { %v6201_v50 = vld [vmem:[#allocation1] sm:$0xff] }
 0x50d   :  { %3051 = vst [vmem:[#allocation1] ss:$9 sm:$0xff] %v6157_v55 }
 0x50e   :  { %3052 = vst [vmem:[#allocation1 + $0x1] ss:$9 sm:$0xff] %v6159_v33 }
 0x50f   :  { %3053 = vst [vmem:[#allocation1 + $0x2] ss:$9 sm:$0xff] %v6163_v38 }
 0x510   :  { %3054 = vst [vmem:[#allocation1 + $0x3] ss:$9 sm:$0xff] %v6167_v56 }
 0x511   :  { %3055 = vst [vmem:[#allocation1 + $0x4] ss:$9 sm:$0xff] %v6170_v6 }
 0x512   :  { %3056 = vst [vmem:[#allocation1 + $0x5] ss:$9 sm:$0xff] %v6174_v62 }
 0x513   :  { %3057 = vst [vmem:[#allocation1 + $0x6] ss:$9 sm:$0xff] %v6177_v28 }
 0x51a   :  { %v6231_v0 = vld [vmem:[#allocation1] sm:$0xff] }
 0x51b   :  { %3059 = vst [vmem:[#allocation1] ss:$9 sm:$0xff] %v6157_v55 }
 0x51c   :  { %3060 = vst [vmem:[#allocation1 + $0x1] ss:$9 sm:$0xff] %v6159_v33 }
 0x51d   :  { %3061 = vst [vmem:[#allocation1 + $0x2] ss:$9 sm:$0xff] %v6163_v38 }
 0x51e   :  { %3062 = vst [vmem:[#allocation1 + $0x3] ss:$9 sm:$0xff] %v6167_v56 }
 0x51f   :  { %3063 = vst [vmem:[#allocation1 + $0x4] ss:$9 sm:$0xff] %v6170_v6 }
 0x520   :  { %3064 = vst [vmem:[#allocation1 + $0x5] ss:$9 sm:$0xff] %v6174_v62 }
 0x521   :  { %3065 = vst [vmem:[#allocation1 + $0x6] ss:$9 sm:$0xff] %v6177_v28 }
 0x528   :  { %v6240_v61 = vld [vmem:[#allocation1] sm:$0xff] }
 0x529   :  { %3067 = vst [vmem:[#allocation1] ss:$9 sm:$0xff] %v6157_v55 }
 0x52a   :  { %3068 = vst [vmem:[#allocation1 + $0x1] ss:$9 sm:$0xff] %v6159_v33 }
 0x52b   :  { %3069 = vst [vmem:[#allocation1 + $0x2] ss:$9 sm:$0xff] %v6163_v38 }
 0x52c   :  { %3070 = vst [vmem:[#allocation1 + $0x3] ss:$9 sm:$0xff] %v6167_v56 }
 0x52d   :  { %3071 = vst [vmem:[#allocation1 + $0x4] ss:$9 sm:$0xff] %v6170_v6 }
 0x52e   :  { %3072 = vst [vmem:[#allocation1 + $0x5] ss:$9 sm:$0xff] %v6174_v62 }
 0x52f   :  { %3073 = vst [vmem:[#allocation1 + $0x6] ss:$9 sm:$0xff] %v6177_v28 }
 0x536   :  { %v6249_v49 = vld [vmem:[#allocation1] sm:$0xff] }
 0x537   :  { %3075 = vst [vmem:[#allocation1] ss:$9 sm:$0xff] %v6157_v55  ;;  %v2861_v55 = vrot.slane %v6107_v5, 5 }
 0x538   :  { %3076 = vst [vmem:[#allocation1 + $0x1] ss:$9 sm:$0xff] %v6159_v33  ;;  %v2863_v33 = vrot.slane %v6110_v35, 6 }
 0x539   :  { %3077 = vst [vmem:[#allocation1 + $0x2] ss:$9 sm:$0xff] %v6163_v38  ;;  %v2865_v38 = vrot.slane %v6113_v53, 7 }
 0x53a   :  { %3078 = vst [vmem:[#allocation1 + $0x3] ss:$9 sm:$0xff] %v6167_v56  ;;  %v2896_v56 = vrot.slane %v2857_v15, 1  ;;  %v2872_v15 = vrot.slane %v6210_v32, 3 }
 0x53b   :  { %3079 = vst [vmem:[#allocation1 + $0x4] ss:$9 sm:$0xff] %v6170_v6  ;;  %v2897_v6 = vrot.slane %v2859_v42, 1  ;;  %v2900_v44 = vrot.slane %v2865_v38, 1  ;;  %v2874_v42 = vrot.slane %v6215_v24, 4  ;;  %v2878_v38 = vrot.slane %v6221_v45, 6 }
 0x53c   :  { %3080 = vst [vmem:[#allocation1 + $0x5] ss:$9 sm:$0xff] %v6174_v62  ;;  %v2898_v62 = vrot.slane %v2861_v55, 1  ;;  %v2876_v55 = vrot.slane %v6218_v29, 5 }
 0x53d   :  { %3081 = vst [vmem:[#allocation1 + $0x6] ss:$9 sm:$0xff] %v6177_v28  ;;  %v2899_v28 = vrot.slane %v2863_v33, 1  ;;  %v2902_v33 = vrot.slane %v2868_v31, 1  ;;  %v2905_v8 = vrot.slane %v2874_v42, 1  ;;  %v2907_v57 = vrot.slane %v2878_v38, 1 }
 0x53e   :  { %v2906_v22 = vrot.slane %v2876_v55, 1 }
 0x544   :  { %v6264_v7 = vld [vmem:[#allocation1] sm:$0xff] }
 0x545   :  { %3083 = vst [vmem:[#allocation1] ss:$9 sm:$0xff] %v2895_v9 }
 0x546   :  { %3084 = vst [vmem:[#allocation1 + $0x1] ss:$9 sm:$0xff] %v2896_v56 }
 0x547   :  { %3085 = vst [vmem:[#allocation1 + $0x2] ss:$9 sm:$0xff] %v2897_v6 }
 0x548   :  { %3086 = vst [vmem:[#allocation1 + $0x3] ss:$9 sm:$0xff] %v2898_v62 }
 0x549   :  { %3087 = vst [vmem:[#allocation1 + $0x4] ss:$9 sm:$0xff] %v2899_v28 }
 0x54a   :  { %3088 = vst [vmem:[#allocation1 + $0x5] ss:$9 sm:$0xff] %v2900_v44 }
 0x54b   :  { %3089 = vst [vmem:[#allocation1 + $0x6] ss:$9 sm:$0xff] %v2901_v59 }
 0x552   :  { %v6267_v5 = vld [vmem:[#allocation1] sm:$0xff] }
 0x553   :  { %3091 = vst [vmem:[#allocation1] ss:$9 sm:$0xff] %v2895_v9 }
 0x554   :  { %3092 = vst [vmem:[#allocation1 + $0x1] ss:$9 sm:$0xff] %v2896_v56 }
 0x555   :  { %3093 = vst [vmem:[#allocation1 + $0x2] ss:$9 sm:$0xff] %v2897_v6 }
 0x556   :  { %3094 = vst [vmem:[#allocation1 + $0x3] ss:$9 sm:$0xff] %v2898_v62 }
 0x557   :  { %3095 = vst [vmem:[#allocation1 + $0x4] ss:$9 sm:$0xff] %v2899_v28 }
 0x558   :  { %3096 = vst [vmem:[#allocation1 + $0x5] ss:$9 sm:$0xff] %v2900_v44 }
 0x559   :  { %3097 = vst [vmem:[#allocation1 + $0x6] ss:$9 sm:$0xff] %v2901_v59 }
 0x560   :  { %v6269_v35 = vld [vmem:[#allocation1] sm:$0xff] }
 0x561   :  { %3099 = vst [vmem:[#allocation1] ss:$9 sm:$0xff] %v2895_v9 }
 0x562   :  { %3100 = vst [vmem:[#allocation1 + $0x1] ss:$9 sm:$0xff] %v2896_v56 }
 0x563   :  { %3101 = vst [vmem:[#allocation1 + $0x2] ss:$9 sm:$0xff] %v2897_v6 }
 0x564   :  { %3102 = vst [vmem:[#allocation1 + $0x3] ss:$9 sm:$0xff] %v2898_v62 }
 0x565   :  { %3103 = vst [vmem:[#allocation1 + $0x4] ss:$9 sm:$0xff] %v2899_v28 }
 0x566   :  { %3104 = vst [vmem:[#allocation1 + $0x5] ss:$9 sm:$0xff] %v2900_v44 }
 0x567   :  { %3105 = vst [vmem:[#allocation1 + $0x6] ss:$9 sm:$0xff] %v2901_v59 }
 0x56e   :  { %v6271_v16 = vld [vmem:[#allocation1] sm:$0xff] }
 0x56f   :  { %3107 = vst [vmem:[#allocation1] ss:$9 sm:$0xff] %v2895_v9 }
 0x570   :  { %3108 = vst [vmem:[#allocation1 + $0x1] ss:$9 sm:$0xff] %v2896_v56 }
 0x571   :  { %3109 = vst [vmem:[#allocation1 + $0x2] ss:$9 sm:$0xff] %v2897_v6 }
 0x572   :  { %3110 = vst [vmem:[#allocation1 + $0x3] ss:$9 sm:$0xff] %v2898_v62 }
 0x573   :  { %3111 = vst [vmem:[#allocation1 + $0x4] ss:$9 sm:$0xff] %v2899_v28 }
 0x574   :  { %3112 = vst [vmem:[#allocation1 + $0x5] ss:$9 sm:$0xff] %v2900_v44 }
 0x575   :  { %3113 = vst [vmem:[#allocation1 + $0x6] ss:$9 sm:$0xff] %v2901_v59 }
 0x57c   :  { %v6273_v53 = vld [vmem:[#allocation1] sm:$0xff] }
 0x57d   :  { %3115 = vst [vmem:[#allocation1] ss:$9 sm:$0xff] %v2895_v9 }
 0x57e   :  { %3116 = vst [vmem:[#allocation1 + $0x1] ss:$9 sm:$0xff] %v2896_v56 }
 0x57f   :  { %3117 = vst [vmem:[#allocation1 + $0x2] ss:$9 sm:$0xff] %v2897_v6 }
 0x580   :  { %3118 = vst [vmem:[#allocation1 + $0x3] ss:$9 sm:$0xff] %v2898_v62 }
 0x581   :  { %3119 = vst [vmem:[#allocation1 + $0x4] ss:$9 sm:$0xff] %v2899_v28 }
 0x582   :  { %3120 = vst [vmem:[#allocation1 + $0x5] ss:$9 sm:$0xff] %v2900_v44 }
 0x583   :  { %3121 = vst [vmem:[#allocation1 + $0x6] ss:$9 sm:$0xff] %v2901_v59 }
 0x58a   :  { %v6275_v58 = vld [vmem:[#allocation1] sm:$0xff] }
 0x58b   :  { %3123 = vst [vmem:[#allocation1] ss:$9 sm:$0xff] %v2895_v9 }
 0x58c   :  { %3124 = vst [vmem:[#allocation1 + $0x1] ss:$9 sm:$0xff] %v2896_v56 }
 0x58d   :  { %3125 = vst [vmem:[#allocation1 + $0x2] ss:$9 sm:$0xff] %v2897_v6 }
 0x58e   :  { %3126 = vst [vmem:[#allocation1 + $0x3] ss:$9 sm:$0xff] %v2898_v62 }
 0x58f   :  { %3127 = vst [vmem:[#allocation1 + $0x4] ss:$9 sm:$0xff] %v2899_v28 }
 0x590   :  { %3128 = vst [vmem:[#allocation1 + $0x5] ss:$9 sm:$0xff] %v2900_v44 }
 0x591   :  { %3129 = vst [vmem:[#allocation1 + $0x6] ss:$9 sm:$0xff] %v2901_v59 }
 0x598   :  { %v6277_v30 = vld [vmem:[#allocation1] sm:$0xff] }
 0x599   :  { %3131 = vst [vmem:[#allocation1] ss:$9 sm:$0xff] %v2895_v9  ;;  %v2903_v9 = vrot.slane %v2870_v13, 1  ;;  %v2778_v13 = vrot.slane %v5933_v2, 1  ;;  %v2780_v2 = vrot.slane %v5936_v63, 2  ;;  %v2782_v63 = vrot.slane %v5939_v39, 3 }
 0x59a   :  { %3132 = vst [vmem:[#allocation1 + $0x1] ss:$9 sm:$0xff] %v2896_v56  ;;  %v2784_v39 = vrot.slane %v5942_v20, 4 }
 0x59b   :  { %3133 = vst [vmem:[#allocation1 + $0x2] ss:$9 sm:$0xff] %v2897_v6  ;;  %v2880_v6 = vrot.slane %v6224_v54, 7 }
 0x59c   :  { %3134 = vst [vmem:[#allocation1 + $0x3] ss:$9 sm:$0xff] %v2898_v62  ;;  %v2904_v62 = vrot.slane %v2872_v15, 1 }
 0x59d   :  { %3135 = vst [vmem:[#allocation1 + $0x4] ss:$9 sm:$0xff] %v2899_v28  ;;  %v2908_v32 = vrot.slane %v2880_v6, 1 }
 0x59e   :  { %3136 = vst [vmem:[#allocation1 + $0x5] ss:$9 sm:$0xff] %v2900_v44 }
 0x59f   :  { %3137 = vst [vmem:[#allocation1 + $0x6] ss:$9 sm:$0xff] %v2901_v59  ;;  %v2909_v59 = vperm.slane %v5930_v43, 0 }
 0x5a1   :  { %v3223_v31 = vmul.f32 %v6079_v41, %v2909_v59 }
 0x5a3   :  { %v3279_v42 = vrot.slane %v3223_v31, 1  ;;  %v3280_v55 = vrot.slane %v3223_v31, 2  ;;  %v3281_v38 = vrot.slane %v3223_v31, 3  ;;  %v3283_v6 = vrot.slane %v3223_v31, 5 }
 0x5a6   :  { %v6285_v56 = vld [vmem:[#allocation1] sm:$0xff] }
 0x5a7   :  { %3139 = vst [vmem:[#allocation1] ss:$9 sm:$0xff] %v2902_v33 }
 0x5a8   :  { %3140 = vst [vmem:[#allocation1 + $0x1] ss:$9 sm:$0xff] %v2903_v9 }
 0x5a9   :  { %3141 = vst [vmem:[#allocation1 + $0x2] ss:$9 sm:$0xff] %v2904_v62 }
 0x5aa   :  { %3142 = vst [vmem:[#allocation1 + $0x3] ss:$9 sm:$0xff] %v2905_v8 }
 0x5ab   :  { %3143 = vst [vmem:[#allocation1 + $0x4] ss:$9 sm:$0xff] %v2906_v22 }
 0x5ac   :  { %3144 = vst [vmem:[#allocation1 + $0x5] ss:$9 sm:$0xff] %v2907_v57 }
 0x5ad   :  { %3145 = vst [vmem:[#allocation1 + $0x6] ss:$9 sm:$0xff] %v2908_v32 }
 0x5b4   :  { %v6288_v24 = vld [vmem:[#allocation1] sm:$0xff] }
 0x5b5   :  { %3147 = vst [vmem:[#allocation1] ss:$9 sm:$0xff] %v2902_v33 }
 0x5b6   :  { %3148 = vst [vmem:[#allocation1 + $0x1] ss:$9 sm:$0xff] %v2903_v9 }
 0x5b7   :  { %3149 = vst [vmem:[#allocation1 + $0x2] ss:$9 sm:$0xff] %v2904_v62 }
 0x5b8   :  { %3150 = vst [vmem:[#allocation1 + $0x3] ss:$9 sm:$0xff] %v2905_v8 }
 0x5b9   :  { %3151 = vst [vmem:[#allocation1 + $0x4] ss:$9 sm:$0xff] %v2906_v22 }
 0x5ba   :  { %3152 = vst [vmem:[#allocation1 + $0x5] ss:$9 sm:$0xff] %v2907_v57 }
 0x5bb   :  { %3153 = vst [vmem:[#allocation1 + $0x6] ss:$9 sm:$0xff] %v2908_v32 }
 0x5c2   :  { %v6290_v29 = vld [vmem:[#allocation1] sm:$0xff] }
 0x5c3   :  { %3155 = vst [vmem:[#allocation1] ss:$9 sm:$0xff] %v2902_v33 }
 0x5c4   :  { %3156 = vst [vmem:[#allocation1 + $0x1] ss:$9 sm:$0xff] %v2903_v9 }
 0x5c5   :  { %3157 = vst [vmem:[#allocation1 + $0x2] ss:$9 sm:$0xff] %v2904_v62 }
 0x5c6   :  { %3158 = vst [vmem:[#allocation1 + $0x3] ss:$9 sm:$0xff] %v2905_v8 }
 0x5c7   :  { %3159 = vst [vmem:[#allocation1 + $0x4] ss:$9 sm:$0xff] %v2906_v22 }
 0x5c8   :  { %3160 = vst [vmem:[#allocation1 + $0x5] ss:$9 sm:$0xff] %v2907_v57 }
 0x5c9   :  { %3161 = vst [vmem:[#allocation1 + $0x6] ss:$9 sm:$0xff] %v2908_v32 }
 0x5d0   :  { %v6292_v45 = vld [vmem:[#allocation1] sm:$0xff] }
 0x5d1   :  { %3163 = vst [vmem:[#allocation1] ss:$9 sm:$0xff] %v2902_v33 }
 0x5d2   :  { %3164 = vst [vmem:[#allocation1 + $0x1] ss:$9 sm:$0xff] %v2903_v9 }
 0x5d3   :  { %3165 = vst [vmem:[#allocation1 + $0x2] ss:$9 sm:$0xff] %v2904_v62 }
 0x5d4   :  { %3166 = vst [vmem:[#allocation1 + $0x3] ss:$9 sm:$0xff] %v2905_v8 }
 0x5d5   :  { %3167 = vst [vmem:[#allocation1 + $0x4] ss:$9 sm:$0xff] %v2906_v22 }
 0x5d6   :  { %3168 = vst [vmem:[#allocation1 + $0x5] ss:$9 sm:$0xff] %v2907_v57 }
 0x5d7   :  { %3169 = vst [vmem:[#allocation1 + $0x6] ss:$9 sm:$0xff] %v2908_v32 }
 0x5de   :  { %v6294_v54 = vld [vmem:[#allocation1] sm:$0xff] }
 0x5df   :  { %3171 = vst [vmem:[#allocation1] ss:$9 sm:$0xff] %v2902_v33 }
 0x5e0   :  { %3172 = vst [vmem:[#allocation1 + $0x1] ss:$9 sm:$0xff] %v2903_v9 }
 0x5e1   :  { %3173 = vst [vmem:[#allocation1 + $0x2] ss:$9 sm:$0xff] %v2904_v62 }
 0x5e2   :  { %3174 = vst [vmem:[#allocation1 + $0x3] ss:$9 sm:$0xff] %v2905_v8 }
 0x5e3   :  { %3175 = vst [vmem:[#allocation1 + $0x4] ss:$9 sm:$0xff] %v2906_v22 }
 0x5e4   :  { %3176 = vst [vmem:[#allocation1 + $0x5] ss:$9 sm:$0xff] %v2907_v57 }
 0x5e5   :  { %3177 = vst [vmem:[#allocation1 + $0x6] ss:$9 sm:$0xff] %v2908_v32 }
 0x5ec   :  { %v6296_v28 = vld [vmem:[#allocation1] sm:$0xff] }
 0x5ed   :  { %3179 = vst [vmem:[#allocation1] ss:$9 sm:$0xff] %v2902_v33 }
 0x5ee   :  { %3180 = vst [vmem:[#allocation1 + $0x1] ss:$9 sm:$0xff] %v2903_v9 }
 0x5ef   :  { %3181 = vst [vmem:[#allocation1 + $0x2] ss:$9 sm:$0xff] %v2904_v62 }
 0x5f0   :  { %3182 = vst [vmem:[#allocation1 + $0x3] ss:$9 sm:$0xff] %v2905_v8 }
 0x5f1   :  { %3183 = vst [vmem:[#allocation1 + $0x4] ss:$9 sm:$0xff] %v2906_v22 }
 0x5f2   :  { %3184 = vst [vmem:[#allocation1 + $0x5] ss:$9 sm:$0xff] %v2907_v57 }
 0x5f3   :  { %3185 = vst [vmem:[#allocation1 + $0x6] ss:$9 sm:$0xff] %v2908_v32 }
 0x5fa   :  { %v6298_v44 = vld [vmem:[#allocation1] sm:$0xff] }
 0x5fb   :  { %3187 = vst [vmem:[#allocation1] ss:$9 sm:$0xff] %v2902_v33  ;;  %v3282_v33 = vrot.slane %v3223_v31, 4 }
 0x5fc   :  { %3188 = vst [vmem:[#allocation1 + $0x1] ss:$9 sm:$0xff] %v2903_v9  ;;  %v2910_v9 = vperm.slane %v2778_v13, 0 }
 0x5fd   :  { %3189 = vst [vmem:[#allocation1 + $0x2] ss:$9 sm:$0xff] %v2904_v62  ;;  %v3284_v62 = vrot.slane %v3223_v31, 6 }
 0x5fe   :  { %3190 = vst [vmem:[#allocation1 + $0x3] ss:$9 sm:$0xff] %v2905_v8  ;;  %v3224_v43 = vmul.f32 %v6088_v18, %v2910_v9  ;;  %v2911_v8 = vperm.slane %v2780_v2, 0 }
 0x5ff   :  { %3191 = vst [vmem:[#allocation1 + $0x4] ss:$9 sm:$0xff] %v2906_v22 }
 0x600   :  { %3192 = vst [vmem:[#allocation1 + $0x5] ss:$9 sm:$0xff] %v2907_v57  ;;  %v3285_v41 = vrot.slane %v3224_v43, 1  ;;  %v3286_v22 = vrot.slane %v3224_v43, 2  ;;  %v3225_v59 = vmul.f32 %v6115_v10, %v2911_v8  ;;  %v3288_v13 = vrot.slane %v3224_v43, 4 }
 0x601   :  { %3193 = vst [vmem:[#allocation1 + $0x6] ss:$9 sm:$0xff] %v2908_v32  ;;  %v3287_v32 = vrot.slane %v3224_v43, 3 }
 0x602   :  { %v3291_v18 = vrot.slane %v3225_v59, 1  ;;  %v3293_v10 = vrot.slane %v3225_v59, 3 }
 0x608   :  { %v6303_v15 = vld [vmem:[#allocation1] sm:$0xff] }
 0x609   :  { %3447 = vst [vmem:[#allocation1] ss:$9 sm:$0xff] %v3223_v31  ;;  %v3290_v31 = vrot.slane %v3224_v43, 6 }
 0x60a   :  { %3449 = vst [vmem:[#allocation1 + $0x1] ss:$9 sm:$0xff] %v3279_v42  ;;  %v3289_v42 = vrot.slane %v3224_v43, 5 }
 0x60b   :  { %3451 = vst [vmem:[#allocation1 + $0x2] ss:$9 sm:$0xff] %v3280_v55  ;;  %v2912_v55 = vperm.slane %v2782_v63, 0 }
 0x60c   :  { %3453 = vst [vmem:[#allocation1 + $0x3] ss:$9 sm:$0xff] %v3281_v38  ;;  %v3292_v38 = vrot.slane %v3225_v59, 2 }
 0x60d   :  { %3455 = vst [vmem:[#allocation1 + $0x4] ss:$9 sm:$0xff] %v3282_v33  ;;  %v3226_v9 = vmul.f32 %v6124_v36, %v2912_v55  ;;  %v2913_v36 = vperm.slane %v2784_v39, 0 }
 0x60e   :  { %3457 = vst [vmem:[#allocation1 + $0x5] ss:$9 sm:$0xff] %v3283_v6  ;;  %v3294_v6 = vrot.slane %v3225_v59, 4 }
 0x60f   :  { %3459 = vst [vmem:[#allocation1 + $0x6] ss:$9 sm:$0xff] %v3284_v62  ;;  %v3295_v62 = vrot.slane %v3225_v59, 5  ;;  %v3297_v2 = vrot.slane %v3226_v9, 1  ;;  %v3299_v8 = vrot.slane %v3226_v9, 3 }
 0x610   :  { %3461 = vst [vmem:[#allocation1 + $0x7] ss:$9 sm:$0xff] %v3224_v43  ;;  %v3296_v43 = vrot.slane %v3225_v59, 6 }
 0x617   :  { %v3462_v57 = vld [vmem:[#allocation1] sm:$0xff] }
 0x618   :  { %3463 = vst [vmem:[#allocation1] ss:$9 sm:$0xff] %v3285_v41  ;;  %v3298_v41 = vrot.slane %v3226_v9, 2 }
 0x619   :  { %3464 = vst [vmem:[#allocation1 + $0x1] ss:$9 sm:$0xff] %v3286_v22  ;;  %v3227_v22 = vmul.f32 %v6133_v52, %v2913_v36 }
 0x61a   :  { %3465 = vst [vmem:[#allocation1 + $0x2] ss:$9 sm:$0xff] %v3287_v32 }
 0x61b   :  { %3466 = vst [vmem:[#allocation1 + $0x3] ss:$9 sm:$0xff] %v3288_v13  ;;  %v3302_v13 = vrot.slane %v3226_v9, 6  ;;  %v3305_v20 = vrot.slane %v3227_v22, 3  ;;  %v3306_v55 = vrot.slane %v3227_v22, 4 }
 0x61c   :  { %3467 = vst [vmem:[#allocation1 + $0x4] ss:$9 sm:$0xff] %v3289_v42  ;;  %v3303_v42 = vrot.slane %v3227_v22, 1 }
 0x61d   :  { %3468 = vst [vmem:[#allocation1 + $0x5] ss:$9 sm:$0xff] %v3290_v31  ;;  %v3304_v31 = vrot.slane %v3227_v22, 2 }
 0x61e   :  { %3469 = vst [vmem:[#allocation1 + $0x6] ss:$9 sm:$0xff] %v3225_v59  ;;  %v3301_v59 = vrot.slane %v3226_v9, 5 }
 0x61f   :  { %3470 = vst [vmem:[#allocation1 + $0x7] ss:$9 sm:$0xff] %v3291_v18  ;;  %v2786_v18 = vrot.slane %v5945_v19, 5 }
 0x620   :  { %3706 = vst [vmem:[%s6461_s9] sm:$0xff] %v3462_v57  ;;  %v3300_v57 = vrot.slane %v3226_v9, 4 }
 0x621   :  { %v2914_v52 = vperm.slane %v2786_v18, 0 }
 0x623   :  { %v3228_v63 = vmul.f32 %v6142_v48, %v2914_v52 }
 0x625   :  { %v3312_v19 = vrot.slane %v3228_v63, 4  ;;  %v3314_v39 = vrot.slane %v3228_v63, 6 }
 0x626   :  { %v3471_v33 = vld [vmem:[#allocation1] sm:$0xff] }
 0x627   :  { %3472 = vst [vmem:[#allocation1] ss:$9 sm:$0xff] %v3292_v38  ;;  %v3307_v38 = vrot.slane %v3227_v22, 5 }
 0x628   :  { %3473 = vst [vmem:[#allocation1 + $0x1] ss:$9 sm:$0xff] %v3293_v10 }
 0x629   :  { %3474 = vst [vmem:[#allocation1 + $0x2] ss:$9 sm:$0xff] %v3294_v6  ;;  %v3310_v6 = vrot.slane %v3228_v63, 2 }
 0x62a   :  { %3475 = vst [vmem:[#allocation1 + $0x3] ss:$9 sm:$0xff] %v3295_v62  ;;  %v3311_v62 = vrot.slane %v3228_v63, 3 }
 0x62b   :  { %3476 = vst [vmem:[#allocation1 + $0x4] ss:$9 sm:$0xff] %v3296_v43  ;;  %v2788_v43 = vrot.slane %v5948_v26, 6 }
 0x62c   :  { %3477 = vst [vmem:[#allocation1 + $0x5] ss:$9 sm:$0xff] %v3226_v9  ;;  %v3309_v9 = vrot.slane %v3228_v63, 1 }
 0x62d   :  { %3478 = vst [vmem:[#allocation1 + $0x6] ss:$9 sm:$0xff] %v3297_v2  ;;  %v2915_v48 = vperm.slane %v2788_v43, 0 }
 0x62e   :  { %3479 = vst [vmem:[#allocation1 + $0x7] ss:$9 sm:$0xff] %v3298_v41  ;;  %v3313_v41 = vrot.slane %v3228_v63, 5 }
 0x62f   :  { %3707 = vst [vmem:[%s6461_s9 + $0x8] sm:$0xff] %v3471_v33  ;;  %v3308_v33 = vrot.slane %v3227_v22, 6  ;;  %v3229_v2 = vmul.f32 %v6161_v51, %v2915_v48  ;;  %v2790_v51 = vrot.slane %v5954_v4, 7  ;;  %v2917_v4 = vperm.slane %v5963_v40, 0 }
 0x631   :  { %v3318_v26 = vrot.slane %v3229_v2, 4 }
 0x635   :  { %v3480_v32 = vld [vmem:[#allocation1] sm:$0xff] }
 0x636   :  { %3481 = vst [vmem:[#allocation1] ss:$9 sm:$0xff] %v3299_v8  ;;  %v3315_v8 = vrot.slane %v3229_v2, 1 }
 0x637   :  { %3482 = vst [vmem:[#allocation1 + $0x1] ss:$9 sm:$0xff] %v3300_v57  ;;  %v3317_v57 = vrot.slane %v3229_v2, 3 }
 0x638   :  { %3483 = vst [vmem:[#allocation1 + $0x2] ss:$9 sm:$0xff] %v3301_v59  ;;  %v3320_v59 = vrot.slane %v3229_v2, 6 }
 0x639   :  { %3484 = vst [vmem:[#allocation1 + $0x3] ss:$9 sm:$0xff] %v3302_v13 }
 0x63a   :  { %3485 = vst [vmem:[#allocation1 + $0x4] ss:$9 sm:$0xff] %v3227_v22  ;;  %v3316_v22 = vrot.slane %v3229_v2, 2 }
 0x63b   :  { %3486 = vst [vmem:[#allocation1 + $0x5] ss:$9 sm:$0xff] %v3303_v42  ;;  %v2916_v42 = vperm.slane %v2790_v51, 0 }
 0x63c   :  { %3487 = vst [vmem:[#allocation1 + $0x6] ss:$9 sm:$0xff] %v3304_v31 }
 0x63d   :  { %3488 = vst [vmem:[#allocation1 + $0x7] ss:$9 sm:$0xff] %v3305_v20  ;;  %v3230_v31 = vmul.f32 %v6183_v21, %v2916_v42  ;;  %v2793_v21 = vrot.slane %v5966_v60, 1  ;;  %v2795_v60 = vrot.slane %v5969_v34, 2  ;;  %v2797_v34 = vrot.slane %v5972_v12, 3 }
 0x63e   :  { %3708 = vst [vmem:[%s6461_s9 + $0x10] sm:$0xff] %v3480_v32  ;;  %v3319_v32 = vrot.slane %v3229_v2, 5 }
 0x63f   :  { %v3321_v20 = vrot.slane %v3230_v31, 1  ;;  %v3322_v52 = vrot.slane %v3230_v31, 2 }
 0x644   :  { %v3489_v10 = vld [vmem:[#allocation1] sm:$0xff] }
 0x645   :  { %3490 = vst [vmem:[#allocation1] ss:$9 sm:$0xff] %v3306_v55  ;;  %v3324_v55 = vrot.slane %v3230_v31, 4 }
 0x646   :  { %3491 = vst [vmem:[#allocation1 + $0x1] ss:$9 sm:$0xff] %v3307_v38  ;;  %v3325_v38 = vrot.slane %v3230_v31, 5 }
 0x647   :  { %3492 = vst [vmem:[#allocation1 + $0x2] ss:$9 sm:$0xff] %v3308_v33  ;;  %v3231_v33 = vmul.f32 %v6192_v23, %v2917_v4  ;;  %v2799_v4 = vrot.slane %v5975_v14, 4 }
 0x648   :  { %3493 = vst [vmem:[#allocation1 + $0x3] ss:$9 sm:$0xff] %v3228_v63  ;;  %v3323_v63 = vrot.slane %v3230_v31, 3 }
 0x649   :  { %3494 = vst [vmem:[#allocation1 + $0x4] ss:$9 sm:$0xff] %v3309_v9  ;;  %v3327_v9 = vrot.slane %v3231_v33, 1  ;;  %v3329_v40 = vrot.slane %v3231_v33, 3  ;;  %v3330_v48 = vrot.slane %v3231_v33, 4  ;;  %v3331_v23 = vrot.slane %v3231_v33, 5 }
 0x64a   :  { %3495 = vst [vmem:[#allocation1 + $0x5] ss:$9 sm:$0xff] %v3310_v6  ;;  %v2918_v6 = vperm.slane %v2793_v21, 0 }
 0x64b   :  { %3496 = vst [vmem:[#allocation1 + $0x6] ss:$9 sm:$0xff] %v3311_v62  ;;  %v3328_v62 = vrot.slane %v3231_v33, 2 }
 0x64c   :  { %3497 = vst [vmem:[#allocation1 + $0x7] ss:$9 sm:$0xff] %v3312_v19  ;;  %v3232_v43 = vmul.f32 %v6201_v50, %v2918_v6 }
 0x64d   :  { %3709 = vst [vmem:[%s6461_s9 + $0x18] sm:$0xff] %v3489_v10  ;;  %v3326_v10 = vrot.slane %v3230_v31, 6 }
 0x64e   :  { %v3335_v50 = vrot.slane %v3232_v43, 3 }
 0x653   :  { %v3498_v36 = vld [vmem:[#allocation1] sm:$0xff] }
 0x654   :  { %3499 = vst [vmem:[#allocation1] ss:$9 sm:$0xff] %v3313_v41  ;;  %v3333_v41 = vrot.slane %v3232_v43, 1 }
 0x655   :  { %3500 = vst [vmem:[#allocation1 + $0x1] ss:$9 sm:$0xff] %v3314_v39  ;;  %v2919_v39 = vperm.slane %v2795_v60, 0 }
 0x656   :  { %3501 = vst [vmem:[#allocation1 + $0x2] ss:$9 sm:$0xff] %v3229_v2  ;;  %v3332_v2 = vrot.slane %v3231_v33, 6 }
 0x657   :  { %3502 = vst [vmem:[#allocation1 + $0x3] ss:$9 sm:$0xff] %v3315_v8 }
 0x658   :  { %3503 = vst [vmem:[#allocation1 + $0x4] ss:$9 sm:$0xff] %v3316_v22  ;;  %v3233_v22 = vmul.f32 %v6231_v0, %v2919_v39  ;;  %v2920_v0 = vperm.slane %v2797_v34, 0 }
 0x659   :  { %3504 = vst [vmem:[#allocation1 + $0x5] ss:$9 sm:$0xff] %v3317_v57  ;;  %v3336_v57 = vrot.slane %v3232_v43, 4 }
 0x65a   :  { %3505 = vst [vmem:[#allocation1 + $0x6] ss:$9 sm:$0xff] %v3318_v26  ;;  %v3337_v26 = vrot.slane %v3232_v43, 5  ;;  %v3339_v51 = vrot.slane %v3233_v22, 1  ;;  %v3234_v42 = vmul.f32 %v6240_v61, %v2920_v0  ;;  %v2921_v61 = vperm.slane %v2799_v4, 0 }
 0x65b   :  { %3506 = vst [vmem:[#allocation1 + $0x7] ss:$9 sm:$0xff] %v3319_v32  ;;  %v3338_v32 = vrot.slane %v3232_v43, 6 }
 0x65c   :  { %3710 = vst [vmem:[%s6461_s9 + $0x20] sm:$0xff] %v3498_v36  ;;  %v3334_v36 = vrot.slane %v3232_v43, 2  ;;  %v3347_v12 = vrot.slane %v3234_v42, 3 }
 0x662   :  { %v3507_v13 = vld [vmem:[#allocation1] sm:$0xff] }
 0x663   :  { %3508 = vst [vmem:[#allocation1] ss:$9 sm:$0xff] %v3320_v59  ;;  %v3340_v59 = vrot.slane %v3233_v22, 2 }
 0x664   :  { %3711 = vst [vmem:[%s6461_s9 + $0x28] sm:$0xff] %v3507_v13  ;;  %v3341_v13 = vrot.slane %v3233_v22, 3 }
 0x66a   :  { %v3509_v18 = vld [vmem:[#allocation1] sm:$0xff] }
 0x66b   :  { %3510 = vst [vmem:[#allocation1] ss:$9 sm:$0xff] %v3230_v31  ;;  %v3342_v31 = vrot.slane %v3233_v22, 4 }
 0x66c   :  { %3511 = vst [vmem:[#allocation1 + $0x1] ss:$9 sm:$0xff] %v3321_v20 }
 0x66d   :  { %3512 = vst [vmem:[#allocation1 + $0x2] ss:$9 sm:$0xff] %v3322_v52  ;;  %v3344_v52 = vrot.slane %v3233_v22, 6 }
 0x66e   :  { %3513 = vst [vmem:[#allocation1 + $0x3] ss:$9 sm:$0xff] %v3323_v63  ;;  %v3345_v63 = vrot.slane %v3234_v42, 1 }
 0x66f   :  { %3514 = vst [vmem:[#allocation1 + $0x4] ss:$9 sm:$0xff] %v3324_v55  ;;  %v3346_v55 = vrot.slane %v3234_v42, 2 }
 0x670   :  { %3515 = vst [vmem:[#allocation1 + $0x5] ss:$9 sm:$0xff] %v3325_v38  ;;  %v3235_v38 = vmul.f32 %v6249_v49, %v2921_v61 }
 0x671   :  { %3516 = vst [vmem:[#allocation1 + $0x6] ss:$9 sm:$0xff] %v3326_v10  ;;  %v3348_v10 = vrot.slane %v3234_v42, 4 }
 0x672   :  { %3517 = vst [vmem:[#allocation1 + $0x7] ss:$9 sm:$0xff] %v3231_v33  ;;  %v3349_v33 = vrot.slane %v3234_v42, 5  ;;  %v3351_v6 = vrot.slane %v3235_v38, 1  ;;  %v3354_v14 = vrot.slane %v3235_v38, 4 }
 0x673   :  { %3712 = vst [vmem:[%s6461_s9 + $0x30] sm:$0x1] %v3509_v18  ;;  %v3343_v18 = vrot.slane %v3233_v22, 5 }
 0x679   :  { %v3518_v19 = vld [vmem:[#allocation1] sm:$0xff] }
 0x67a   :  { %3519 = vst [vmem:[#allocation1] ss:$9 sm:$0xff] %v3327_v9  ;;  %v3350_v9 = vrot.slane %v3234_v42, 6 }
 0x67b   :  { %3520 = vst [vmem:[#allocation1 + $0x1] ss:$9 sm:$0xff] %v3328_v62  ;;  %v3352_v62 = vrot.slane %v3235_v38, 2 }
 0x67c   :  { %3521 = vst [vmem:[#allocation1 + $0x2] ss:$9 sm:$0xff] %v3329_v40  ;;  %v2801_v40 = vrot.slane %v5978_v17, 5 }
 0x67d   :  { %3522 = vst [vmem:[#allocation1 + $0x3] ss:$9 sm:$0xff] %v3330_v48  ;;  %v3355_v48 = vrot.slane %v3235_v38, 5 }
 0x67e   :  { %3523 = vst [vmem:[#allocation1 + $0x4] ss:$9 sm:$0xff] %v3331_v23  ;;  %v2922_v49 = vperm.slane %v2801_v40, 0  ;;  %v3356_v23 = vrot.slane %v3235_v38, 6 }
 0x67f   :  { %3524 = vst [vmem:[#allocation1 + $0x5] ss:$9 sm:$0xff] %v3332_v2 }
 0x680   :  { %3525 = vst [vmem:[#allocation1 + $0x6] ss:$9 sm:$0xff] %v3232_v43  ;;  %v3236_v43 = vmul.f32 %v6264_v7, %v2922_v49  ;;  %v2803_v7 = vrot.slane %v5981_v46, 6  ;;  %v2809_v49 = vsel %vm2189_vm2, %v5988_v27, %v5986_v3 }
 0x681   :  { %3526 = vst [vmem:[#allocation1 + $0x7] ss:$9 sm:$0xff] %v3333_v41 }
 0x682   :  { %3713 = vst [vmem:[%s6461_s9 + $0x38] sm:$0xff] %v3518_v19  ;;  %v3353_v19 = vrot.slane %v3235_v38, 3  ;;  %v3357_v41 = vrot.slane %v3236_v43, 1  ;;  %v3358_v60 = vrot.slane %v3236_v43, 2  ;;  %v3359_v39 = vrot.slane %v3236_v43, 3 }
 0x683   :  { %v3360_v17 = vrot.slane %v3236_v43, 4 }
 0x688   :  { %v3527_v8 = vld [vmem:[#allocation1] sm:$0xff] }
 0x689   :  { %3528 = vst [vmem:[#allocation1] ss:$9 sm:$0xff] %v3334_v36  ;;  %v3361_v36 = vrot.slane %v3236_v43, 5 }
 0x68a   :  { %3529 = vst [vmem:[#allocation1 + $0x1] ss:$9 sm:$0xff] %v3335_v50  ;;  %v3362_v50 = vrot.slane %v3236_v43, 6 }
 0x68b   :  { %3530 = vst [vmem:[#allocation1 + $0x2] ss:$9 sm:$0xff] %v3336_v57 }
 0x68c   :  { %3531 = vst [vmem:[#allocation1 + $0x3] ss:$9 sm:$0xff] %v3337_v26  ;;  %v2805_v26 = vrot.slane %v5984_v11, 7  ;;  %v2806_v11 = vsel %vm2775_vm10, %v5988_v27, %v5986_v3 }
 0x68d   :  { %3532 = vst [vmem:[#allocation1 + $0x4] ss:$9 sm:$0xff] %v3338_v32 }
 0x68e   :  { %3533 = vst [vmem:[#allocation1 + $0x5] ss:$9 sm:$0xff] %v3233_v22  ;;  %v2923_v22 = vperm.slane %v2803_v7, 0  ;;  %v2924_v46 = vperm.slane %v2805_v26, 0  ;;  %v2811_v7 = vsel %vm2192_vm3, %v5988_v27, %v5986_v3 }
 0x68f   :  { %3534 = vst [vmem:[#allocation1 + $0x6] ss:$9 sm:$0xff] %v3339_v51 }
 0x690   :  { %3535 = vst [vmem:[#allocation1 + $0x7] ss:$9 sm:$0xff] %v3340_v59  ;;  %v3237_v57 = vmul.f32 %v6267_v5, %v2923_v22  ;;  %v2812_v22 = vrot.slane %v2811_v7, 3 }
 0x691   :  { %3714 = vst [vmem:[%s6461_s9 + $0x40] sm:$0xff] %v3527_v8 }
 0x692   :  { %v3363_v32 = vrot.slane %v3237_v57, 1  ;;  %v3364_v59 = vrot.slane %v3237_v57, 2  ;;  %v3365_v34 = vrot.slane %v3237_v57, 3  ;;  %v3366_v0 = vrot.slane %v3237_v57, 4 }
 0x697   :  { %v3536_v20 = vld [vmem:[#allocation1] sm:$0xff] }
 0x698   :  { %3537 = vst [vmem:[#allocation1] ss:$9 sm:$0xff] %v3341_v13  ;;  %v3367_v13 = vrot.slane %v3237_v57, 5 }
 0x699   :  { %3538 = vst [vmem:[#allocation1 + $0x1] ss:$9 sm:$0xff] %v3342_v31  ;;  %v3238_v31 = vmul.f32 %v6269_v35, %v2924_v46 }
 0x69a   :  { %3539 = vst [vmem:[#allocation1 + $0x2] ss:$9 sm:$0xff] %v3343_v18 }
 0x69b   :  { %3540 = vst [vmem:[#allocation1 + $0x3] ss:$9 sm:$0xff] %v3344_v52  ;;  %v3369_v5 = vrot.slane %v3238_v31, 1  ;;  %v3370_v18 = vrot.slane %v3238_v31, 2  ;;  %v3372_v35 = vrot.slane %v3238_v31, 4  ;;  %v3374_v4 = vrot.slane %v3238_v31, 6 }
 0x69c   :  { %3541 = vst [vmem:[#allocation1 + $0x4] ss:$9 sm:$0xff] %v3234_v42  ;;  %v3368_v42 = vrot.slane %v3237_v57, 6 }
 0x69d   :  { %3542 = vst [vmem:[#allocation1 + $0x5] ss:$9 sm:$0xff] %v3345_v63  ;;  %v3371_v63 = vrot.slane %v3238_v31, 3 }
 0x69e   :  { %3543 = vst [vmem:[#allocation1 + $0x6] ss:$9 sm:$0xff] %v3346_v55 }
 0x69f   :  { %3544 = vst [vmem:[#allocation1 + $0x7] ss:$9 sm:$0xff] %v3347_v12  ;;  %v3373_v12 = vrot.slane %v3238_v31, 5 }
 0x6a0   :  { %3715 = vst [vmem:[%s6461_s9 + $0x48] sm:$0xff] %v3536_v20  ;;  %v2925_v20 = vperm.slane %v2806_v11, 0 }
 0x6a2   :  { %v3239_v55 = vmul.f32 %v6271_v16, %v2925_v20 }
 0x6a4   :  { %v3375_v61 = vrot.slane %v3239_v55, 1 }
 0x6a6   :  { %v3545_v21 = vld [vmem:[#allocation1] sm:$0xff] }
 0x6a7   :  { %3546 = vst [vmem:[#allocation1] ss:$9 sm:$0xff] %v3348_v10 }
 0x6a8   :  { %3547 = vst [vmem:[#allocation1 + $0x1] ss:$9 sm:$0xff] %v3349_v33  ;;  %v3376_v33 = vrot.slane %v3239_v55, 2 }
 0x6a9   :  { %3548 = vst [vmem:[#allocation1 + $0x2] ss:$9 sm:$0xff] %v3350_v9 }
 0x6aa   :  { %3549 = vst [vmem:[#allocation1 + $0x3] ss:$9 sm:$0xff] %v3235_v38  ;;  %v2807_v38 = vsel %vm2186_vm1, %v5988_v27, %v5986_v3 }
 0x6ab   :  { %3550 = vst [vmem:[#allocation1 + $0x4] ss:$9 sm:$0xff] %v3351_v6  ;;  %v2808_v16 = vrot.slane %v2807_v38, 1  ;;  %v2818_v38 = vrot.slane %v5998_v25, 6  ;;  %v2820_v25 = vrot.slane %v6003_v47, 7  ;;  %v2933_v47 = vperm.slane %v6019_v1, 0 }
 0x6ac   :  { %3551 = vst [vmem:[#allocation1 + $0x5] ss:$9 sm:$0xff] %v3352_v62  ;;  %v3378_v62 = vrot.slane %v3239_v55, 4 }
 0x6ad   :  { %3552 = vst [vmem:[#allocation1 + $0x6] ss:$9 sm:$0xff] %v3353_v19  ;;  %v2926_v10 = vperm.slane %v2808_v16, 0  ;;  %v3379_v19 = vrot.slane %v3239_v55, 5 }
 0x6ae   :  { %3553 = vst [vmem:[#allocation1 + $0x7] ss:$9 sm:$0xff] %v3354_v14  ;;  %v3380_v14 = vrot.slane %v3239_v55, 6 }
 0x6af   :  { %3716 = vst [vmem:[%s6461_s9 + $0x50] sm:$0xff] %v3545_v21  ;;  %v3377_v21 = vrot.slane %v3239_v55, 3  ;;  %v3240_v6 = vmul.f32 %v6273_v53, %v2926_v10 }
 0x6b1   :  { %v3381_v40 = vrot.slane %v3240_v6, 1 }
 0x6b5   :  { %v3554_v2 = vld [vmem:[#allocation1] sm:$0xff] }
 0x6b6   :  { %3555 = vst [vmem:[#allocation1] ss:$9 sm:$0xff] %v3355_v48  ;;  %v2810_v48 = vrot.slane %v2809_v49, 2 }
 0x6b7   :  { %3556 = vst [vmem:[#allocation1 + $0x1] ss:$9 sm:$0xff] %v3356_v23  ;;  %v3383_v23 = vrot.slane %v3240_v6, 3 }
 0x6b8   :  { %3557 = vst [vmem:[#allocation1 + $0x2] ss:$9 sm:$0xff] %v3236_v43  ;;  %v3382_v43 = vrot.slane %v3240_v6, 2  ;;  %v2927_v53 = vperm.slane %v2810_v48, 0 }
 0x6b9   :  { %3558 = vst [vmem:[#allocation1 + $0x3] ss:$9 sm:$0xff] %v3357_v41  ;;  %v3384_v41 = vrot.slane %v3240_v6, 4 }
 0x6ba   :  { %3559 = vst [vmem:[#allocation1 + $0x4] ss:$9 sm:$0xff] %v3358_v60 }
 0x6bb   :  { %3560 = vst [vmem:[#allocation1 + $0x5] ss:$9 sm:$0xff] %v3359_v39  ;;  %v3385_v39 = vrot.slane %v3240_v6, 5 }
 0x6bc   :  { %3561 = vst [vmem:[#allocation1 + $0x6] ss:$9 sm:$0xff] %v3360_v17  ;;  %v3386_v17 = vrot.slane %v3240_v6, 6 }
 0x6bd   :  { %3562 = vst [vmem:[#allocation1 + $0x7] ss:$9 sm:$0xff] %v3361_v36 }
 0x6be   :  { %3717 = vst [vmem:[%s6461_s9 + $0x58] sm:$0xff] %v3554_v2  ;;  %v3241_v2 = vmul.f32 %v6275_v58, %v2927_v53  ;;  %v2928_v58 = vperm.slane %v2812_v22, 0  ;;  %v6897_v22 = vld [vmem:[#allocation6_spill] sm:$0xff] }
 0x6bf   :  { %v2823_v1 = vrot.slane %v6897_v22, 1 }
 0x6c0   :  { %v3387_v36 = vrot.slane %v3241_v2, 1  ;;  %v3390_v26 = vrot.slane %v3241_v2, 4 }
 0x6c4   :  { %v3563_v8 = vld [vmem:[#allocation1] sm:$0xff] }
 0x6c5   :  { %3564 = vst [vmem:[#allocation1] ss:$9 sm:$0xff] %v3362_v50  ;;  %v3388_v50 = vrot.slane %v3241_v2, 2 }
 0x6c6   :  { %3718 = vst [vmem:[%s6461_s9 + $0x60] sm:$0xff] %v3563_v8  ;;  %v3389_v8 = vrot.slane %v3241_v2, 3 }
 0x6cc   :  { %v3565_v51 = vld [vmem:[#allocation1] sm:$0xff] }
 0x6cd   :  { %3566 = vst [vmem:[#allocation1] ss:$9 sm:$0xff] %v3237_v57  ;;  %v3242_v57 = vmul.f32 %v6277_v30, %v2928_v58 }
 0x6ce   :  { %3567 = vst [vmem:[#allocation1 + $0x1] ss:$9 sm:$0xff] %v3363_v32  ;;  %v3391_v32 = vrot.slane %v3241_v2, 5 }
 0x6cf   :  { %3568 = vst [vmem:[#allocation1 + $0x2] ss:$9 sm:$0xff] %v3364_v59  ;;  %v3392_v59 = vrot.slane %v3241_v2, 6  ;;  %v3394_v46 = vrot.slane %v3242_v57, 2  ;;  %v3398_v20 = vrot.slane %v3242_v57, 6 }
 0x6d0   :  { %3569 = vst [vmem:[#allocation1 + $0x3] ss:$9 sm:$0xff] %v3365_v34  ;;  %v3393_v34 = vrot.slane %v3242_v57, 1 }
 0x6d1   :  { %3570 = vst [vmem:[#allocation1 + $0x4] ss:$9 sm:$0xff] %v3366_v0  ;;  %v2813_v0 = vsel %vm2195_vm4, %v5988_v27, %v5986_v3 }
 0x6d2   :  { %3571 = vst [vmem:[#allocation1 + $0x5] ss:$9 sm:$0xff] %v3367_v13  ;;  %v3395_v13 = vrot.slane %v3242_v57, 3 }
 0x6d3   :  { %3572 = vst [vmem:[#allocation1 + $0x6] ss:$9 sm:$0xff] %v3368_v42  ;;  %v3396_v42 = vrot.slane %v3242_v57, 4 }
 0x6d4   :  { %3573 = vst [vmem:[#allocation1 + $0x7] ss:$9 sm:$0xff] %v3238_v31  ;;  %v2814_v31 = vrot.slane %v2813_v0, 4 }
 0x6d5   :  { %3719 = vst [vmem:[%s6461_s9 + $0x68] sm:$0x1] %v3565_v51 }
 0x6d6   :  { %v2929_v30 = vperm.slane %v2814_v31, 0 }
 0x6d8   :  { %v3243_v11 = vmul.f32 %v6285_v56, %v2929_v30  ;;  %v2816_v56 = vrot.slane %v5993_v37, 5  ;;  %v2931_v37 = vperm.slane %v2818_v38, 0 }
 0x6da   :  { %v3399_v3 = vrot.slane %v3243_v11, 1  ;;  %v3400_v27 = vrot.slane %v3243_v11, 2 }
 0x6db   :  { %v3574_v52 = vld [vmem:[#allocation1] sm:$0xff] }
 0x6dc   :  { %3575 = vst [vmem:[#allocation1] ss:$9 sm:$0xff] %v3369_v5  ;;  %v3397_v5 = vrot.slane %v3242_v57, 5 }
 0x6dd   :  { %3576 = vst [vmem:[#allocation1 + $0x1] ss:$9 sm:$0xff] %v3370_v18 }
 0x6de   :  { %3577 = vst [vmem:[#allocation1 + $0x2] ss:$9 sm:$0xff] %v3371_v63  ;;  %v3402_v63 = vrot.slane %v3243_v11, 4 }
 0x6df   :  { %3578 = vst [vmem:[#allocation1 + $0x3] ss:$9 sm:$0xff] %v3372_v35  ;;  %v3404_v35 = vrot.slane %v3243_v11, 6 }
 0x6e0   :  { %3579 = vst [vmem:[#allocation1 + $0x4] ss:$9 sm:$0xff] %v3373_v12 }
 0x6e1   :  { %3580 = vst [vmem:[#allocation1 + $0x5] ss:$9 sm:$0xff] %v3374_v4  ;;  %v2930_v4 = vperm.slane %v2816_v56, 0 }
 0x6e2   :  { %3581 = vst [vmem:[#allocation1 + $0x6] ss:$9 sm:$0xff] %v3239_v55  ;;  %v3403_v55 = vrot.slane %v3243_v11, 5 }
 0x6e3   :  { %3582 = vst [vmem:[#allocation1 + $0x7] ss:$9 sm:$0xff] %v3375_v61  ;;  %v3244_v61 = vmul.f32 %v6288_v24, %v2930_v4 }
 0x6e4   :  { %3720 = vst [vmem:[%s6461_s9 + $0x70] sm:$0xff] %v3574_v52  ;;  %v3401_v52 = vrot.slane %v3243_v11, 3 }
 0x6e5   :  { %v3405_v16 = vrot.slane %v3244_v61, 1 }
 0x6ea   :  { %v3583_v9 = vld [vmem:[#allocation1] sm:$0xff] }
 0x6eb   :  { %3584 = vst [vmem:[#allocation1] ss:$9 sm:$0xff] %v3376_v33  ;;  %v3406_v33 = vrot.slane %v3244_v61, 2 }
 0x6ec   :  { %3585 = vst [vmem:[#allocation1 + $0x1] ss:$9 sm:$0xff] %v3377_v21  ;;  %v3407_v21 = vrot.slane %v3244_v61, 3 }
 0x6ed   :  { %3586 = vst [vmem:[#allocation1 + $0x2] ss:$9 sm:$0xff] %v3378_v62  ;;  %v3410_v62 = vrot.slane %v3244_v61, 6 }
 0x6ee   :  { %3587 = vst [vmem:[#allocation1 + $0x3] ss:$9 sm:$0xff] %v3379_v19  ;;  %v3245_v19 = vmul.f32 %v6290_v29, %v2931_v37 }
 0x6ef   :  { %3588 = vst [vmem:[#allocation1 + $0x4] ss:$9 sm:$0xff] %v3380_v14  ;;  %v2932_v14 = vperm.slane %v2820_v25, 0 }
 0x6f0   :  { %3589 = vst [vmem:[#allocation1 + $0x5] ss:$9 sm:$0xff] %v3240_v6  ;;  %v3409_v6 = vrot.slane %v3244_v61, 5  ;;  %v3411_v24 = vrot.slane %v3245_v19, 1  ;;  %v3414_v53 = vrot.slane %v3245_v19, 4  ;;  %v3415_v29 = vrot.slane %v3245_v19, 5 }
 0x6f1   :  { %3590 = vst [vmem:[#allocation1 + $0x6] ss:$9 sm:$0xff] %v3381_v40  ;;  %v3412_v40 = vrot.slane %v3245_v19, 2  ;;  %v3246_v48 = vmul.f32 %v6292_v45, %v2932_v14 }
 0x6f2   :  { %3591 = vst [vmem:[#allocation1 + $0x7] ss:$9 sm:$0xff] %v3382_v43  ;;  %v3413_v43 = vrot.slane %v3245_v19, 3 }
 0x6f3   :  { %3721 = vst [vmem:[%s6461_s9 + $0x78] sm:$0xff] %v3583_v9  ;;  %v3408_v9 = vrot.slane %v3244_v61, 4  ;;  %v3422_v7 = vrot.slane %v3246_v48, 6 }
 0x6f9   :  { %v3592_v60 = vld [vmem:[#allocation1] sm:$0xff] }
 0x6fa   :  { %3593 = vst [vmem:[#allocation1] ss:$9 sm:$0xff] %v3383_v23  ;;  %v3416_v23 = vrot.slane %v3245_v19, 6 }
 0x6fb   :  { %3594 = vst [vmem:[#allocation1 + $0x1] ss:$9 sm:$0xff] %v3384_v41  ;;  %v3418_v41 = vrot.slane %v3246_v48, 2 }
 0x6fc   :  { %3595 = vst [vmem:[#allocation1 + $0x2] ss:$9 sm:$0xff] %v3385_v39  ;;  %v3247_v39 = vmul.f32 %v6294_v54, %v2933_v47  ;;  %v2934_v54 = vperm.slane %v2823_v1, 0 }
 0x6fd   :  { %3596 = vst [vmem:[#allocation1 + $0x3] ss:$9 sm:$0xff] %v3386_v17  ;;  %v3420_v17 = vrot.slane %v3246_v48, 4 }
 0x6fe   :  { %3597 = vst [vmem:[#allocation1 + $0x4] ss:$9 sm:$0xff] %v3241_v2  ;;  %v3417_v2 = vrot.slane %v3246_v48, 1  ;;  %v3425_v58 = vrot.slane %v3247_v39, 3 }
 0x6ff   :  { %3598 = vst [vmem:[#allocation1 + $0x5] ss:$9 sm:$0xff] %v3387_v36  ;;  %v3421_v36 = vrot.slane %v3246_v48, 5 }
 0x700   :  { %3599 = vst [vmem:[#allocation1 + $0x6] ss:$9 sm:$0xff] %v3388_v50  ;;  %v3423_v50 = vrot.slane %v3247_v39, 1 }
 0x701   :  { %3600 = vst [vmem:[#allocation1 + $0x7] ss:$9 sm:$0xff] %v3389_v8  ;;  %v3424_v8 = vrot.slane %v3247_v39, 2 }
 0x702   :  { %3722 = vst [vmem:[%s6461_s9 + $0x80] sm:$0xff] %v3592_v60  ;;  %v3419_v60 = vrot.slane %v3246_v48, 3 }
 0x708   :  { %v3601_v51 = vld [vmem:[#allocation1] sm:$0xff] }
 0x709   :  { %3602 = vst [vmem:[#allocation1] ss:$9 sm:$0xff] %v3390_v26  ;;  %v3426_v26 = vrot.slane %v3247_v39, 4 }
 0x70a   :  { %3603 = vst [vmem:[#allocation1 + $0x1] ss:$9 sm:$0xff] %v3391_v32 }
 0x70b   :  { %3604 = vst [vmem:[#allocation1 + $0x2] ss:$9 sm:$0xff] %v3392_v59  ;;  %v3428_v59 = vrot.slane %v3247_v39, 6 }
 0x70c   :  { %3605 = vst [vmem:[#allocation1 + $0x3] ss:$9 sm:$0xff] %v3242_v57  ;;  %v3248_v57 = vmul.f32 %v6296_v28, %v2934_v54 }
 0x70d   :  { %3606 = vst [vmem:[#allocation1 + $0x4] ss:$9 sm:$0xff] %v3393_v34 }
 0x70e   :  { %3607 = vst [vmem:[#allocation1 + $0x5] ss:$9 sm:$0xff] %v3394_v46  ;;  %v3429_v34 = vrot.slane %v3248_v57, 1  ;;  %v3430_v0 = vrot.slane %v3248_v57, 2  ;;  %v3431_v46 = vrot.slane %v3248_v57, 3  ;;  %v3432_v30 = vrot.slane %v3248_v57, 4 }
 0x70f   :  { %3608 = vst [vmem:[#allocation1 + $0x6] ss:$9 sm:$0xff] %v3395_v13  ;;  %v6898_v13 = vld [vmem:[#allocation7_spill] sm:$0xff] }
 0x710   :  { %3609 = vst [vmem:[#allocation1 + $0x7] ss:$9 sm:$0xff] %v3396_v42  ;;  %v2825_v42 = vrot.slane %v6898_v13, 2 }
 0x711   :  { %3723 = vst [vmem:[%s6461_s9 + $0x88] sm:$0xff] %v3601_v51  ;;  %v3427_v51 = vrot.slane %v3247_v39, 5 }
 0x712   :  { %v2935_v28 = vperm.slane %v2825_v42, 0 }
 0x714   :  { %v3249_v31 = vmul.f32 %v6298_v44, %v2935_v28 }
 0x717   :  { %v3610_v18 = vld [vmem:[#allocation1] sm:$0xff] }
 0x718   :  { %3611 = vst [vmem:[#allocation1] ss:$9 sm:$0xff] %v3397_v5 }
 0x719   :  { %3612 = vst [vmem:[#allocation1 + $0x1] ss:$9 sm:$0xff] %v3398_v20  ;;  %v3434_v20 = vrot.slane %v3248_v57, 6 }
 0x71a   :  { %3613 = vst [vmem:[#allocation1 + $0x2] ss:$9 sm:$0xff] %v3243_v11  ;;  %v3433_v11 = vrot.slane %v3248_v57, 5 }
 0x71b   :  { %3614 = vst [vmem:[#allocation1 + $0x3] ss:$9 sm:$0xff] %v3399_v3  ;;  %v3436_v3 = vrot.slane %v3249_v31, 2 }
 0x71c   :  { %3615 = vst [vmem:[#allocation1 + $0x4] ss:$9 sm:$0xff] %v3400_v27  ;;  %v3437_v27 = vrot.slane %v3249_v31, 3 }
 0x71d   :  { %3616 = vst [vmem:[#allocation1 + $0x5] ss:$9 sm:$0xff] %v3401_v52  ;;  %v3438_v52 = vrot.slane %v3249_v31, 4 }
 0x71e   :  { %3617 = vst [vmem:[#allocation1 + $0x6] ss:$9 sm:$0xff] %v3402_v63  ;;  %v6899_v63 = vld [vmem:[#allocation8_spill] sm:$0xff] }
 0x71f   :  { %3618 = vst [vmem:[#allocation1 + $0x7] ss:$9 sm:$0xff] %v3403_v55  ;;  %v2827_v55 = vrot.slane %v6899_v63, 3 }
 0x720   :  { %3724 = vst [vmem:[%s6461_s9 + $0x90] sm:$0xff] %v3610_v18  ;;  %v3435_v18 = vrot.slane %v3249_v31, 1 }
 0x721   :  { %v2936_v44 = vperm.slane %v2827_v55, 0 }
 0x723   :  { %v3250_v56 = vmul.f32 %v6303_v15, %v2936_v44 }
 0x725   :  { %v3442_v38 = vrot.slane %v3250_v56, 2  ;;  %v3446_v15 = vrot.slane %v3250_v56, 6 }
 0x726   :  { %v3619_v12 = vld [vmem:[#allocation1] sm:$0xff] }
 0x727   :  { %3620 = vst [vmem:[#allocation1] ss:$9 sm:$0xff] %v3404_v35  ;;  %v3439_v35 = vrot.slane %v3249_v31, 5 }
 0x728   :  { %3725 = vst [vmem:[%s6461_s9 + $0x98] sm:$0xff] %v3619_v12  ;;  %v3440_v12 = vrot.slane %v3249_v31, 6 }
 0x72e   :  { %v3621_v10 = vld [vmem:[#allocation1] sm:$0xff] }
 0x72f   :  { %3622 = vst [vmem:[#allocation1] ss:$9 sm:$0xff] %v3244_v61  ;;  %v3441_v61 = vrot.slane %v3250_v56, 1 }
 0x730   :  { %3623 = vst [vmem:[#allocation1 + $0x1] ss:$9 sm:$0xff] %v3405_v16  ;;  %v3443_v16 = vrot.slane %v3250_v56, 3 }
 0x731   :  { %3624 = vst [vmem:[#allocation1 + $0x2] ss:$9 sm:$0xff] %v3406_v33  ;;  %v3445_v33 = vrot.slane %v3250_v56, 5 }
 0x732   :  { %3625 = vst [vmem:[#allocation1 + $0x3] ss:$9 sm:$0xff] %v3407_v21 }
 0x733   :  { %3626 = vst [vmem:[#allocation1 + $0x4] ss:$9 sm:$0xff] %v3408_v9 }
 0x734   :  { %3627 = vst [vmem:[#allocation1 + $0x5] ss:$9 sm:$0xff] %v3409_v6 }
 0x735   :  { %3628 = vst [vmem:[#allocation1 + $0x6] ss:$9 sm:$0xff] %v3410_v62 }
 0x736   :  { %3629 = vst [vmem:[#allocation1 + $0x7] ss:$9 sm:$0xff] %v3245_v19 }
 0x737   :  { %3726 = vst [vmem:[%s6461_s9 + $0xa0] sm:$0x1] %v3621_v10  ;;  %v3444_v10 = vrot.slane %v3250_v56, 4 }
 0x73d   :  { %v3630_v49 = vld [vmem:[#allocation1] sm:$0xff] }
 0x73e   :  { %3631 = vst [vmem:[#allocation1] ss:$9 sm:$0xff] %v3411_v24 }
 0x73f   :  { %3632 = vst [vmem:[#allocation1 + $0x1] ss:$9 sm:$0xff] %v3412_v40 }
 0x740   :  { %3633 = vst [vmem:[#allocation1 + $0x2] ss:$9 sm:$0xff] %v3413_v43 }
 0x741   :  { %3634 = vst [vmem:[#allocation1 + $0x3] ss:$9 sm:$0xff] %v3414_v53 }
 0x742   :  { %3635 = vst [vmem:[#allocation1 + $0x4] ss:$9 sm:$0xff] %v3415_v29 }
 0x743   :  { %3636 = vst [vmem:[#allocation1 + $0x5] ss:$9 sm:$0xff] %v3416_v23 }
 0x744   :  { %3637 = vst [vmem:[#allocation1 + $0x6] ss:$9 sm:$0xff] %v3246_v48 }
 0x745   :  { %3638 = vst [vmem:[#allocation1 + $0x7] ss:$9 sm:$0xff] %v3417_v2 }
 0x746   :  { %3727 = vst [vmem:[%s6461_s9 + $0xa8] sm:$0xff] %v3630_v49 }
 0x74c   :  { %v3639_v45 = vld [vmem:[#allocation1] sm:$0xff] }
 0x74d   :  { %3640 = vst [vmem:[#allocation1] ss:$9 sm:$0xff] %v3418_v41 }
 0x74e   :  { %3641 = vst [vmem:[#allocation1 + $0x1] ss:$9 sm:$0xff] %v3419_v60 }
 0x74f   :  { %3642 = vst [vmem:[#allocation1 + $0x2] ss:$9 sm:$0xff] %v3420_v17 }
 0x750   :  { %3643 = vst [vmem:[#allocation1 + $0x3] ss:$9 sm:$0xff] %v3421_v36 }
 0x751   :  { %3644 = vst [vmem:[#allocation1 + $0x4] ss:$9 sm:$0xff] %v3422_v7 }
 0x752   :  { %3645 = vst [vmem:[#allocation1 + $0x5] ss:$9 sm:$0xff] %v3247_v39 }
 0x753   :  { %3646 = vst [vmem:[#allocation1 + $0x6] ss:$9 sm:$0xff] %v3423_v50 }
 0x754   :  { %3647 = vst [vmem:[#allocation1 + $0x7] ss:$9 sm:$0xff] %v3424_v8 }
 0x755   :  { %3728 = vst [vmem:[%s6461_s9 + $0xb0] sm:$0xff] %v3639_v45 }
 0x75b   :  { %v3648_v32 = vld [vmem:[#allocation1] sm:$0xff] }
 0x75c   :  { %3649 = vst [vmem:[#allocation1] ss:$9 sm:$0xff] %v3425_v58 }
 0x75d   :  { %3650 = vst [vmem:[#allocation1 + $0x1] ss:$9 sm:$0xff] %v3426_v26 }
 0x75e   :  { %3651 = vst [vmem:[#allocation1 + $0x2] ss:$9 sm:$0xff] %v3427_v51 }
 0x75f   :  { %3652 = vst [vmem:[#allocation1 + $0x3] ss:$9 sm:$0xff] %v3428_v59 }
 0x760   :  { %3653 = vst [vmem:[#allocation1 + $0x4] ss:$9 sm:$0xff] %v3248_v57 }
 0x761   :  { %3654 = vst [vmem:[#allocation1 + $0x5] ss:$9 sm:$0xff] %v3429_v34 }
 0x762   :  { %3655 = vst [vmem:[#allocation1 + $0x6] ss:$9 sm:$0xff] %v3430_v0 }
 0x763   :  { %3656 = vst [vmem:[#allocation1 + $0x7] ss:$9 sm:$0xff] %v3431_v46 }
 0x764   :  { %3729 = vst [vmem:[%s6461_s9 + $0xb8] sm:$0xff] %v3648_v32 }
 0x76a   :  { %v3657_v5 = vld [vmem:[#allocation1] sm:$0xff] }
 0x76b   :  { %3658 = vst [vmem:[#allocation1] ss:$9 sm:$0xff] %v3432_v30 }
 0x76c   :  { %3659 = vst [vmem:[#allocation1 + $0x1] ss:$9 sm:$0xff] %v3433_v11 }
 0x76d   :  { %3660 = vst [vmem:[#allocation1 + $0x2] ss:$9 sm:$0xff] %v3434_v20 }
 0x76e   :  { %3661 = vst [vmem:[#allocation1 + $0x3] ss:$9 sm:$0xff] %v3249_v31 }
 0x76f   :  { %3662 = vst [vmem:[#allocation1 + $0x4] ss:$9 sm:$0xff] %v3435_v18 }
 0x770   :  { %3663 = vst [vmem:[#allocation1 + $0x5] ss:$9 sm:$0xff] %v3436_v3 }
 0x771   :  { %3664 = vst [vmem:[#allocation1 + $0x6] ss:$9 sm:$0xff] %v3437_v27 }
 0x772   :  { %3665 = vst [vmem:[#allocation1 + $0x7] ss:$9 sm:$0xff] %v3438_v52 }
 0x773   :  { %3730 = vst [vmem:[%s6461_s9 + $0xc0] sm:$0xff] %v3657_v5 }
 0x779   :  { %v3666_v4 = vld [vmem:[#allocation1] sm:$0xff] }
 0x77a   :  { %3667 = vst [vmem:[#allocation1] ss:$9 sm:$0xff] %v3439_v35 }
 0x77b   :  { %3668 = vst [vmem:[#allocation1 + $0x1] ss:$9 sm:$0xff] %v3440_v12 }
 0x77c   :  { %3669 = vst [vmem:[#allocation1 + $0x2] ss:$9 sm:$0xff] %v3250_v56 }
 0x77d   :  { %3670 = vst [vmem:[#allocation1 + $0x3] ss:$9 sm:$0xff] %v3441_v61 }
 0x77e   :  { %3671 = vst [vmem:[#allocation1 + $0x4] ss:$9 sm:$0xff] %v3442_v38 }
 0x77f   :  { %3672 = vst [vmem:[#allocation1 + $0x5] ss:$9 sm:$0xff] %v3443_v16 }
 0x780   :  { %3673 = vst [vmem:[#allocation1 + $0x6] ss:$9 sm:$0xff] %v3444_v10 }
 0x781   :  { %3674 = vst [vmem:[#allocation1 + $0x7] ss:$9 sm:$0xff] %v3445_v33 }
 0x782   :  { %3731 = vst [vmem:[%s6461_s9 + $0xc8] sm:$0xff] %v3666_v4 }
 0x788   :  { %v3675_v21 = vld [vmem:[#allocation1] sm:$0xff] }
 0x789   :  { %3676 = vst [vmem:[#allocation1] ss:$9 sm:$0xff] %v3446_v15 }
 0x78a   :  { %3732 = vst [vmem:[%s6461_s9 + $0xd0] sm:$0xff] %v3675_v21 }
 0x790   :  { %v3677_v9 = vld [vmem:[#allocation1] sm:$0xff] }
 0x791   :  { %3733 = vst [vmem:[%s6461_s9 + $0xd8] sm:$0x1] %v3677_v9 }

</bundles_post_ra>
